<compile_context>
chip_gen: v7x
topology: tpu7x:2x2x1
jax: 0.10.0
libtpu: 0.0.40
codegen_flags: <defaults>
</compile_context>

<pallas_src>
import jax
import jax.numpy as jnp
import numpy as np
from jax import lax
from jax.experimental import pallas as pl
from jax.experimental.pallas import tpu as pltpu

L_IN = 57       # input sequence length
K_IN = 64       # lane-friendly padded input width (rows 57..63 of W1 are zero)
L1 = 28         # length after conv1 and both "same" convs
L_POOL = 14     # length after MaxPool1d(2, 2)
HALF = 768      # lane-aligned half width holding the 700 even (resp. odd) time-step cols
N1 = 384        # conv1 output width  (280 real columns, zero-padded to 3*128)
N2 = 640        # conv2 output width  (560 real columns, zero-padded to 5*128)
ND1 = 256       # dense1 output width (140 real columns)
ND2 = 128       # dense2 output width (50 real columns)


def _fused_kernel(x_ref, w1_ref, b1_ref, w2_ref, b2_ref, w3_ref, b3_ref,
                  wd1_ref, bd1_ref, wd2_ref, bd2_ref, wd3_ref, bd3_ref, o_ref):
    """Whole ConvNet forward for one batch tile: conv stack + pool + dense head."""
    f32 = jnp.float32

    def mm(a, w_ref):
        # bf16 MXU feed, f32 accumulation.
        return jnp.dot(a.astype(jnp.bfloat16), w_ref[...], preferred_element_type=f32)

    h = jnp.maximum(mm(x_ref[...], w1_ref) + b1_ref[...], 0.0)   # conv1 + ReLU -> (TB, 384)
    h = jnp.maximum(mm(h, w2_ref) + b2_ref[...], 0.0)            # conv2 + ReLU -> (TB, 640)
    h3 = mm(h, w3_ref)                                           # conv3 pre-bias -> (TB, 1536)
    # MaxPool1d(2,2) fused with conv3's bias + ReLU: even/odd time steps live in
    # the two lane-aligned 768-wide halves and share the same bias, and
    # max/relu/(+bias) commute, so one half-width bias+ReLU after the max suffices.
    h = jnp.maximum(jnp.maximum(h3[:, :HALF], h3[:, HALF:]) + b3_ref[...], 0.0)  # (TB, 768)
    # TODO(synk): nn.Dropout(p=0.2) is identity in eval/inference mode; the
    # training-mode stochastic mask is intentionally not implemented.
    h = jnp.maximum(mm(h, wd1_ref) + bd1_ref[...], 0.0)          # dense1 + ReLU -> (TB, 256)
    h = jnp.maximum(mm(h, wd2_ref) + bd2_ref[...], 0.0)          # dense2 + ReLU -> (TB, 128)
    o_ref[...] = mm(h, wd3_ref) + bd3_ref[...]                   # logits -> (TB, 2)


def _fold_params(params):
    """Fold PyTorch conv/dense params into lane-aligned matmul weights (trace-time)."""
    (w1, b1, w2, b2, w3, b3, wd1, bd1, wd2, bd2, wd3, bd3) = params
    f32, bf16 = jnp.float32, jnp.bfloat16

    def pad_row(vec, n):
        v = vec.reshape(1, -1)
        return jnp.pad(v, ((0, 0), (0, n - v.shape[1])))

    # conv1 (10,1,3), stride 2, no pad:  W1[2t+k, c*28+t] = w1[c,0,k]
    # (rows 57..63 and cols 280..383 stay zero -> lane-aligned, math unchanged).
    k, c, t = jnp.meshgrid(jnp.arange(3), jnp.arange(10), jnp.arange(L1), indexing="ij")
    W1 = jnp.zeros((K_IN, N1), f32).at[2 * t + k, c * L1 + t].add(w1[c, 0, k])
    B1 = pad_row(jnp.repeat(b1, L1), N1)

    # conv2 (20,10,3), pad 1:  W2[ci*28+s, co*28+t] = w2[co,ci,k], s = t+k-1 (zero-padded)
    k, ci, co, t = jnp.meshgrid(jnp.arange(3), jnp.arange(10), jnp.arange(20),
                                jnp.arange(L1), indexing="ij")
    s = t + k - 1
    ok = (s >= 0) & (s < L1)
    W2 = jnp.zeros((N1, N2), f32).at[
        ci * L1 + jnp.clip(s, 0, L1 - 1), co * L1 + t
    ].add(jnp.where(ok, w2[co, ci, k], 0.0))
    B2 = pad_row(jnp.repeat(b2, L1), N2)

    # conv3 (50,20,3), pad 1, with output columns permuted so that
    # col = (t%2)*768 + c*14 + t//2  (even times in [0,768), odd times in [768,1536)).
    k, ci, co, t = jnp.meshgrid(jnp.arange(3), jnp.arange(20), jnp.arange(50),
                                jnp.arange(L1), indexing="ij")
    s = t + k - 1
    ok = (s >= 0) & (s < L1)
    col = (t % 2) * HALF + co * L_POOL + t // 2
    W3 = jnp.zeros((N2, 2 * HALF), f32).at[
        ci * L1 + jnp.clip(s, 0, L1 - 1), col
    ].add(jnp.where(ok, w3[co, ci, k], 0.0))
    # Half-width bias shared by the even/odd halves (applied after the pool max).
    B3 = pad_row(jnp.repeat(b3, L_POOL), HALF)

    # Dense head folded over the zero-padded layouts; pooled column c*14+j is
    # exactly PyTorch's view(-1, 50*14) feature order.
    Wd1 = jnp.zeros((HALF, ND1), f32).at[:50 * L_POOL, :140].set(wd1.T)
    Bd1 = pad_row(bd1, ND1)
    Wd2 = jnp.zeros((ND1, ND2), f32).at[:140, :50].set(wd2.T)
    Bd2 = pad_row(bd2, ND2)
    Wd3 = jnp.zeros((ND2, 2), f32).at[:50, :].set(wd3.T)
    Bd3 = bd3.reshape(1, -1)

    weights = tuple(w.astype(bf16) for w in (W1, W2, W3, Wd1, Wd2, Wd3))
    biases = (B1, B2, B3, Bd1, Bd2, Bd3)
    return weights, biases


def _round_up(a, m):
    return ((a + m - 1) // m) * m


def convnet_forward(x, params, block_b=512):
    n = x.shape[0]
    (W1, W2, W3, Wd1, Wd2, Wd3), (B1, B2, B3, Bd1, Bd2, Bd3) = _fold_params(params)

    # Batch tile: at least 128 rows (>= bf16 min tile, fills the MXU M dim), at
    # most block_b, and sized ~ceil(n/2) so that whenever n > 128 the grid has
    # >= 2 steps and both v7x TensorCores get work (harmless on v5e/v6e).
    tb = min(block_b, max(128, _round_up(pl.cdiv(n, 2), 128)))
    n_pad = _round_up(n, tb)

    x2 = x.reshape(n, L_IN).astype(jnp.bfloat16)
    x2 = jnp.pad(x2, ((0, n_pad - n), (0, K_IN - L_IN)))   # pad rows + K 57->64

    const = lambda i: (0, 0)
    # Grid-invariant weights/biases: constant index_map keeps them VMEM-resident
    # across grid steps; single-buffer them so they don't pay the double-buffer
    # VMEM tax (no re-DMA happens anyway).
    cspec = lambda a: pl.BlockSpec(a.shape, const, pipeline_mode=pl.Buffered(1))

    logits = pl.pallas_call(
        _fused_kernel,
        out_shape=jax.ShapeDtypeStruct((n_pad, 2), jnp.float32),
        grid=(n_pad // tb,),
        in_specs=[
            pl.BlockSpec((tb, K_IN), lambda i: (i, 0)),
            cspec(W1), cspec(B1), cspec(W2), cspec(B2), cspec(W3), cspec(B3),
            cspec(Wd1), cspec(Bd1), cspec(Wd2), cspec(Bd2), cspec(Wd3), cspec(Bd3),
        ],
        out_specs=pl.BlockSpec((tb, 2), lambda i: (i, 0)),
        compiler_params=pltpu.CompilerParams(
            dimension_semantics=("parallel",),
            # Explicit limit: keeps large TB safe under v5e's 16 MiB default
            # scoped VMEM while staying well under v7x's 64 MiB physical VMEM.
            vmem_limit_bytes=48 * 1024 * 1024,
        ),
    )(x2, W1, B1, W2, B2, W3, B3, Wd1, Bd1, Wd2, Bd2, Wd3, Bd3)
    return logits[:n]


def init_params(key):
    """Deterministic synthetic parameters (PyTorch-default-like U(+-1/sqrt(fan_in)))."""
    def u(k, shape, fan_in):
        bound = 1.0 / np.sqrt(fan_in)
        return jax.random.uniform(k, shape, jnp.float32, -bound, bound)

    ks = jax.random.split(key, 12)
    params = (
        u(ks[0], (10, 1, 3), 3),    u(ks[1], (10,), 3),      # conv1
        u(ks[2], (20, 10, 3), 30),  u(ks[3], (20,), 30),     # conv2
        u(ks[4], (50, 20, 3), 60),  u(ks[5], (50,), 60),     # conv3
        u(ks[6], (140, 700), 700),  u(ks[7], (140,), 700),   # dense1
        u(ks[8], (50, 140), 140),   u(ks[9], (50,), 140),    # dense2
        u(ks[10], (2, 50), 50),     u(ks[11], (2,), 50),     # dense3
    )
    # Round through bf16 so the bf16 MXU path and the f32 XLA reference agree tightly.
    return tuple(p.astype(jnp.bfloat16).astype(jnp.float32) for p in params)


def reference_forward(x, params):
    """Plain-JAX reference mirroring the PyTorch forward (eval mode)."""
    (w1, b1, w2, b2, w3, b3, wd1, bd1, wd2, bd2, wd3, bd3) = params

    def conv1d(h, w, b, stride=1, pad=0):
        y = lax.conv_general_dilated(h, w, window_strides=(stride,),
                                     padding=[(pad, pad)],
                                     dimension_numbers=("NCH", "OIH", "NCH"))
        return y + b[None, :, None]

    h = jax.nn.relu(conv1d(x, w1, b1, stride=2, pad=0))
    h = jax.nn.relu(conv1d(h, w2, b2, stride=1, pad=1))
    h = jax.nn.relu(conv1d(h, w3, b3, stride=1, pad=1))
    n = h.shape[0]
    h = h.reshape(n, 50, L_POOL, 2).max(axis=-1)      # MaxPool1d(2, 2)
    h = h.reshape(n, 50 * L_POOL)                     # view(-1, 700); Dropout = identity (eval)
    h = jax.nn.relu(h @ wd1.T + bd1)
    h = jax.nn.relu(h @ wd2.T + bd2)
    return h @ wd3.T + bd3


if __name__ == "__main__":
    key = jax.random.PRNGKey(0)
    pkey, xkey = jax.random.split(key)
    params = init_params(pkey)

    x = jax.random.normal(xkey, (2, 1, L_IN), jnp.float32)
    x = x.astype(jnp.bfloat16).astype(jnp.float32)

    out = jax.jit(convnet_forward)(x, params)
    out = jax.block_until_ready(out)
    assert out.shape == (2, 2) and out.dtype == jnp.float32

    ref = reference_forward(x, params)
    np.testing.assert_allclose(np.asarray(out), np.asarray(ref), rtol=2e-2, atol=2e-2)

    print("KERNEL_OK")
</pallas_src>

<mosaic_0001>
module attributes {stable_mosaic.version = 11 : i64} {
  func.func private @main(%arg0: i32) attributes {dimension_semantics = [#tpu.dimension_semantics<core_parallel>], iteration_bounds = array<i64: 2>, tpu.core_type = #tpu.core_type<sc_scalar_subcore>, window_params = []} {
    return
  }
}

module attributes {stable_mosaic.version = 11 : i64} {
  func.func private @main(%arg0: i32) attributes {dimension_semantics = [#tpu.dimension_semantics<core_parallel>], iteration_bounds = array<i64: 2>, tpu.core_type = #tpu.core_type<sc_scalar_subcore>, window_params = []} {
    return
  }
}

module attributes {stable_mosaic.version = 11 : i64} {
  func.func @_fused_kernel(%arg0: i32, %arg1: memref<128x64xbf16, #tpu.memory_space<vmem>>, %arg2: memref<64x384xbf16, #tpu.memory_space<vmem>>, %arg3: memref<1x384xf32, #tpu.memory_space<vmem>>, %arg4: memref<384x640xbf16, #tpu.memory_space<vmem>>, %arg5: memref<1x640xf32, #tpu.memory_space<vmem>>, %arg6: memref<640x1536xbf16, #tpu.memory_space<vmem>>, %arg7: memref<1x768xf32, #tpu.memory_space<vmem>>, %arg8: memref<768x256xbf16, #tpu.memory_space<vmem>>, %arg9: memref<1x256xf32, #tpu.memory_space<vmem>>, %arg10: memref<256x128xbf16, #tpu.memory_space<vmem>>, %arg11: memref<1x128xf32, #tpu.memory_space<vmem>>, %arg12: memref<128x2xbf16, #tpu.memory_space<vmem>>, %arg13: memref<1x2xf32, #tpu.memory_space<vmem>>, %arg14: memref<128x2xf32, #tpu.memory_space<vmem>>) attributes {dimension_semantics = [#tpu.dimension_semantics<parallel>], iteration_bounds = array<i64: 1>, scalar_prefetch = 0 : i64, scratch_operands = 0 : i64, tpu.core_type = #tpu.core_type<tc>, window_params = [{transform_indices = @transform_0, window_bounds = array<i64: 128, 64>}, {pipeline_mode = #tpu.pipeline_mode<synchronous>, transform_indices = @transform_1, window_bounds = array<i64: 64, 384>}, {pipeline_mode = #tpu.pipeline_mode<synchronous>, transform_indices = @transform_2, window_bounds = array<i64: 1, 384>}, {pipeline_mode = #tpu.pipeline_mode<synchronous>, transform_indices = @transform_3, window_bounds = array<i64: 384, 640>}, {pipeline_mode = #tpu.pipeline_mode<synchronous>, transform_indices = @transform_4, window_bounds = array<i64: 1, 640>}, {pipeline_mode = #tpu.pipeline_mode<synchronous>, transform_indices = @transform_5, window_bounds = array<i64: 640, 1536>}, {pipeline_mode = #tpu.pipeline_mode<synchronous>, transform_indices = @transform_6, window_bounds = array<i64: 1, 768>}, {pipeline_mode = #tpu.pipeline_mode<synchronous>, transform_indices = @transform_7, window_bounds = array<i64: 768, 256>}, {pipeline_mode = #tpu.pipeline_mode<synchronous>, transform_indices = @transform_8, window_bounds = array<i64: 1, 256>}, {pipeline_mode = #tpu.pipeline_mode<synchronous>, transform_indices = @transform_9, window_bounds = array<i64: 256, 128>}, {pipeline_mode = #tpu.pipeline_mode<synchronous>, transform_indices = @transform_10, window_bounds = array<i64: 1, 128>}, {pipeline_mode = #tpu.pipeline_mode<synchronous>, transform_indices = @transform_11, window_bounds = array<i64: 128, 2>}, {pipeline_mode = #tpu.pipeline_mode<synchronous>, transform_indices = @transform_12, window_bounds = array<i64: 1, 2>}, {transform_indices = @transform_13, window_bounds = array<i64: 128, 2>}]} {
    %c0 = arith.constant 0 : index
    %c0_0 = arith.constant 0 : index
    %0 = vector.load %arg1[%c0, %c0_0] : memref<128x64xbf16, #tpu.memory_space<vmem>>, vector<128x64xbf16>
    %c0_1 = arith.constant 0 : index
    %c0_2 = arith.constant 0 : index
    %1 = vector.load %arg2[%c0_1, %c0_2] : memref<64x384xbf16, #tpu.memory_space<vmem>>, vector<64x384xbf16>
    %cst = arith.constant dense<0.000000e+00> : vector<128x384xf32>
    %2 = tpu.matmul %0, %1, %cst {dimension_numbers = #tpu.dot_dimension_numbers<[1], [0], [0], [1], [0, 0, 1, 1], [], []>} : vector<128x64xbf16>, vector<64x384xbf16>, vector<128x384xf32> -> vector<128x384xf32>
    %c0_3 = arith.constant 0 : index
    %c0_4 = arith.constant 0 : index
    %3 = vector.load %arg3[%c0_3, %c0_4] : memref<1x384xf32, #tpu.memory_space<vmem>>, vector<1x384xf32>
    %4 = vector.broadcast %3 : vector<1x384xf32> to vector<128x384xf32>
    %5 = arith.addf %2, %4 : vector<128x384xf32>
    %cst_5 = arith.constant 0.000000e+00 : f32
    %6 = vector.broadcast %cst_5 : f32 to vector<128x384xf32>
    %7 = arith.maximumf %5, %6 : vector<128x384xf32>
    %8 = arith.truncf %7 : vector<128x384xf32> to vector<128x384xbf16>
    %c0_6 = arith.constant 0 : index
    %c0_7 = arith.constant 0 : index
    %9 = vector.load %arg4[%c0_6, %c0_7] : memref<384x640xbf16, #tpu.memory_space<vmem>>, vector<384x640xbf16>
    %cst_8 = arith.constant dense<0.000000e+00> : vector<128x640xf32>
    %10 = tpu.matmul %8, %9, %cst_8 {dimension_numbers = #tpu.dot_dimension_numbers<[1], [0], [0], [1], [0, 0, 1, 1], [], []>} : vector<128x384xbf16>, vector<384x640xbf16>, vector<128x640xf32> -> vector<128x640xf32>
    %c0_9 = arith.constant 0 : index
    %c0_10 = arith.constant 0 : index
    %11 = vector.load %arg5[%c0_9, %c0_10] : memref<1x640xf32, #tpu.memory_space<vmem>>, vector<1x640xf32>
    %12 = vector.broadcast %11 : vector<1x640xf32> to vector<128x640xf32>
    %13 = arith.addf %10, %12 : vector<128x640xf32>
    %cst_11 = arith.constant 0.000000e+00 : f32
    %14 = vector.broadcast %cst_11 : f32 to vector<128x640xf32>
    %15 = arith.maximumf %13, %14 : vector<128x640xf32>
    %16 = arith.truncf %15 : vector<128x640xf32> to vector<128x640xbf16>
    %c0_12 = arith.constant 0 : index
    %c0_13 = arith.constant 0 : index
    %17 = vector.load %arg6[%c0_12, %c0_13] : memref<640x1536xbf16, #tpu.memory_space<vmem>>, vector<640x1536xbf16>
    %cst_14 = arith.constant dense<0.000000e+00> : vector<128x1536xf32>
    %18 = tpu.matmul %16, %17, %cst_14 {dimension_numbers = #tpu.dot_dimension_numbers<[1], [0], [0], [1], [0, 0, 1, 1], [], []>} : vector<128x640xbf16>, vector<640x1536xbf16>, vector<128x1536xf32> -> vector<128x1536xf32>
    %19 = vector.extract_strided_slice %18 {offsets = [0, 0], sizes = [128, 768], strides = [1, 1]} : vector<128x1536xf32> to vector<128x768xf32>
    %20 = vector.extract_strided_slice %18 {offsets = [0, 768], sizes = [128, 768], strides = [1, 1]} : vector<128x1536xf32> to vector<128x768xf32>
    %21 = arith.maximumf %19, %20 : vector<128x768xf32>
    %c0_15 = arith.constant 0 : index
    %c0_16 = arith.constant 0 : index
    %22 = vector.load %arg7[%c0_15, %c0_16] : memref<1x768xf32, #tpu.memory_space<vmem>>, vector<1x768xf32>
    %23 = vector.broadcast %22 : vector<1x768xf32> to vector<128x768xf32>
    %24 = arith.addf %21, %23 : vector<128x768xf32>
    %cst_17 = arith.constant 0.000000e+00 : f32
    %25 = vector.broadcast %cst_17 : f32 to vector<128x768xf32>
    %26 = arith.maximumf %24, %25 : vector<128x768xf32>
    %27 = arith.truncf %26 : vector<128x768xf32> to vector<128x768xbf16>
    %c0_18 = arith.constant 0 : index
    %c0_19 = arith.constant 0 : index
    %28 = vector.load %arg8[%c0_18, %c0_19] : memref<768x256xbf16, #tpu.memory_space<vmem>>, vector<768x256xbf16>
    %cst_20 = arith.constant dense<0.000000e+00> : vector<128x256xf32>
    %29 = tpu.matmul %27, %28, %cst_20 {dimension_numbers = #tpu.dot_dimension_numbers<[1], [0], [0], [1], [0, 0, 1, 1], [], []>} : vector<128x768xbf16>, vector<768x256xbf16>, vector<128x256xf32> -> vector<128x256xf32>
    %c0_21 = arith.constant 0 : index
    %c0_22 = arith.constant 0 : index
    %30 = vector.load %arg9[%c0_21, %c0_22] : memref<1x256xf32, #tpu.memory_space<vmem>>, vector<1x256xf32>
    %31 = vector.broadcast %30 : vector<1x256xf32> to vector<128x256xf32>
    %32 = arith.addf %29, %31 : vector<128x256xf32>
    %cst_23 = arith.constant 0.000000e+00 : f32
    %33 = vector.broadcast %cst_23 : f32 to vector<128x256xf32>
    %34 = arith.maximumf %32, %33 : vector<128x256xf32>
    %35 = arith.truncf %34 : vector<128x256xf32> to vector<128x256xbf16>
    %c0_24 = arith.constant 0 : index
    %c0_25 = arith.constant 0 : index
    %36 = vector.load %arg10[%c0_24, %c0_25] : memref<256x128xbf16, #tpu.memory_space<vmem>>, vector<256x128xbf16>
    %cst_26 = arith.constant dense<0.000000e+00> : vector<128x128xf32>
    %37 = tpu.matmul %35, %36, %cst_26 {dimension_numbers = #tpu.dot_dimension_numbers<[1], [0], [0], [1], [0, 0, 1, 1], [], []>} : vector<128x256xbf16>, vector<256x128xbf16>, vector<128x128xf32> -> vector<128x128xf32>
    %c0_27 = arith.constant 0 : index
    %c0_28 = arith.constant 0 : index
    %38 = vector.load %arg11[%c0_27, %c0_28] : memref<1x128xf32, #tpu.memory_space<vmem>>, vector<1x128xf32>
    %39 = vector.broadcast %38 : vector<1x128xf32> to vector<128x128xf32>
    %40 = arith.addf %37, %39 : vector<128x128xf32>
    %cst_29 = arith.constant 0.000000e+00 : f32
    %41 = vector.broadcast %cst_29 : f32 to vector<128x128xf32>
    %42 = arith.maximumf %40, %41 : vector<128x128xf32>
    %43 = arith.truncf %42 : vector<128x128xf32> to vector<128x128xbf16>
    %c0_30 = arith.constant 0 : index
    %c0_31 = arith.constant 0 : index
    %44 = vector.load %arg12[%c0_30, %c0_31] : memref<128x2xbf16, #tpu.memory_space<vmem>>, vector<128x2xbf16>
    %cst_32 = arith.constant dense<0.000000e+00> : vector<128x2xf32>
    %45 = tpu.matmul %43, %44, %cst_32 {dimension_numbers = #tpu.dot_dimension_numbers<[1], [0], [0], [1], [0, 0, 1, 1], [], []>} : vector<128x128xbf16>, vector<128x2xbf16>, vector<128x2xf32> -> vector<128x2xf32>
    %c0_33 = arith.constant 0 : index
    %c0_34 = arith.constant 0 : index
    %46 = vector.load %arg13[%c0_33, %c0_34] : memref<1x2xf32, #tpu.memory_space<vmem>>, vector<1x2xf32>
    %47 = vector.broadcast %46 : vector<1x2xf32> to vector<128x2xf32>
    %48 = arith.addf %45, %47 : vector<128x2xf32>
    %c0_35 = arith.constant 0 : index
    %c0_36 = arith.constant 0 : index
    %49 = vector.load %arg14[%c0_35, %c0_36] : memref<128x2xf32, #tpu.memory_space<vmem>>, vector<128x2xf32>
    tpu.vector_store %arg14[%c0_35, %c0_36], %48 {strides = array<i32>} : memref<128x2xf32, #tpu.memory_space<vmem>>, vector<128x2xf32>,
    return
  }
  func.func @transform_0(%arg0: i32) -> (i32, i32) {
    %c0_i32 = arith.constant 0 : i32
    %c0_i32_0 = arith.constant 0 : i32
    return %arg0, %c0_i32 : i32, i32
  }
  func.func @transform_1(%arg0: i32) -> (i32, i32) {
    %c0_i32 = arith.constant 0 : i32
    %c0_i32_0 = arith.constant 0 : i32
    %c0_i32_1 = arith.constant 0 : i32
    return %c0_i32, %c0_i32_0 : i32, i32
  }
  func.func @transform_2(%arg0: i32) -> (i32, i32) {
    %c0_i32 = arith.constant 0 : i32
    %c0_i32_0 = arith.constant 0 : i32
    %c0_i32_1 = arith.constant 0 : i32
    return %c0_i32, %c0_i32_0 : i32, i32
  }
  func.func @transform_3(%arg0: i32) -> (i32, i32) {
    %c0_i32 = arith.constant 0 : i32
    %c0_i32_0 = arith.constant 0 : i32
    %c0_i32_1 = arith.constant 0 : i32
    return %c0_i32, %c0_i32_0 : i32, i32
  }
  func.func @transform_4(%arg0: i32) -> (i32, i32) {
    %c0_i32 = arith.constant 0 : i32
    %c0_i32_0 = arith.constant 0 : i32
    %c0_i32_1 = arith.constant 0 : i32
    return %c0_i32, %c0_i32_0 : i32, i32
  }
  func.func @transform_5(%arg0: i32) -> (i32, i32) {
    %c0_i32 = arith.constant 0 : i32
    %c0_i32_0 = arith.constant 0 : i32
    %c0_i32_1 = arith.constant 0 : i32
    return %c0_i32, %c0_i32_0 : i32, i32
  }
  func.func @transform_6(%arg0: i32) -> (i32, i32) {
    %c0_i32 = arith.constant 0 : i32
    %c0_i32_0 = arith.constant 0 : i32
    %c0_i32_1 = arith.constant 0 : i32
    return %c0_i32, %c0_i32_0 : i32, i32
  }
  func.func @transform_7(%arg0: i32) -> (i32, i32) {
    %c0_i32 = arith.constant 0 : i32
    %c0_i32_0 = arith.constant 0 : i32
    %c0_i32_1 = arith.constant 0 : i32
    return %c0_i32, %c0_i32_0 : i32, i32
  }
  func.func @transform_8(%arg0: i32) -> (i32, i32) {
    %c0_i32 = arith.constant 0 : i32
    %c0_i32_0 = arith.constant 0 : i32
    %c0_i32_1 = arith.constant 0 : i32
    return %c0_i32, %c0_i32_0 : i32, i32
  }
  func.func @transform_9(%arg0: i32) -> (i32, i32) {
    %c0_i32 = arith.constant 0 : i32
    %c0_i32_0 = arith.constant 0 : i32
    %c0_i32_1 = arith.constant 0 : i32
    return %c0_i32, %c0_i32_0 : i32, i32
  }
  func.func @transform_10(%arg0: i32) -> (i32, i32) {
    %c0_i32 = arith.constant 0 : i32
    %c0_i32_0 = arith.constant 0 : i32
    %c0_i32_1 = arith.constant 0 : i32
    return %c0_i32, %c0_i32_0 : i32, i32
  }
  func.func @transform_11(%arg0: i32) -> (i32, i32) {
    %c0_i32 = arith.constant 0 : i32
    %c0_i32_0 = arith.constant 0 : i32
    %c0_i32_1 = arith.constant 0 : i32
    return %c0_i32, %c0_i32_0 : i32, i32
  }
  func.func @transform_12(%arg0: i32) -> (i32, i32) {
    %c0_i32 = arith.constant 0 : i32
    %c0_i32_0 = arith.constant 0 : i32
    %c0_i32_1 = arith.constant 0 : i32
    return %c0_i32, %c0_i32_0 : i32, i32
  }
  func.func @transform_13(%arg0: i32) -> (i32, i32) {
    %c0_i32 = arith.constant 0 : i32
    %c0_i32_0 = arith.constant 0 : i32
    return %arg0, %c0_i32 : i32, i32
  }
}

</mosaic_0001>

<bundles_post_ra>
// kernel: convnet_forward.1
= control target key start
LH: loop header
LB: loop body
LE: loop exit
PB: predicated region body
PF: predicated region fallthrough
CT: control target
= control target key end

     0   :  { %v15167_v1 = vmov 0   ;;  %vm198_vm0 = vcmask 523264   ;;  %vm8747_vm1 = vcmask 15360   ;;  %s15152_s1 = inlined_call_operand.vmem [shape: bf16[64,384], index: 1, kind: input, shape index: {}]   ;;  %s15153_s0 = inlined_call_operand.vmem [shape: bf16[128,64], index: 0, kind: input, shape index: {}]   ;;  %s15154_s3 = inlined_call_operand.vmem [shape: bf16[384,640], index: 3, kind: input, shape index: {}]   ;;  %s15155_s2 = inlined_call_operand.vmem [shape: f32[1,384], index: 2, kind: input, shape index: {}]   ;;  %s15156_s5 = inlined_call_operand.vmem [shape: bf16[640,1536], index: 5, kind: input, shape index: {}]   ;;  %s15157_s4 = inlined_call_operand.vmem [shape: f32[1,640], index: 4, kind: input, shape index: {}]   ;;  %s15158_s7 = inlined_call_operand.vmem [shape: bf16[768,256], index: 7, kind: input, shape index: {}]   ;;  %s15159_s6 = inlined_call_operand.vmem [shape: f32[1,768], index: 6, kind: input, shape index: {}]   ;;  %s15160_s9 = inlined_call_operand.vmem [shape: bf16[256,128], index: 9, kind: input, shape index: {}]   ;;  %s15161_s11 = inlined_call_operand.vmem [shape: bf16[128,2], index: 11, kind: input, shape index: {}]   ;;  %s15162_s8 = inlined_call_operand.vmem [shape: f32[1,256], index: 8, kind: input, shape index: {}]   ;;  %s15163_s10 = inlined_call_operand.vmem [shape: f32[1,128], index: 10, kind: input, shape index: {}]   ;;  %s15164_s12 = inlined_call_operand.vmem [shape: f32[1,2], index: 12, kind: input, shape index: {}]   ;;  %s15165_s13 = inlined_call_operand.vmem [shape: f32[128,2], index: 13, kind: output, shape index: {}]  }
   0x1   :  { %v10395_v0 = vld [vmem:[%s15152_s1 + $0x4] ss:$12 sps:$4 sm:$0xff]   ;;  %255 = vmatprep.mubr.bf16.mxu0 %v15167_v1  ;;  %v10397_v2 = vld [vmem:[%s15152_s1 + $0x8] ss:$12 sps:$4 sm:$0xff]   ;;  %v10398_v3 = vld [vmem:[%s15152_s1] ss:$12 sps:$4 sm:$0xff]  }
   0x2   :  { %223 = vmatprep.subr.bf16.mxu0 %v10395_v0  ;;  %9698 = vmatprep.subr.bf16.mxu1 %v10397_v2  ;;  %v10399_v4 = vld [vmem:[%s15152_s1 + $0x1c] ss:$12 sps:$4 sm:$0xff]   ;;  %v10401_v5 = vld [vmem:[%s15152_s1 + $0x20] ss:$12 sps:$4 sm:$0xff]   ;;  %v10402_v6 = vld [vmem:[%s15152_s1 + $0x18] ss:$12 sps:$4 sm:$0xff]  }
   0x3   :  { %224 = vmatpush1.bf16.msra.mxu0 %v10398_v3  ;;  %9699 = vmatpush3.bf16.msra.mxu1 %v10397_v2  ;;  %v10403_v7 = vld [vmem:[%s15152_s1 + $0x34] ss:$12 sps:$4 sm:$0xff]   ;;  %v10405_v8 = vld [vmem:[%s15152_s1 + $0x38] ss:$12 sps:$4 sm:$0xff]   ;;  %v10406_v9 = vld [vmem:[%s15152_s1 + $0x30] ss:$12 sps:$4 sm:$0xff]  }
   0x4   :  { %225 = vmatprep.subr.bf16.mxu0 %v10399_v4  ;;  %9700 = vmatprep.subr.bf16.mxu1 %v10401_v5  ;;  %v10407_v10 = vld [vmem:[%s15152_s1 + $0x4c] ss:$12 sps:$4 sm:$0xff]   ;;  %v10409_v11 = vld [vmem:[%s15152_s1 + $0x50] ss:$12 sps:$4 sm:$0xff]   ;;  %v10411_v12 = vld [vmem:[%s15153_s0] sm:$0xff]  }
   0x5   :  { %v10410_v13 = vld [vmem:[%s15152_s1 + $0x48] ss:$12 sps:$4 sm:$0xff]   ;;  %9706 = vmatprep.mubr.msk.bf16.mxu1 %vm198_vm0, %v10411_v12  ;;  %v10421_v17 = vld [vmem:[%s15154_s3 + $0x4] ss:$20 sps:$4 sm:$0xff]   ;;  %v10424_v18 = vld [vmem:[%s15154_s3 + $0x2c] ss:$20 sps:$4 sm:$0xff]  }
   0x6   :  { %v10412_v14 = vld [vmem:[%s15153_s0 + $0x8] sm:$0xff]   ;;  %v10413_v15 = vld [vmem:[%s15153_s0 + $0x10] sm:$0xff]   ;;  %v10414_v20 = vld [vmem:[%s15153_s0 + $0x18] sm:$0xff]  }
   0x7   :  { %226 = vmatpush1.bf16.msra.mxu0 %v10402_v6  ;;  %9701 = vmatpush3.bf16.msra.mxu1 %v10401_v5  ;;  %v10419_v16 = vld [vmem:[%s15154_s3] ss:$20 sps:$4 sm:$0xff]   ;;  %v10422_v19 = vld [vmem:[%s15154_s3 + $0x28] ss:$20 sps:$4 sm:$0xff]   ;;  %v10425_v23 = vld [vmem:[%s15154_s3 + $0x50] ss:$20 sps:$4 sm:$0xff]  }
   0x8   :  { %227 = vmatprep.subr.bf16.mxu0 %v10403_v7  ;;  %9702 = vmatprep.subr.bf16.mxu1 %v10405_v8  ;;  %v11616_v21 = vld [vmem:[%s15153_s0 + $0x20] sm:$0xff]   ;;  %v10427_v22 = vld [vmem:[%s15154_s3 + $0x54] ss:$20 sps:$4 sm:$0xff]   ;;  %v10430_v24 = vld [vmem:[%s15154_s3 + $0x7c] ss:$20 sps:$4 sm:$0xff]  }
   0x9   :  { %v10443_v25 = vld [vmem:[%s15154_s3 + $0x280] ss:$20 sps:$4 sm:$0xff]   ;;  %v10445_v26 = vld [vmem:[%s15154_s3 + $0x284] ss:$20 sps:$4 sm:$0xff]   ;;  %v11641_v27 = vld [vmem:[%s15153_s0 + $0x28] sm:$0xff]  }
   0xa   :  { %v10428_v28 = vld [vmem:[%s15154_s3 + $0x78] ss:$20 sps:$4 sm:$0xff]   ;;  %v11649_v29 = vld [vmem:[%s15153_s0 + $0x30] sm:$0xff]   ;;  %v10449_v32 = vld [vmem:[%s15154_s3 + $0x2a8] ss:$20 sps:$4 sm:$0xff]  }
   0xb   :  { %228 = vmatpush1.bf16.msra.mxu0 %v10406_v9  ;;  %9703 = vmatpush3.bf16.msra.mxu1 %v10405_v8  ;;  %v10451_v30 = vld [vmem:[%s15154_s3 + $0x2ac] ss:$20 sps:$4 sm:$0xff]   ;;  %v10433_v31 = vld [vmem:[%s15154_s3 + $0xa4] ss:$20 sps:$4 sm:$0xff]   ;;  %v10457_v34 = vld [vmem:[%s15154_s3 + $0x2d4] ss:$20 sps:$4 sm:$0xff]   ;;  %v79_v8 = vlaneseq }
   0xc   :  { %229 = vmatprep.subr.bf16.mxu0 %v10407_v10  ;;  %9704 = vmatprep.subr.bf16.mxu1 %v10409_v11  ;;  %v10431_v33 = vld [vmem:[%s15154_s3 + $0xa0] ss:$20 sps:$4 sm:$0xff]   ;;  %v10455_v36 = vld [vmem:[%s15154_s3 + $0x2d0] ss:$20 sps:$4 sm:$0xff]   ;;  %v10434_v37 = vld [vmem:[%s15154_s3 + $0xc8] ss:$20 sps:$4 sm:$0xff]  }
   0xd   :  { %v10436_v35 = vld [vmem:[%s15154_s3 + $0xcc] ss:$20 sps:$4 sm:$0xff]   ;;  %v10463_v38 = vld [vmem:[%s15154_s3 + $0x2fc] ss:$20 sps:$4 sm:$0xff]   ;;  %v10439_v40 = vld [vmem:[%s15154_s3 + $0xf4] ss:$20 sps:$4 sm:$0xff]  }
   0xe   :  { %v10418_v39 = vld [vmem:[%s15153_s0 + $0x38] sm:$0xff]   ;;  %v10437_v42 = vld [vmem:[%s15154_s3 + $0xf0] ss:$20 sps:$4 sm:$0xff]   ;;  %v10467_v45 = vld [vmem:[%s15154_s3 + $0x320] ss:$20 sps:$4 sm:$0xff]   ;;  %v11794_v9 = vshrl.u32 %v79_v8, 7 }
   0xf   :  { %230 = vmatpush1.bf16.msra.mxu0 %v10410_v13  ;;  %9705 = vmatpush3.bf16.msra.mxu1 %v10409_v11  ;;  %v10461_v41 = vld [vmem:[%s15154_s3 + $0x2f8] ss:$20 sps:$4 sm:$0xff]   ;;  %v10442_v44 = vld [vmem:[%s15154_s3 + $0x11c] ss:$20 sps:$4 sm:$0xff]   ;;  %v10446_v50 = vld [vmem:[%s15154_s3 + $0x140] ss:$20 sps:$4 sm:$0xff]  }
  0x10   :  { %1300 = vmatprep.subr.bf16.mxu0 %v10421_v17  ;;  %1413 = vmatprep.subr.bf16.mxu1 %v10445_v26  ;;  %v10469_v43 = vld [vmem:[%s15154_s3 + $0x324] ss:$20 sps:$4 sm:$0xff]   ;;  %v10475_v47 = vld [vmem:[%s15154_s3 + $0x34c] ss:$20 sps:$4 sm:$0xff]   ;;  %v10473_v49 = vld [vmem:[%s15154_s3 + $0x348] ss:$20 sps:$4 sm:$0xff]  }
  0x11   :  { %v10440_v46 = vld [vmem:[%s15154_s3 + $0x118] ss:$20 sps:$4 sm:$0xff]   ;;  %v10452_v52 = vld [vmem:[%s15154_s3 + $0x168] ss:$20 sps:$4 sm:$0xff]   ;;  %v10458_v54 = vld [vmem:[%s15154_s3 + $0x190] ss:$20 sps:$4 sm:$0xff]  }
  0x12   :  { %8788 = vmatmul.mubr.msk.bf16.vlgmr.msra.gmra.mrb[0].mxu0 %vm198_vm0, %v10411_v12  ;;  %9707 = vmatmul.mubr.msk.bf16.vlgmr.msra.gmra.mrb[0].mxu1 %vm198_vm0, %v10412_v14  ;;  %v10448_v48 = vld [vmem:[%s15154_s3 + $0x144] ss:$20 sps:$4 sm:$0xff]   ;;  %v10454_v51 = vld [vmem:[%s15154_s3 + $0x16c] ss:$20 sps:$4 sm:$0xff]   ;;  %v10460_v53 = vld [vmem:[%s15154_s3 + $0x194] ss:$20 sps:$4 sm:$0xff]  }
  0x13   :  { %265 = vmatprep.mubr.bf16.mxu0 %v15167_v1  ;;  %9710 = vmatprep.mubr.msk.bf16.mxu1 %vm198_vm0, %v10413_v15  ;;  %v10466_v55 = vld [vmem:[%s15154_s3 + $0x1bc] ss:$20 sps:$4 sm:$0xff]   ;;  %v10464_v56 = vld [vmem:[%s15154_s3 + $0x1b8] ss:$20 sps:$4 sm:$0xff]   ;;  %v10470_v58 = vld [vmem:[%s15154_s3 + $0x1e0] ss:$20 sps:$4 sm:$0xff]  }
  0x14   :  { %1301 = vmatpush1.bf16.msra.mxu0 %v10419_v16  ;;  %1414 = vmatpush1.bf16.msra.mxu1 %v10443_v25  ;;  %v10472_v57 = vld [vmem:[%s15154_s3 + $0x1e4] ss:$20 sps:$4 sm:$0xff]   ;;  %v10478_v59 = vld [vmem:[%s15154_s3 + $0x20c] ss:$20 sps:$4 sm:$0xff]   ;;  %v10476_v60 = vld [vmem:[%s15154_s3 + $0x208] ss:$20 sps:$4 sm:$0xff]  }
  0x15   :  { %1302 = vmatprep.subr.bf16.mxu0 %v10424_v18  ;;  %1415 = vmatprep.subr.bf16.mxu1 %v10451_v30  ;;  %v10481_v61 = vld [vmem:[%s15154_s3 + $0x374] ss:$20 sps:$4 sm:$0xff]   ;;  %v10479_v62 = vld [vmem:[%s15154_s3 + $0x370] ss:$20 sps:$4 sm:$0xff]   ;;  %v10485_v3 = vld [vmem:[%s15154_s3 + $0x398] ss:$20 sps:$4 sm:$0xff]  }
  0x16   :  { %v10484_v63 = vld [vmem:[%s15154_s3 + $0x234] ss:$20 sps:$4 sm:$0xff]   ;;  %v10482_v0 = vld [vmem:[%s15154_s3 + $0x230] ss:$20 sps:$4 sm:$0xff]   ;;  %v10488_v5 = vld [vmem:[%s15154_s3 + $0x258] ss:$20 sps:$4 sm:$0xff]  }
  0x17   :  { %v10487_v2 = vld [vmem:[%s15154_s3 + $0x39c] ss:$20 sps:$4 sm:$0xff]   ;;  %v10493_v6 = vld [vmem:[%s15154_s3 + $0xc] ss:$20 sps:$4 sm:$0xff]   ;;  %15183 = vst [vmem:[#allocation2_spill] sm:$0xff] %v11794_v9  ;;  %v11797_v10 = vsub.s32 0, %v11794_v9 }
  0x18   :  { %1303 = vmatpush1.bf16.msra.mxu0 %v10422_v19  ;;  %1416 = vmatpush1.bf16.msra.mxu1 %v10449_v32  ;;  %v10490_v4 = vld [vmem:[%s15154_s3 + $0x25c] ss:$20 sps:$4 sm:$0xff]   ;;  %v11800_v11 = vsub.s32 2, %v11794_v9  ;;  %v77_v12 = vld [vmem:[%s15155_s2] sm:$0x7]  ;;  %v11806_v13 = vsub.s32 1, %v11794_v9 }
  0x19   :  { %1304 = vmatprep.subr.bf16.mxu0 %v10427_v22  ;;  %1417 = vmatprep.subr.bf16.mxu1 %v10457_v34  ;;  %v10518_v7 = vld [vmem:[%s15154_s3 + $0x150] ss:$20 sps:$4 sm:$0xff]   ;;  %15184 = vst [vmem:[#allocation3_spill] sm:$0xff] %v11797_v10 }
  0x1a   :  { %8789 = vmatmul.mubr.msk.bf16.gmra.mrb[4].mxu0 %vm198_vm0, %v10412_v14  ;;  %9711 = vmatmul.mubr.msk.bf16.gmra.mrb[4].mxu1 %vm198_vm0, %v10414_v20  ;;  %15185 = vst [vmem:[#allocation4_spill] sm:$0xff] %v11800_v11  ;;  %15186 = vst [vmem:[#allocation5_spill] sm:$0xff] %v11806_v13  ;;  %v11809_v14 = vrot.slane %v77_v12, %v11797_v10  ;;  %v11815_v16 = vrot.slane %v77_v12, %v11806_v13 }
  0x1b   :  { %275 = vmatprep.mubr.bf16.mxu0 %v15167_v1  ;;  %9714 = vmatprep.mubr.msk.bf16.mxu1 %vm198_vm0, %v11616_v21 }
  0x1c   :  { %1305 = vmatpush1.bf16.msra.mxu0 %v10425_v23  ;;  %1418 = vmatpush1.bf16.msra.mxu1 %v10455_v36 }
  0x1d   :  { %1306 = vmatprep.subr.bf16.mxu0 %v10430_v24  ;;  %1419 = vmatprep.subr.bf16.mxu1 %v10463_v38 }
  0x20   :  { %1307 = vmatpush1.bf16.msra.mxu0 %v10428_v28  ;;  %1420 = vmatpush1.bf16.msra.mxu1 %v10461_v41 }
  0x21   :  { %1308 = vmatprep.subr.bf16.mxu0 %v10433_v31  ;;  %1421 = vmatprep.subr.bf16.mxu1 %v10469_v43  ;;  %v10491_v43 = vld [vmem:[%s15154_s3 + $0x8] ss:$20 sps:$4 sm:$0xff]  }
  0x22   :  { %8790 = vmatmul.mubr.msk.bf16.gmra.mrb[8].mxu0 %vm198_vm0, %v10413_v15  ;;  %9715 = vmatmul.mubr.msk.bf16.gmra.mrb[8].mxu1 %vm198_vm0, %v11641_v27  ;;  %v11812_v15 = vrot.slane %v77_v12, %v11800_v11 }
  0x23   :  { %285 = vmatprep.mubr.bf16.mxu0 %v15167_v1  ;;  %9718 = vmatprep.mubr.msk.bf16.mxu1 %vm198_vm0, %v11649_v29 }
  0x24   :  { %1309 = vmatpush1.bf16.msra.mxu0 %v10431_v33  ;;  %1422 = vmatpush1.bf16.msra.mxu1 %v10467_v45 }
  0x25   :  { %1310 = vmatprep.subr.bf16.mxu0 %v10436_v35  ;;  %1423 = vmatprep.subr.bf16.mxu1 %v10475_v47 }
  0x28   :  { %1311 = vmatpush1.bf16.msra.mxu0 %v10434_v37  ;;  %1424 = vmatpush1.bf16.msra.mxu1 %v10473_v49 }
  0x29   :  { %1312 = vmatprep.subr.bf16.mxu0 %v10439_v40  ;;  %1425 = vmatprep.subr.bf16.mxu1 %v10481_v61 }
  0x2a   :  { %8791 = vmatmul.mubr.msk.bf16.gmra.mrb[12].mxu0 %vm198_vm0, %v10414_v20  ;;  %9719 = vmatmul.mubr.msk.bf16.gmra.mrb[12].mxu1 %vm198_vm0, %v10418_v39 }
  0x2b   :  { %295 = vmatprep.mubr.bf16.mxu0 %v15167_v1  ;;  %1445 = vmatprep.mubr.bf16.mxu1 %v15167_v1 }
  0x2c   :  { %1313 = vmatpush1.bf16.msra.mxu0 %v10437_v42  ;;  %1426 = vmatpush1.bf16.msra.mxu1 %v10479_v62 }
  0x2d   :  { %1314 = vmatprep.subr.bf16.mxu0 %v10442_v44  ;;  %1427 = vmatprep.subr.bf16.mxu1 %v10487_v2 }
  0x30   :  { %1315 = vmatpush1.bf16.msra.mxu0 %v10440_v46  ;;  %1428 = vmatpush1.bf16.msra.mxu1 %v10485_v3 }
  0x31   :  { %1316 = vmatprep.subr.bf16.mxu0 %v10448_v48  ;;  %1526 = vmatprep.subr.bf16.mxu1 %v10493_v6  ;;  %v10496_v48 = vld [vmem:[%s15154_s3 + $0x34] ss:$20 sps:$4 sm:$0xff]  }
  0x32   :  { %8792 = vmatmul.mubr.msk.bf16.gmra.mrb[16].mxu0 %vm198_vm0, %v11616_v21 }
  0x33   :  { %305 = vmatprep.mubr.bf16.mxu0 %v15167_v1 }
  0x34   :  { %1317 = vmatpush1.bf16.msra.mxu0 %v10446_v50 }
  0x35   :  { %1318 = vmatprep.subr.bf16.mxu0 %v10454_v51 }
  0x38   :  { %1319 = vmatpush1.bf16.msra.mxu0 %v10452_v52 }
  0x39   :  { %1320 = vmatprep.subr.bf16.mxu0 %v10460_v53  ;;  %v10519_v53 = vld [vmem:[%s15154_s3 + $0x10] ss:$20 sps:$4 sm:$0xff]  }
  0x3a   :  { %8793 = vmatmul.mubr.msk.bf16.gmra.mrb[20].mxu0 %vm198_vm0, %v11641_v27 }
  0x3b   :  { %315 = vmatprep.mubr.bf16.mxu0 %v15167_v1 }
  0x3c   :  { %1321 = vmatpush1.bf16.msra.mxu0 %v10458_v54 }
  0x3d   :  { %1322 = vmatprep.subr.bf16.mxu0 %v10466_v55 }
  0x40   :  { %1323 = vmatpush1.bf16.msra.mxu0 %v10464_v56 }
  0x41   :  { %1324 = vmatprep.subr.bf16.mxu0 %v10472_v57 }
  0x42   :  { %8794 = vmatmul.mubr.msk.bf16.gmra.mrb[24].mxu0 %vm198_vm0, %v11649_v29 }
  0x43   :  { %325 = vmatprep.mubr.bf16.mxu0 %v15167_v1 }
  0x44   :  { %1325 = vmatpush1.bf16.msra.mxu0 %v10470_v58  ;;  %v10523_v58 = vld [vmem:[%s15154_s3 + $0x178] ss:$20 sps:$4 sm:$0xff]  }
  0x45   :  { %1326 = vmatprep.subr.bf16.mxu0 %v10478_v59 }
  0x48   :  { %1327 = vmatpush1.bf16.msra.mxu0 %v10476_v60 }
  0x49   :  { %1328 = vmatprep.subr.bf16.mxu0 %v10484_v63  ;;  %v10494_v63 = vld [vmem:[%s15154_s3 + $0x30] ss:$20 sps:$4 sm:$0xff]  }
  0x4a   :  { %8795 = vmatmul.mubr.msk.bf16.gmra.mrb[28].mxu0 %vm198_vm0, %v10418_v39 }
  0x4c   :  { %1329 = vmatpush1.bf16.msra.mxu0 %v10482_v0 }
  0x4d   :  { %1330 = vmatprep.subr.bf16.mxu0 %v10490_v4 }
  0x50   :  { %1331 = vmatpush1.bf16.msra.mxu0 %v10488_v5 }
  0x51   :  { %9538 = vmatprep.subr.bf16.mxu0 %v10518_v7  ;;  %v10499_v7 = vld [vmem:[%s15154_s3 + $0x5c] ss:$20 sps:$4 sm:$0xff]  }
  0xe5   :  { %v257_v17 = vpop.f32.mrb[0].mxu0  ;;  %v9708_v18 = vpop.f32.mrb[0].mxu1 }
  0xe6   :  { %v258_v19 = vadd.f32 %v257_v17, %v11809_v14  ;;  %v379_v20 = vadd.f32 %v9708_v18, %v11812_v15  ;;  %v259_v21 = vpop.f32.mrb[1].mxu0  ;;  %v370_v22 = vpop.f32.mrb[1].mxu1  ;;  %v10524_v17 = vld [vmem:[%s15154_s3 + $0x38] ss:$20 sps:$4 sm:$0xff]  }
  0xe7   :  { %v260_v23 = vadd.f32 %v259_v21, %v11815_v16  ;;  %v371_v24 = vadd.f32 %v370_v22, %v11812_v15  ;;  %v261_v25 = vpop.f32.mrb[2].mxu0  ;;  %v9709_v26 = vpop.f32.mrb[2].mxu1  ;;  %v10497_v22 = vld [vmem:[%s15154_s3 + $0x58] ss:$20 sps:$4 sm:$0xff]  }
  0xe8   :  { %v433_v27 = vmax.f32 %v258_v19, 0.0  ;;  %v262_v28 = vadd.f32 %v261_v25, %v11809_v14  ;;  %v382_v29 = vadd.f32 %v9709_v26, %v11812_v15  ;;  %v263_v30 = vpop.f32.mrb[3].mxu0  ;;  %v373_v31 = vpop.f32.mrb[3].mxu1  ;;  %v441_v35 = vmax.f32 %v379_v20, 0.0  ;;  %v10502_v26 = vld [vmem:[%s15154_s3 + $0x84] ss:$20 sps:$4 sm:$0xff]  }
  0xe9   :  { %v434_v32 = vmax.f32 %v260_v23, 0.0  ;;  %v264_v33 = vadd.f32 %v263_v30, %v11815_v16  ;;  %v374_v34 = vadd.f32 %v373_v31, %v11812_v15  ;;  %v435_v38 = vmax.f32 %v371_v24, 0.0 }
  0xea   :  { %v436_v36 = vmax.f32 %v262_v28, 0.0  ;;  %v444_v37 = vmax.f32 %v382_v29, 0.0 }
  0xeb   :  { %v437_v39 = vmax.f32 %v264_v33, 0.0  ;;  %v438_v40 = vmax.f32 %v374_v34, 0.0 }
  0xec   :  { %v11825_v41 = vpack.c.bf16 %v436_v36, %v433_v27  ;;  %v11827_v42 = vpack.c.bf16 %v444_v37, %v441_v35  ;;  %v10500_v35 = vld [vmem:[%s15154_s3 + $0x80] ss:$20 sps:$4 sm:$0xff]  }
  0xed   :  { %v11832_v44 = vpack.c.bf16 %v437_v39, %v434_v32  ;;  %v11834_v45 = vpack.c.bf16 %v438_v40, %v435_v38  ;;  %v267_v46 = vpop.f32.mrb[4].mxu0  ;;  %v9712_v47 = vpop.f32.mrb[4].mxu1  ;;  %v10528_v32 = vld [vmem:[%s15154_s3 + $0x1a0] ss:$20 sps:$4 sm:$0xff]  }
  0xee   :  { %v268_v49 = vadd.f32 %v267_v46, %v11809_v14  ;;  %v269_v50 = vpop.f32.mrb[5].mxu0  ;;  %v395_v51 = vadd.f32 %v9712_v47, %v11812_v15  ;;  %v386_v52 = vpop.f32.mrb[5].mxu1  ;;  %v10529_v38 = vld [vmem:[%s15154_s3 + $0x60] ss:$20 sps:$4 sm:$0xff]  }
  0xef   :  { %v270_v54 = vadd.f32 %v269_v50, %v11815_v16  ;;  %v271_v55 = vpop.f32.mrb[6].mxu0  ;;  %1332 = vmatprep.mubr.bf16.mxu0 %v11832_v44  ;;  %1446 = vmatmul.mubr.bf16.vlgmr.msra.gmra.mrb[16].mxu1 %v11834_v45  ;;  %v387_v56 = vadd.f32 %v386_v52, %v11812_v15  ;;  %v9713_v57 = vpop.f32.mrb[6].mxu1  ;;  %v10505_v52 = vld [vmem:[%s15154_s3 + $0xac] ss:$20 sps:$4 sm:$0xff]  }
  0xf0   :  { %v439_v59 = vmax.f32 %v268_v49, 0.0  ;;  %v272_v60 = vadd.f32 %v271_v55, %v11809_v14  ;;  %1527 = vmatpush1.bf16.msra.mxu1 %v10491_v43  ;;  %v273_v61 = vpop.f32.mrb[7].mxu0  ;;  %1333 = vmatmul.mubr.bf16.vlgmr.msra.gmra.mrb[32].mxu0 %v11825_v41  ;;  %v453_v62 = vmax.f32 %v395_v51, 0.0  ;;  %v398_v0 = vadd.f32 %v9713_v57, %v11812_v15  ;;  %v389_v2 = vpop.f32.mrb[7].mxu1  ;;  %v10533_v49 = vld [vmem:[%s15154_s3 + $0x1c8] ss:$20 sps:$4 sm:$0xff]  }
  0xf1   :  { %v440_v3 = vmax.f32 %v270_v54, 0.0  ;;  %v274_v4 = vadd.f32 %v273_v61, %v11815_v16  ;;  %1528 = vmatprep.subr.bf16.mxu1 %v10496_v48  ;;  %v447_v5 = vmax.f32 %v387_v56, 0.0  ;;  %v390_v6 = vadd.f32 %v389_v2, %v11812_v15  ;;  %1455 = vmatprep.mubr.bf16.mxu1 %v15167_v1 }
  0xf2   :  { %v442_v8 = vmax.f32 %v272_v60, 0.0  ;;  %v456_v12 = vmax.f32 %v398_v0, 0.0  ;;  %9539 = vmatpush3.bf16.msra.mxu0 %v10519_v53  ;;  %v10503_v60 = vld [vmem:[%s15154_s3 + $0xa8] ss:$20 sps:$4 sm:$0xff]  }
  0xf3   :  { %v443_v18 = vmax.f32 %v274_v4, 0.0  ;;  %v450_v19 = vmax.f32 %v390_v6, 0.0  ;;  %9540 = vmatprep.subr.bf16.mxu0 %v10523_v58  ;;  %v10508_v0 = vld [vmem:[%s15154_s3 + $0xd4] ss:$20 sps:$4 sm:$0xff]  }
  0xf4   :  { %v11866_v20 = vpack.c.bf16 %v442_v8, %v439_v59  ;;  %1529 = vmatpush1.bf16.msra.mxu1 %v10494_v63  ;;  %v11868_v21 = vpack.c.bf16 %v456_v12, %v453_v62  ;;  %v10534_v8 = vld [vmem:[%s15154_s3 + $0x88] ss:$20 sps:$4 sm:$0xff]  }
  0xf5   :  { %v11873_v23 = vpack.c.bf16 %v443_v18, %v440_v3  ;;  %v277_v24 = vpop.f32.mrb[8].mxu0  ;;  %v11875_v25 = vpack.c.bf16 %v450_v19, %v447_v5  ;;  %1530 = vmatprep.subr.bf16.mxu1 %v10499_v7  ;;  %v9716_v27 = vpop.f32.mrb[8].mxu1 }
  0xf6   :  { %v278_v28 = vadd.f32 %v277_v24, %v11809_v14  ;;  %v279_v29 = vpop.f32.mrb[9].mxu0  ;;  %v411_v30 = vadd.f32 %v9716_v27, %v11812_v15  ;;  %v402_v31 = vpop.f32.mrb[9].mxu1  ;;  %9541 = vmatpush3.bf16.msra.mxu0 %v10524_v17 }
  0xf7   :  { %v280_v33 = vadd.f32 %v279_v29, %v11815_v16  ;;  %v281_v34 = vpop.f32.mrb[10].mxu0  ;;  %1342 = vmatprep.mubr.bf16.mxu0 %v11873_v23  ;;  %1456 = vmatmul.mubr.bf16.gmra.mrb[20].mxu1 %v11827_v42  ;;  %v403_v36 = vadd.f32 %v402_v31, %v11812_v15  ;;  %v9717_v37 = vpop.f32.mrb[10].mxu1 }
  0xf8   :  { %v445_v39 = vmax.f32 %v278_v28, 0.0  ;;  %v282_v40 = vadd.f32 %v281_v34, %v11809_v14  ;;  %1531 = vmatpush1.bf16.msra.mxu1 %v10497_v22  ;;  %v283_v43 = vpop.f32.mrb[11].mxu0  ;;  %1343 = vmatmul.mubr.bf16.gmra.mrb[36].mxu0 %v11866_v20  ;;  %v465_v46 = vmax.f32 %v411_v30, 0.0  ;;  %v414_v47 = vadd.f32 %v9717_v37, %v11812_v15  ;;  %v405_v48 = vpop.f32.mrb[11].mxu1  ;;  %v10538_v22 = vld [vmem:[%s15154_s3 + $0x1f0] ss:$20 sps:$4 sm:$0xff]  }
  0xf9   :  { %v446_v50 = vmax.f32 %v280_v33, 0.0  ;;  %v284_v51 = vadd.f32 %v283_v43, %v11815_v16  ;;  %1532 = vmatprep.subr.bf16.mxu1 %v10502_v26  ;;  %1465 = vmatprep.mubr.bf16.mxu1 %v15167_v1  ;;  %v459_v53 = vmax.f32 %v403_v36, 0.0  ;;  %v406_v54 = vadd.f32 %v405_v48, %v11812_v15  ;;  %v10506_v28 = vld [vmem:[%s15154_s3 + $0xd0] ss:$20 sps:$4 sm:$0xff]  }
  0xfa   :  { %v448_v55 = vmax.f32 %v282_v40, 0.0  ;;  %v468_v56 = vmax.f32 %v414_v47, 0.0  ;;  %9542 = vmatprep.subr.bf16.mxu0 %v10528_v32  ;;  %v10511_v34 = vld [vmem:[%s15154_s3 + $0xfc] ss:$20 sps:$4 sm:$0xff]   ;;  %v10509_v47 = vld [vmem:[%s15154_s3 + $0xf8] ss:$20 sps:$4 sm:$0xff]  }
  0xfb   :  { %v449_v57 = vmax.f32 %v284_v51, 0.0  ;;  %v462_v58 = vmax.f32 %v406_v54, 0.0  ;;  %9543 = vmatpush3.bf16.msra.mxu0 %v10529_v38  ;;  %v10543_v54 = vld [vmem:[%s15154_s3 + $0x218] ss:$20 sps:$4 sm:$0xff]  }
  0xfc   :  { %v11907_v59 = vpack.c.bf16 %v448_v55, %v445_v39  ;;  %1533 = vmatpush1.bf16.msra.mxu1 %v10500_v35  ;;  %v11912_v61 = vpack.c.bf16 %v468_v56, %v465_v46  ;;  %9544 = vmatprep.subr.bf16.mxu0 %v10533_v49  ;;  %v10539_v39 = vld [vmem:[%s15154_s3 + $0xb0] ss:$20 sps:$4 sm:$0xff]  }
  0xfd   :  { %v11914_v62 = vpack.c.bf16 %v449_v57, %v446_v50  ;;  %v287_v63 = vpop.f32.mrb[12].mxu0  ;;  %1534 = vmatprep.subr.bf16.mxu1 %v10505_v52  ;;  %v11919_v2 = vpack.c.bf16 %v462_v58, %v459_v53  ;;  %v9720_v3 = vpop.f32.mrb[12].mxu1  ;;  %v10514_v50 = vld [vmem:[%s15154_s3 + $0x124] ss:$20 sps:$4 sm:$0xff]  }
  0xfe   :  { %v288_v4 = vadd.f32 %v287_v63, %v11809_v14  ;;  %v289_v5 = vpop.f32.mrb[13].mxu0  ;;  %v427_v6 = vadd.f32 %v9720_v3, %v11812_v15  ;;  %v418_v7 = vpop.f32.mrb[13].mxu1  ;;  %v10544_v57 = vld [vmem:[%s15154_s3 + $0xd8] ss:$20 sps:$4 sm:$0xff]   ;;  %v10548_v3 = vld [vmem:[%s15154_s3 + $0x240] ss:$20 sps:$4 sm:$0xff]  }
  0xff   :  { %v290_v12 = vadd.f32 %v289_v5, %v11815_v16  ;;  %v291_v17 = vpop.f32.mrb[14].mxu0  ;;  %1352 = vmatprep.mubr.bf16.mxu0 %v11914_v62  ;;  %1466 = vmatmul.mubr.bf16.gmra.mrb[24].mxu1 %v11875_v25  ;;  %v419_v18 = vadd.f32 %v418_v7, %v11812_v15  ;;  %v9721_v19 = vpop.f32.mrb[14].mxu1 }
 0x100   :  { %v451_v24 = vmax.f32 %v288_v4, 0.0  ;;  %v292_v26 = vadd.f32 %v291_v17, %v11809_v14  ;;  %1535 = vmatpush1.bf16.msra.mxu1 %v10503_v60  ;;  %v293_v27 = vpop.f32.mrb[15].mxu0  ;;  %1353 = vmatmul.mubr.bf16.gmra.mrb[40].mxu0 %v11907_v59  ;;  %v477_v29 = vmax.f32 %v427_v6, 0.0  ;;  %v430_v30 = vadd.f32 %v9721_v19, %v11812_v15  ;;  %v421_v31 = vpop.f32.mrb[15].mxu1  ;;  %v10517_v6 = vld [vmem:[%s15154_s3 + $0x14c] ss:$20 sps:$4 sm:$0xff]  }
 0x101   :  { %v452_v32 = vmax.f32 %v290_v12, 0.0  ;;  %v294_v33 = vadd.f32 %v293_v27, %v11815_v16  ;;  %1536 = vmatprep.subr.bf16.mxu1 %v10508_v0  ;;  %1475 = vmatprep.mubr.bf16.mxu1 %v15167_v1  ;;  %v471_v35 = vmax.f32 %v419_v18, 0.0  ;;  %v422_v36 = vadd.f32 %v421_v31, %v11812_v15  ;;  %v10512_v0 = vld [vmem:[%s15154_s3 + $0x120] ss:$20 sps:$4 sm:$0xff]   ;;  %v10515_v17 = vld [vmem:[%s15154_s3 + $0x148] ss:$20 sps:$4 sm:$0xff]  }
 0x102   :  { %v454_v37 = vmax.f32 %v292_v26, 0.0  ;;  %v480_v38 = vmax.f32 %v430_v30, 0.0  ;;  %9545 = vmatpush3.bf16.msra.mxu0 %v10534_v8  ;;  %v10549_v27 = vld [vmem:[%s15154_s3 + $0x100] ss:$20 sps:$4 sm:$0xff]   ;;  %v10520_v30 = vld [vmem:[%s15154_s3 + $0x170] ss:$20 sps:$4 sm:$0xff]  }
 0x103   :  { %v455_v40 = vmax.f32 %v294_v33, 0.0  ;;  %v474_v43 = vmax.f32 %v422_v36, 0.0  ;;  %9546 = vmatprep.subr.bf16.mxu0 %v10538_v22  ;;  %v10522_v22 = vld [vmem:[%s15154_s3 + $0x174] ss:$20 sps:$4 sm:$0xff]  }
 0x104   :  { %v11948_v46 = vpack.c.bf16 %v454_v37, %v451_v24  ;;  %1537 = vmatpush1.bf16.msra.mxu1 %v10506_v28  ;;  %v11953_v48 = vpack.c.bf16 %v480_v38, %v477_v29  ;;  %v10553_v31 = vld [vmem:[%s15154_s3 + $0x268] ss:$20 sps:$4 sm:$0xff]  }
 0x105   :  { %v11955_v15 = vpack.c.bf16 %v455_v40, %v452_v32  ;;  %v297_v49 = vpop.f32.mrb[16].mxu0  ;;  %1538 = vmatprep.subr.bf16.mxu1 %v10511_v34  ;;  %v11960_v51 = vpack.c.bf16 %v474_v43, %v471_v35  ;;  %v10527_v35 = vld [vmem:[%s15154_s3 + $0x19c] ss:$20 sps:$4 sm:$0xff]   ;;  %v10525_v40 = vld [vmem:[%s15154_s3 + $0x198] ss:$20 sps:$4 sm:$0xff]  }
 0x106   :  { %v298_v52 = vadd.f32 %v297_v49, %v11809_v14  ;;  %v299_v53 = vpop.f32.mrb[17].mxu0  ;;  %9547 = vmatpush3.bf16.msra.mxu0 %v10539_v39  ;;  %v10554_v38 = vld [vmem:[%s15154_s3 + $0x128] ss:$20 sps:$4 sm:$0xff]  }
 0x107   :  { %v300_v55 = vadd.f32 %v299_v53, %v11815_v16  ;;  %v301_v56 = vpop.f32.mrb[18].mxu0  ;;  %1362 = vmatprep.mubr.bf16.mxu0 %v11955_v15  ;;  %1476 = vmatmul.mubr.bf16.gmra.mrb[28].mxu1 %v11868_v21 }
 0x108   :  { %v457_v58 = vmax.f32 %v298_v52, 0.0  ;;  %v302_v60 = vadd.f32 %v301_v56, %v11809_v14  ;;  %1539 = vmatpush1.bf16.msra.mxu1 %v10509_v47  ;;  %v303_v63 = vpop.f32.mrb[19].mxu0  ;;  %1363 = vmatmul.mubr.bf16.gmra.mrb[44].mxu0 %v11948_v46  ;;  %v10532_v47 = vld [vmem:[%s15154_s3 + $0x1c4] ss:$20 sps:$4 sm:$0xff]  }
 0x109   :  { %v458_v4 = vmax.f32 %v300_v55, 0.0  ;;  %v304_v5 = vadd.f32 %v303_v63, %v11815_v16  ;;  %1540 = vmatprep.subr.bf16.mxu1 %v10514_v50  ;;  %1485 = vmatprep.mubr.bf16.mxu1 %v15167_v1  ;;  %v10586_v55 = vld [vmem:[%s15156_s5 + $0x4] ss:$48 sps:$4 sm:$0xff]  }
 0x10a   :  { %v460_v7 = vmax.f32 %v302_v60, 0.0  ;;  %9548 = vmatprep.subr.bf16.mxu0 %v10543_v54 }
 0x10b   :  { %v461_v8 = vmax.f32 %v304_v5, 0.0  ;;  %9549 = vmatpush3.bf16.msra.mxu0 %v10544_v57 }
 0x10c   :  { %v11985_v12 = vpack.c.bf16 %v460_v7, %v457_v58  ;;  %1541 = vmatpush1.bf16.msra.mxu1 %v10512_v0  ;;  %9550 = vmatprep.subr.bf16.mxu0 %v10548_v3  ;;  %v10530_v0 = vld [vmem:[%s15154_s3 + $0x1c0] ss:$20 sps:$4 sm:$0xff]   ;;  %v10535_v7 = vld [vmem:[%s15154_s3 + $0x1e8] ss:$20 sps:$4 sm:$0xff]  }
 0x10d   :  { %v11990_v18 = vpack.c.bf16 %v461_v8, %v458_v4  ;;  %v307_v19 = vpop.f32.mrb[20].mxu0  ;;  %1542 = vmatprep.subr.bf16.mxu1 %v10517_v6  ;;  %v10537_v3 = vld [vmem:[%s15154_s3 + $0x1ec] ss:$20 sps:$4 sm:$0xff]  }
 0x10e   :  { %v308_v24 = vadd.f32 %v307_v19, %v11809_v14  ;;  %v309_v26 = vpop.f32.mrb[21].mxu0 }
 0x10f   :  { %v310_v28 = vadd.f32 %v309_v26, %v11815_v16  ;;  %v311_v29 = vpop.f32.mrb[22].mxu0  ;;  %1372 = vmatprep.mubr.bf16.mxu0 %v11990_v18  ;;  %1486 = vmatmul.mubr.bf16.gmra.mrb[32].mxu1 %v11919_v2 }
 0x110   :  { %v463_v32 = vmax.f32 %v308_v24, 0.0  ;;  %v312_v33 = vadd.f32 %v311_v29, %v11809_v14  ;;  %1543 = vmatpush1.bf16.msra.mxu1 %v10515_v17  ;;  %v313_v34 = vpop.f32.mrb[23].mxu0  ;;  %1373 = vmatmul.mubr.bf16.gmra.mrb[48].mxu0 %v11985_v12  ;;  %v10542_v17 = vld [vmem:[%s15154_s3 + $0x214] ss:$20 sps:$4 sm:$0xff]  }
 0x111   :  { %v464_v36 = vmax.f32 %v310_v28, 0.0  ;;  %v314_v37 = vadd.f32 %v313_v34, %v11815_v16  ;;  %1544 = vmatprep.subr.bf16.mxu1 %v10522_v22  ;;  %1495 = vmatprep.mubr.bf16.mxu1 %v15167_v1  ;;  %v10547_v34 = vld [vmem:[%s15154_s3 + $0x23c] ss:$20 sps:$4 sm:$0xff]  }
 0x112   :  { %v466_v39 = vmax.f32 %v312_v33, 0.0  ;;  %9551 = vmatpush3.bf16.msra.mxu0 %v10549_v27  ;;  %v10540_v33 = vld [vmem:[%s15154_s3 + $0x210] ss:$20 sps:$4 sm:$0xff]  }
 0x113   :  { %v467_v43 = vmax.f32 %v314_v37, 0.0  ;;  %9552 = vmatprep.subr.bf16.mxu0 %v10553_v31 }
 0x114   :  { %v12024_v49 = vpack.c.bf16 %v466_v39, %v463_v32  ;;  %1545 = vmatpush1.bf16.msra.mxu1 %v10520_v30 }
 0x115   :  { %v12026_v50 = vpack.c.bf16 %v467_v43, %v464_v36  ;;  %v317_v52 = vpop.f32.mrb[24].mxu0  ;;  %1546 = vmatprep.subr.bf16.mxu1 %v10527_v35  ;;  %v10552_v43 = vld [vmem:[%s15154_s3 + $0x264] ss:$20 sps:$4 sm:$0xff]  }
 0x116   :  { %v318_v53 = vadd.f32 %v317_v52, %v11809_v14  ;;  %v319_v54 = vpop.f32.mrb[25].mxu0  ;;  %9553 = vmatpush3.bf16.msra.mxu0 %v10554_v38  ;;  %v10555_v52 = vld [vmem:[%s15154_s3 + $0x288] ss:$20 sps:$4 sm:$0xff]  }
 0x117   :  { %v320_v56 = vadd.f32 %v319_v54, %v11815_v16  ;;  %v321_v57 = vpop.f32.mrb[26].mxu0  ;;  %1382 = vmatprep.mubr.bf16.mxu0 %v12026_v50  ;;  %1496 = vmatmul.mubr.bf16.gmra.mrb[36].mxu1 %v11912_v61  ;;  %v10584_v54 = vld [vmem:[%s15156_s5] ss:$48 sps:$4 sm:$0xff]  }
 0x118   :  { %v469_v58 = vmax.f32 %v318_v53, 0.0  ;;  %v322_v60 = vadd.f32 %v321_v57, %v11809_v14  ;;  %1547 = vmatpush1.bf16.msra.mxu1 %v10525_v40  ;;  %v323_v63 = vpop.f32.mrb[27].mxu0  ;;  %1383 = vmatmul.mubr.bf16.gmra.mrb[52].mxu0 %v12024_v49  ;;  %v10560_v53 = vld [vmem:[%s15154_s3 + $0x2b4] ss:$20 sps:$4 sm:$0xff]   ;;  %v10587_v57 = vld [vmem:[%s15156_s5 + $0x60] ss:$48 sps:$4 sm:$0xff]  }
 0x119   :  { %v470_v4 = vmax.f32 %v320_v56, 0.0  ;;  %v324_v5 = vadd.f32 %v323_v63, %v11815_v16  ;;  %1548 = vmatprep.subr.bf16.mxu1 %v10532_v47  ;;  %1505 = vmatprep.mubr.bf16.mxu1 %v15167_v1  ;;  %v10557_v47 = vld [vmem:[%s15154_s3 + $0x28c] ss:$20 sps:$4 sm:$0xff]   ;;  %v10563_v56 = vld [vmem:[%s15154_s3 + $0x2dc] ss:$20 sps:$4 sm:$0xff]  }
 0x11a   :  { %v472_v6 = vmax.f32 %v322_v60, 0.0  ;;  %4946 = vmatprep.subr.bf16.mxu0 %v10586_v55  ;;  %v10558_v55 = vld [vmem:[%s15154_s3 + $0x2b0] ss:$20 sps:$4 sm:$0xff]  }
 0x11b   :  { %v473_v8 = vmax.f32 %v324_v5, 0.0  ;;  %v10566_v60 = vld [vmem:[%s15154_s3 + $0x304] ss:$20 sps:$4 sm:$0xff]   ;;  %v10567_v5 = vld [vmem:[%s15154_s3 + $0x328] ss:$20 sps:$4 sm:$0xff]  }
 0x11c   :  { %v12051_v19 = vpack.c.bf16 %v472_v6, %v469_v58  ;;  %1549 = vmatpush1.bf16.msra.mxu1 %v10530_v0  ;;  %v10561_v58 = vld [vmem:[%s15154_s3 + $0x2d8] ss:$20 sps:$4 sm:$0xff]   ;;  %v10596_v63 = vld [vmem:[%s15156_s5 + $0x124] ss:$48 sps:$4 sm:$0xff]  }
 0x11d   :  { %v12053_v22 = vpack.c.bf16 %v473_v8, %v470_v4  ;;  %v327_v24 = vpop.f32.mrb[28].mxu0  ;;  %1550 = vmatprep.subr.bf16.mxu1 %v10537_v3  ;;  %v10564_v0 = vld [vmem:[%s15154_s3 + $0x300] ss:$20 sps:$4 sm:$0xff]   ;;  %v10570_v8 = vld [vmem:[%s15154_s3 + $0x350] ss:$20 sps:$4 sm:$0xff]  }
 0x11e   :  { %v328_v26 = vadd.f32 %v327_v24, %v11809_v14  ;;  %v329_v27 = vpop.f32.mrb[29].mxu0  ;;  %v10569_v3 = vld [vmem:[%s15154_s3 + $0x32c] ss:$20 sps:$4 sm:$0xff]   ;;  %v10572_v6 = vld [vmem:[%s15154_s3 + $0x354] ss:$20 sps:$4 sm:$0xff]  }
 0x11f   :  { %v330_v28 = vadd.f32 %v329_v27, %v11815_v16  ;;  %v331_v29 = vpop.f32.mrb[30].mxu0  ;;  %1392 = vmatprep.mubr.bf16.mxu0 %v12053_v22  ;;  %1506 = vmatmul.mubr.bf16.gmra.mrb[40].mxu1 %v11960_v51  ;;  %v10594_v4 = vld [vmem:[%s15156_s5 + $0x120] ss:$48 sps:$4 sm:$0xff]  }
 0x120   :  { %v475_v30 = vmax.f32 %v328_v26, 0.0  ;;  %v332_v31 = vadd.f32 %v331_v29, %v11809_v14  ;;  %1551 = vmatpush1.bf16.msra.mxu1 %v10535_v7  ;;  %v333_v32 = vpop.f32.mrb[31].mxu0  ;;  %1393 = vmatmul.mubr.bf16.gmra.mrb[56].mxu0 %v12051_v19  ;;  %v10545_v14 = vld [vmem:[%s15154_s3 + $0x238] ss:$20 sps:$4 sm:$0xff]   ;;  %v10603_v7 = vld [vmem:[%s15156_s5 + $0x1e4] ss:$48 sps:$4 sm:$0xff]  }
 0x121   :  { %v476_v35 = vmax.f32 %v330_v28, 0.0  ;;  %v334_v36 = vadd.f32 %v333_v32, %v11815_v16  ;;  %1552 = vmatprep.subr.bf16.mxu1 %v10542_v17  ;;  %1515 = vmatprep.mubr.bf16.mxu1 %v15167_v1  ;;  %v10550_v16 = vld [vmem:[%s15154_s3 + $0x260] ss:$20 sps:$4 sm:$0xff]   ;;  %v10575_v17 = vld [vmem:[%s15154_s3 + $0x37c] ss:$20 sps:$4 sm:$0xff]  }
 0x122   :  { %v478_v37 = vmax.f32 %v332_v31, 0.0  ;;  %v10601_v24 = vld [vmem:[%s15156_s5 + $0x1e0] ss:$48 sps:$4 sm:$0xff]   ;;  %v10578_v26 = vld [vmem:[%s15154_s3 + $0x3a4] ss:$20 sps:$4 sm:$0xff]  }
 0x123   :  { %v479_v38 = vmax.f32 %v334_v36, 0.0  ;;  %v10605_v27 = vld [vmem:[%s15156_s5 + $0x240] ss:$48 sps:$4 sm:$0xff]   ;;  %v10610_v28 = vld [vmem:[%s15156_s5 + $0x2a4] ss:$48 sps:$4 sm:$0xff]  }
 0x124   :  { %v12072_v39 = vpack.c.bf16 %v478_v37, %v475_v30  ;;  %1553 = vmatpush1.bf16.msra.mxu1 %v10540_v33  ;;  %v10576_v29 = vld [vmem:[%s15154_s3 + $0x3a0] ss:$20 sps:$4 sm:$0xff]   ;;  %v10579_v30 = vld [vmem:[%s15154_s3 + $0x290] ss:$20 sps:$4 sm:$0xff]  }
 0x125   :  { %v12074_v40 = vpack.c.bf16 %v479_v38, %v476_v35  ;;  %1554 = vmatprep.subr.bf16.mxu1 %v10547_v34  ;;  %v10608_v31 = vld [vmem:[%s15156_s5 + $0x2a0] ss:$48 sps:$4 sm:$0xff]   ;;  %v10622_v32 = vld [vmem:[%s15156_s5 + $0x364] ss:$48 sps:$4 sm:$0xff]  }
 0x126   :  { %v10620_v33 = vld [vmem:[%s15156_s5 + $0x360] ss:$48 sps:$4 sm:$0xff]   ;;  %v10628_v34 = vld [vmem:[%s15156_s5 + $0x3c4] ss:$48 sps:$4 sm:$0xff]  }
 0x127   :  { %1402 = vmatprep.mubr.bf16.mxu0 %v12074_v40  ;;  %1516 = vmatmul.mubr.bf16.gmra.mrb[44].mxu1 %v11953_v48  ;;  %v10626_v35 = vld [vmem:[%s15156_s5 + $0x3c0] ss:$48 sps:$4 sm:$0xff]   ;;  %v10640_v36 = vld [vmem:[%s15156_s5 + $0x484] ss:$48 sps:$4 sm:$0xff]  }
 0x128   :  { %1555 = vmatpush1.bf16.msra.mxu1 %v10545_v14  ;;  %1403 = vmatmul.mubr.bf16.gmra.mrb[60].mxu0 %v12072_v39  ;;  %v10638_v37 = vld [vmem:[%s15156_s5 + $0x480] ss:$48 sps:$4 sm:$0xff]   ;;  %v10652_v14 = vld [vmem:[%s15156_s5 + $0x544] ss:$48 sps:$4 sm:$0xff]  }
 0x129   :  { %1558 = vmatprep.mubr.bf16.mxu1 %v11832_v44  ;;  %1784 = vmatprep.mubr.bf16.mxu0 %v11832_v44  ;;  %v10589_v44 = vld [vmem:[%s15156_s5 + $0x64] ss:$48 sps:$4 sm:$0xff]   ;;  %v10650_v38 = vld [vmem:[%s15156_s5 + $0x540] ss:$48 sps:$4 sm:$0xff]  }
 0x12a   :  { %1556 = vmatprep.subr.bf16.mxu1 %v10552_v43  ;;  %v10580_v43 = vld [vmem:[%s15154_s3 + $0x2b8] ss:$20 sps:$4 sm:$0xff]  }
 0x12c   :  { %1557 = vmatpush1.bf16.msra.mxu1 %v10550_v16  ;;  %v10581_v16 = vld [vmem:[%s15154_s3 + $0x2e0] ss:$20 sps:$4 sm:$0xff]  }
 0x12d   :  { %1639 = vmatprep.subr.bf16.mxu1 %v10557_v47  ;;  %v10583_v47 = vld [vmem:[%s15154_s3 + $0x330] ss:$20 sps:$4 sm:$0xff]  }
 0x12f   :  { %1559 = vmatmul.mubr.bf16.vlgmr.msra.gmra.mrb[48].mxu1 %v11825_v41 }
 0x130   :  { %1640 = vmatpush1.bf16.msra.mxu1 %v10555_v52  ;;  %1785 = vmatmul.mubr.bf16.vlgmr.msra.gmra.mrb[64].mxu0 %v11825_v41  ;;  %v10593_v41 = vld [vmem:[%s15156_s5 + $0xc4] ss:$48 sps:$4 sm:$0xff]   ;;  %v10590_v52 = vld [vmem:[%s15154_s3 + $0x358] ss:$20 sps:$4 sm:$0xff]  }
 0x131   :  { %1568 = vmatprep.mubr.bf16.mxu1 %v11873_v23  ;;  %1792 = vmatprep.mubr.bf16.mxu0 %v11873_v23  ;;  %v10591_v23 = vld [vmem:[%s15156_s5 + $0xc0] ss:$48 sps:$4 sm:$0xff]  }
 0x132   :  { %1641 = vmatprep.subr.bf16.mxu1 %v10560_v53  ;;  %4947 = vmatpush1.bf16.msra.mxu0 %v10584_v54  ;;  %v10597_v53 = vld [vmem:[%s15154_s3 + $0x380] ss:$20 sps:$4 sm:$0xff]   ;;  %v10604_v54 = vld [vmem:[%s15154_s3 + $0x3a8] ss:$20 sps:$4 sm:$0xff]  }
 0x133   :  { %4948 = vmatprep.subr.bf16.mxu0 %v10589_v44  ;;  %v10613_v44 = vld [vmem:[%s15156_s5 + $0xc] ss:$48 sps:$4 sm:$0xff]  }
 0x134   :  { %1642 = vmatpush1.bf16.msra.mxu1 %v10558_v55  ;;  %v10685_v55 = vld [vmem:[%s15156_s5 + $0x604] ss:$48 sps:$4 sm:$0xff]  }
 0x135   :  { %1643 = vmatprep.subr.bf16.mxu1 %v10563_v56  ;;  %v10611_v56 = vld [vmem:[%s15156_s5 + $0x8] ss:$48 sps:$4 sm:$0xff]  }
 0x136   :  { %4949 = vmatpush1.bf16.msra.mxu0 %v10587_v57  ;;  %v10619_v57 = vld [vmem:[%s15156_s5 + $0x6c] ss:$48 sps:$4 sm:$0xff]  }
 0x137   :  { %1569 = vmatmul.mubr.bf16.gmra.mrb[52].mxu1 %v11866_v20  ;;  %4950 = vmatprep.subr.bf16.mxu0 %v10593_v41  ;;  %v10617_v41 = vld [vmem:[%s15156_s5 + $0x68] ss:$48 sps:$4 sm:$0xff]  }
 0x138   :  { %1793 = vmatmul.mubr.bf16.gmra.mrb[68].mxu0 %v11866_v20  ;;  %1578 = vmatprep.mubr.bf16.mxu1 %v11914_v62  ;;  %v10600_v20 = vld [vmem:[%s15156_s5 + $0x184] ss:$48 sps:$4 sm:$0xff]  }
 0x139   :  { %1800 = vmatprep.mubr.bf16.mxu0 %v11914_v62  ;;  %1644 = vmatpush1.bf16.msra.mxu1 %v10561_v58  ;;  %v10598_v62 = vld [vmem:[%s15156_s5 + $0x180] ss:$48 sps:$4 sm:$0xff]   ;;  %v10623_v58 = vld [vmem:[%s15156_s5 + $0xc8] ss:$48 sps:$4 sm:$0xff]  }
 0x13a   :  { %1645 = vmatprep.subr.bf16.mxu1 %v10566_v60  ;;  %4951 = vmatpush1.bf16.msra.mxu0 %v10591_v23  ;;  %v10637_v60 = vld [vmem:[%s15156_s5 + $0x18c] ss:$48 sps:$4 sm:$0xff]   ;;  %v10635_v23 = vld [vmem:[%s15156_s5 + $0x188] ss:$48 sps:$4 sm:$0xff]  }
 0x13b   :  { %4952 = vmatprep.subr.bf16.mxu0 %v10596_v63  ;;  %v649_v63 = vld [vmem:[%s15157_s4] sm:$0x1f] }
 0x13d   :  { %1646 = vmatpush1.bf16.msra.mxu1 %v10564_v0  ;;  %v12348_v0 = vrot.slane %v649_v63, %v11797_v10 }
 0x13e   :  { %1647 = vmatprep.subr.bf16.mxu1 %v10569_v3  ;;  %4953 = vmatpush1.bf16.msra.mxu0 %v10594_v4  ;;  %v10649_v3 = vld [vmem:[%s15156_s5 + $0x24c] ss:$48 sps:$4 sm:$0xff]   ;;  %v12354_v4 = vrot.slane %v649_v63, %v11806_v13  ;;  %v10665_v63 = vld [vmem:[%s15156_s5 + $0x3c8] ss:$48 sps:$4 sm:$0xff]  }
 0x13f   :  { %1579 = vmatmul.mubr.bf16.gmra.mrb[56].mxu1 %v11907_v59  ;;  %4954 = vmatprep.subr.bf16.mxu0 %v10600_v20 }
 0x140   :  { %1801 = vmatmul.mubr.bf16.gmra.mrb[72].mxu0 %v11907_v59  ;;  %1588 = vmatprep.mubr.bf16.mxu1 %v11955_v15  ;;  %v10607_v59 = vld [vmem:[%s15156_s5 + $0x244] ss:$48 sps:$4 sm:$0xff]  }
 0x141   :  { %1808 = vmatprep.mubr.bf16.mxu0 %v11955_v15  ;;  %1648 = vmatpush1.bf16.msra.mxu1 %v10567_v5  ;;  %v10573_v15 = vld [vmem:[%s15154_s3 + $0x378] ss:$20 sps:$4 sm:$0xff]  }
 0x142   :  { %1649 = vmatprep.subr.bf16.mxu1 %v10572_v6  ;;  %4955 = vmatpush1.bf16.msra.mxu0 %v10598_v62 }
 0x143   :  { %4956 = vmatprep.subr.bf16.mxu0 %v10603_v7 }
 0x145   :  { %1650 = vmatpush1.bf16.msra.mxu1 %v10570_v8 }
 0x146   :  { %1651 = vmatprep.subr.bf16.mxu1 %v10575_v17  ;;  %4957 = vmatpush1.bf16.msra.mxu0 %v10601_v24 }
 0x147   :  { %1589 = vmatmul.mubr.bf16.gmra.mrb[60].mxu1 %v11948_v46  ;;  %4958 = vmatprep.subr.bf16.mxu0 %v10607_v59  ;;  %v10655_v59 = vld [vmem:[%s15156_s5 + $0x2ac] ss:$48 sps:$4 sm:$0xff]  }
 0x148   :  { %1809 = vmatmul.mubr.bf16.gmra.mrb[76].mxu0 %v11948_v46  ;;  %1598 = vmatprep.mubr.bf16.mxu1 %v11990_v18  ;;  %v10616_v46 = vld [vmem:[%s15156_s5 + $0x304] ss:$48 sps:$4 sm:$0xff]  }
 0x149   :  { %1816 = vmatprep.mubr.bf16.mxu0 %v11990_v18  ;;  %1652 = vmatpush1.bf16.msra.mxu1 %v10573_v15  ;;  %v10614_v18 = vld [vmem:[%s15156_s5 + $0x300] ss:$48 sps:$4 sm:$0xff]  }
 0x14a   :  { %1653 = vmatprep.subr.bf16.mxu1 %v10578_v26  ;;  %4959 = vmatpush1.bf16.msra.mxu0 %v10605_v27 }
 0x14b   :  { %4960 = vmatprep.subr.bf16.mxu0 %v10610_v28 }
 0x14d   :  { %1654 = vmatpush1.bf16.msra.mxu1 %v10576_v29 }
 0x14e   :  { %9722 = vmatprep.subr.bf16.mxu1 %v10579_v30  ;;  %4961 = vmatpush1.bf16.msra.mxu0 %v10608_v31  ;;  %v10653_v31 = vld [vmem:[%s15156_s5 + $0x2a8] ss:$48 sps:$4 sm:$0xff]  }
 0x14f   :  { %1599 = vmatmul.mubr.bf16.gmra.mrb[64].mxu1 %v11985_v12  ;;  %4962 = vmatprep.subr.bf16.mxu0 %v10616_v46 }
 0x150   :  { %1817 = vmatmul.mubr.bf16.gmra.mrb[80].mxu0 %v11985_v12  ;;  %1608 = vmatprep.mubr.bf16.mxu1 %v12026_v50  ;;  %v10634_v12 = vld [vmem:[%s15156_s5 + $0x424] ss:$48 sps:$4 sm:$0xff]  }
 0x151   :  { %1824 = vmatprep.mubr.bf16.mxu0 %v12026_v50  ;;  %v10632_v50 = vld [vmem:[%s15156_s5 + $0x420] ss:$48 sps:$4 sm:$0xff]  }
 0x152   :  { %4963 = vmatpush1.bf16.msra.mxu0 %v10614_v18 }
 0x153   :  { %4964 = vmatprep.subr.bf16.mxu0 %v10622_v32  ;;  %v10661_v32 = vld [vmem:[%s15156_s5 + $0x30c] ss:$48 sps:$4 sm:$0xff]  }
 0x156   :  { %4965 = vmatpush1.bf16.msra.mxu0 %v10620_v33 }
 0x157   :  { %1609 = vmatmul.mubr.bf16.gmra.mrb[68].mxu1 %v12024_v49  ;;  %4966 = vmatprep.subr.bf16.mxu0 %v10628_v34 }
 0x158   :  { %1825 = vmatmul.mubr.bf16.gmra.mrb[84].mxu0 %v12024_v49  ;;  %1618 = vmatprep.mubr.bf16.mxu1 %v12053_v22  ;;  %v10646_v49 = vld [vmem:[%s15156_s5 + $0x4e4] ss:$48 sps:$4 sm:$0xff]  }
 0x159   :  { %1832 = vmatprep.mubr.bf16.mxu0 %v12053_v22  ;;  %v10644_v22 = vld [vmem:[%s15156_s5 + $0x4e0] ss:$48 sps:$4 sm:$0xff]  }
 0x15a   :  { %4967 = vmatpush1.bf16.msra.mxu0 %v10626_v35 }
 0x15b   :  { %4968 = vmatprep.subr.bf16.mxu0 %v10634_v12 }
 0x15e   :  { %4969 = vmatpush1.bf16.msra.mxu0 %v10632_v50 }
 0x15f   :  { %1619 = vmatmul.mubr.bf16.gmra.mrb[72].mxu1 %v12051_v19  ;;  %4970 = vmatprep.subr.bf16.mxu0 %v10640_v36 }
 0x160   :  { %1833 = vmatmul.mubr.bf16.gmra.mrb[88].mxu0 %v12051_v19  ;;  %1628 = vmatprep.mubr.bf16.mxu1 %v12074_v40  ;;  %v10658_v19 = vld [vmem:[%s15156_s5 + $0x5a4] ss:$48 sps:$4 sm:$0xff]  }
 0x161   :  { %1840 = vmatprep.mubr.bf16.mxu0 %v12074_v40  ;;  %v10656_v40 = vld [vmem:[%s15156_s5 + $0x5a0] ss:$48 sps:$4 sm:$0xff]  }
 0x162   :  { %4971 = vmatpush1.bf16.msra.mxu0 %v10638_v37  ;;  %v10664_v37 = vld [vmem:[%s15156_s5 + $0x36c] ss:$48 sps:$4 sm:$0xff]  }
 0x163   :  { %4972 = vmatprep.subr.bf16.mxu0 %v10646_v49  ;;  %v10683_v49 = vld [vmem:[%s15156_s5 + $0x600] ss:$48 sps:$4 sm:$0xff]  }
 0x166   :  { %4973 = vmatpush1.bf16.msra.mxu0 %v10644_v22 }
 0x167   :  { %1629 = vmatmul.mubr.bf16.gmra.mrb[76].mxu1 %v12072_v39  ;;  %4974 = vmatprep.subr.bf16.mxu0 %v10652_v14 }
 0x168   :  { %1841 = vmatmul.mubr.bf16.gmra.mrb[92].mxu0 %v12072_v39  ;;  %1671 = vmatprep.mubr.bf16.mxu1 %v15167_v1  ;;  %v10582_v39 = vld [vmem:[%s15154_s3 + $0x308] ss:$20 sps:$4 sm:$0xff]  }
 0x16a   :  { %4975 = vmatpush1.bf16.msra.mxu0 %v10650_v38 }
 0x16b   :  { %4976 = vmatprep.subr.bf16.mxu0 %v10658_v19 }
 0x16e   :  { %4977 = vmatpush1.bf16.msra.mxu0 %v10656_v40  ;;  %v10691_v40 = vld [vmem:[%s15156_s5 + $0x664] ss:$48 sps:$4 sm:$0xff]  }
 0x16f   :  { %1672 = vmatmul.mubr.bf16.vlgmr.msra.gmra.mrb[48].mxu1 %v11834_v45  ;;  %5059 = vmatprep.subr.bf16.mxu0 %v10685_v55 }
 0x170   :  { %9723 = vmatpush3.bf16.msra.mxu1 %v10579_v30  ;;  %1681 = vmatprep.mubr.bf16.mxu1 %v15167_v1 }
 0x171   :  { %9724 = vmatprep.subr.bf16.mxu1 %v10580_v43 }
 0x174   :  { %9725 = vmatpush3.bf16.msra.mxu1 %v10580_v43 }
 0x175   :  { %9726 = vmatprep.subr.bf16.mxu1 %v10581_v16 }
 0x177   :  { %1682 = vmatmul.mubr.bf16.gmra.mrb[52].mxu1 %v11827_v42 }
 0x178   :  { %1691 = vmatprep.mubr.bf16.mxu1 %v15167_v1  ;;  %9727 = vmatpush3.bf16.msra.mxu1 %v10581_v16 }
 0x179   :  { %9728 = vmatprep.subr.bf16.mxu1 %v10582_v39 }
 0x17c   :  { %9729 = vmatpush3.bf16.msra.mxu1 %v10582_v39 }
 0x17d   :  { %9730 = vmatprep.subr.bf16.mxu1 %v10583_v47 }
 0x17f   :  { %1692 = vmatmul.mubr.bf16.gmra.mrb[56].mxu1 %v11875_v25 }
 0x180   :  { %1701 = vmatprep.mubr.bf16.mxu1 %v15167_v1  ;;  %9731 = vmatpush3.bf16.msra.mxu1 %v10583_v47 }
 0x181   :  { %9732 = vmatprep.subr.bf16.mxu1 %v10590_v52 }
 0x184   :  { %9733 = vmatpush3.bf16.msra.mxu1 %v10590_v52 }
 0x185   :  { %9734 = vmatprep.subr.bf16.mxu1 %v10597_v53 }
 0x187   :  { %1702 = vmatmul.mubr.bf16.gmra.mrb[60].mxu1 %v11868_v21 }
 0x188   :  { %1711 = vmatprep.mubr.bf16.mxu1 %v15167_v1  ;;  %9735 = vmatpush3.bf16.msra.mxu1 %v10597_v53 }
 0x189   :  { %9736 = vmatprep.subr.bf16.mxu1 %v10604_v54 }
 0x18c   :  { %9737 = vmatpush3.bf16.msra.mxu1 %v10604_v54 }
 0x18d   :  { %5285 = vmatprep.subr.bf16.mxu1 %v10613_v44  ;;  %v10662_v44 = vld [vmem:[%s15156_s5 + $0x368] ss:$48 sps:$4 sm:$0xff]  }
 0x18f   :  { %1712 = vmatmul.mubr.bf16.gmra.mrb[64].mxu1 %v11919_v2 }
 0x190   :  { %1721 = vmatprep.mubr.bf16.mxu1 %v15167_v1 }
 0x197   :  { %1722 = vmatmul.mubr.bf16.gmra.mrb[68].mxu1 %v11912_v61 }
 0x198   :  { %1731 = vmatprep.mubr.bf16.mxu1 %v15167_v1 }
 0x19f   :  { %1732 = vmatmul.mubr.bf16.gmra.mrb[72].mxu1 %v11960_v51 }
 0x1a0   :  { %1741 = vmatprep.mubr.bf16.mxu1 %v15167_v1 }
 0x1a7   :  { %1742 = vmatmul.mubr.bf16.gmra.mrb[76].mxu1 %v11953_v48 }
 0x1a8   :  { %9738 = vmatprep.mubr.bf16.mxu1 %v11834_v45  ;;  %v10625_v45 = vld [vmem:[%s15156_s5 + $0xcc] ss:$48 sps:$4 sm:$0xff]  }
 0x1af   :  { %9739 = vmatmul.mubr.bf16.vlgmr.msra.gmra.mrb[80].mxu1 %v11827_v42  ;;  %v10631_v42 = vld [vmem:[%s15156_s5 + $0x12c] ss:$48 sps:$4 sm:$0xff]  }
 0x1b0   :  { %5286 = vmatpush1.bf16.msra.mxu1 %v10611_v56  ;;  %9742 = vmatprep.mubr.bf16.mxu1 %v11875_v25  ;;  %v10629_v25 = vld [vmem:[%s15156_s5 + $0x128] ss:$48 sps:$4 sm:$0xff]  }
 0x1b1   :  { %5287 = vmatprep.subr.bf16.mxu1 %v10619_v57  ;;  %v10667_v57 = vld [vmem:[%s15156_s5 + $0x3cc] ss:$48 sps:$4 sm:$0xff]  }
 0x1b4   :  { %5288 = vmatpush1.bf16.msra.mxu1 %v10617_v41 }
 0x1b5   :  { %5289 = vmatprep.subr.bf16.mxu1 %v10625_v45 }
 0x1b7   :  { %9743 = vmatmul.mubr.bf16.gmra.mrb[84].mxu1 %v11868_v21  ;;  %v10643_v21 = vld [vmem:[%s15156_s5 + $0x1ec] ss:$48 sps:$4 sm:$0xff]  }
 0x1b8   :  { %5290 = vmatpush1.bf16.msra.mxu1 %v10623_v58  ;;  %9746 = vmatprep.mubr.bf16.mxu1 %v11919_v2  ;;  %v10641_v2 = vld [vmem:[%s15156_s5 + $0x1e8] ss:$48 sps:$4 sm:$0xff]  }
 0x1b9   :  { %5291 = vmatprep.subr.bf16.mxu1 %v10631_v42  ;;  %v10689_v42 = vld [vmem:[%s15156_s5 + $0x660] ss:$48 sps:$4 sm:$0xff]  }
 0x1bc   :  { %5292 = vmatpush1.bf16.msra.mxu1 %v10629_v25  ;;  %v10697_v25 = vld [vmem:[%s15156_s5 + $0x6c4] ss:$48 sps:$4 sm:$0xff]  }
 0x1bd   :  { %5293 = vmatprep.subr.bf16.mxu1 %v10637_v60 }
 0x1bf   :  { %9747 = vmatmul.mubr.bf16.gmra.mrb[88].mxu1 %v11912_v61 }
 0x1c0   :  { %5294 = vmatpush1.bf16.msra.mxu1 %v10635_v23  ;;  %9750 = vmatprep.mubr.bf16.mxu1 %v11960_v51  ;;  %v10647_v51 = vld [vmem:[%s15156_s5 + $0x248] ss:$48 sps:$4 sm:$0xff]  }
 0x1c1   :  { %5295 = vmatprep.subr.bf16.mxu1 %v10643_v21 }
 0x1c2   :  { %v1447_v20 = vpop.f32.mrb[16].mxu1 }
 0x1c3   :  { %v1334_v61 = vpop.f32.mrb[32].mxu0  ;;  %v1449_v5 = vpop.f32.mrb[17].mxu1 }
 0x1c4   :  { %v1335_v6 = vadd.f32 %v1334_v61, %v12348_v0  ;;  %5296 = vmatpush1.bf16.msra.mxu1 %v10641_v2  ;;  %v1336_v62 = vpop.f32.mrb[33].mxu0  ;;  %v1451_v7 = vpop.f32.mrb[18].mxu1  ;;  %v10670_v61 = vld [vmem:[%s15156_s5 + $0x42c] ss:$48 sps:$4 sm:$0xff]  }
 0x1c5   :  { %v1337_v8 = vadd.f32 %v1336_v62, %v12354_v4  ;;  %v1338_v17 = vpop.f32.mrb[34].mxu0  ;;  %v1453_v24 = vpop.f32.mrb[19].mxu1  ;;  %5297 = vmatprep.subr.bf16.mxu1 %v10649_v3 }
 0x1c6   :  { %v1448_v15 = vadd.f32 %v1447_v20, %v1335_v6  ;;  %v1339_v26 = vadd.f32 %v1338_v17, %v12348_v0  ;;  %v1340_v27 = vpop.f32.mrb[35].mxu0 }
 0x1c7   :  { %v1450_v28 = vadd.f32 %v1449_v5, %v1337_v8  ;;  %v1341_v29 = vadd.f32 %v1340_v27, %v12354_v4  ;;  %9751 = vmatmul.mubr.bf16.gmra.mrb[92].mxu1 %v11953_v48  ;;  %v10659_v48 = vld [vmem:[%s15156_s5 + $0x308] ss:$48 sps:$4 sm:$0xff]   ;;  %v10695_v5 = vld [vmem:[%s15156_s5 + $0x6c0] ss:$48 sps:$4 sm:$0xff]   ;;  %v10703_v8 = vld [vmem:[%s15156_s5 + $0x724] ss:$48 sps:$4 sm:$0xff]  }
 0x1c8   :  { %v1452_v30 = vadd.f32 %v1451_v7, %v1339_v26  ;;  %5298 = vmatpush1.bf16.msra.mxu1 %v10647_v51  ;;  %v1946_v46 = vmax.f32 %v1448_v15, 0.0 }
 0x1c9   :  { %v1454_v18 = vadd.f32 %v1453_v24, %v1341_v29  ;;  %5299 = vmatprep.subr.bf16.mxu1 %v10655_v59  ;;  %v1947_v33 = vmax.f32 %v1450_v28, 0.0  ;;  %v10668_v29 = vld [vmem:[%s15156_s5 + $0x428] ss:$48 sps:$4 sm:$0xff]  }
 0x1ca   :  { %v1951_v34 = vmax.f32 %v1452_v30, 0.0  ;;  %v1457_v35 = vpop.f32.mrb[20].mxu1 }
 0x1cb   :  { %v1952_v12 = vmax.f32 %v1454_v18, 0.0  ;;  %v1344_v50 = vpop.f32.mrb[36].mxu0  ;;  %v1459_v36 = vpop.f32.mrb[21].mxu1 }
 0x1cc   :  { %v12382_v22 = vpack.c.bf16 %v1951_v34, %v1946_v46  ;;  %v1345_v14 = vadd.f32 %v1344_v50, %v12348_v0  ;;  %5300 = vmatpush1.bf16.msra.mxu1 %v10653_v31  ;;  %v1346_v38 = vpop.f32.mrb[37].mxu0  ;;  %v1461_v19 = vpop.f32.mrb[22].mxu1  ;;  %v10673_v46 = vld [vmem:[%s15156_s5 + $0x48c] ss:$48 sps:$4 sm:$0xff]   ;;  %v10701_v34 = vld [vmem:[%s15156_s5 + $0x720] ss:$48 sps:$4 sm:$0xff]  }
 0x1cd   :  { %v12388_v43 = vpack.c.bf16 %v1952_v12, %v1947_v33  ;;  %v1347_v16 = vadd.f32 %v1346_v38, %v12354_v4  ;;  %v1348_v39 = vpop.f32.mrb[38].mxu0  ;;  %v1463_v47 = vpop.f32.mrb[23].mxu1  ;;  %5301 = vmatprep.subr.bf16.mxu1 %v10661_v32 }
 0x1ce   :  { %v1458_v52 = vadd.f32 %v1457_v35, %v1345_v14  ;;  %v1349_v53 = vadd.f32 %v1348_v39, %v12348_v0  ;;  %v1350_v54 = vpop.f32.mrb[39].mxu0  ;;  %v10709_v35 = vld [vmem:[%s15156_s5 + $0x784] ss:$48 sps:$4 sm:$0xff]  }
 0x1cf   :  { %v1460_v55 = vadd.f32 %v1459_v36, %v1347_v16  ;;  %v1351_v56 = vadd.f32 %v1350_v54, %v12354_v4  ;;  %4978 = vmatprep.mubr.bf16.mxu0 %v12388_v43  ;;  %5317 = vmatprep.mubr.bf16.mxu1 %v12388_v43  ;;  %v10671_v36 = vld [vmem:[%s15156_s5 + $0x488] ss:$48 sps:$4 sm:$0xff]   ;;  %v10676_v54 = vld [vmem:[%s15156_s5 + $0x4ec] ss:$48 sps:$4 sm:$0xff]  }
 0x1d0   :  { %v1462_v41 = vadd.f32 %v1461_v19, %v1349_v53  ;;  %5302 = vmatpush1.bf16.msra.mxu1 %v10659_v48  ;;  %4979 = vmatmul.mubr.bf16.vlgmr.msra.gmra.mrb[96].mxu0 %v12382_v22  ;;  %v1956_v45 = vmax.f32 %v1458_v52, 0.0 }
 0x1d1   :  { %v1464_v58 = vadd.f32 %v1463_v47, %v1351_v56  ;;  %5303 = vmatprep.subr.bf16.mxu1 %v10664_v37  ;;  %5060 = vmatpush1.bf16.msra.mxu0 %v10683_v49  ;;  %v1957_v60 = vmax.f32 %v1460_v55, 0.0 }
 0x1d2   :  { %v1961_v23 = vmax.f32 %v1462_v41, 0.0  ;;  %v1467_v21 = vpop.f32.mrb[24].mxu1  ;;  %5061 = vmatprep.subr.bf16.mxu0 %v10691_v40  ;;  %v10715_v41 = vld [vmem:[%s15156_s5 + $0x7e4] ss:$48 sps:$4 sm:$0xff]  }
 0x1d3   :  { %v1962_v2 = vmax.f32 %v1464_v58, 0.0  ;;  %v1354_v3 = vpop.f32.mrb[40].mxu0  ;;  %v1469_v20 = vpop.f32.mrb[25].mxu1 }
 0x1d4   :  { %v12417_v6 = vpack.c.bf16 %v1961_v23, %v1956_v45  ;;  %v1355_v62 = vadd.f32 %v1354_v3, %v12348_v0  ;;  %5304 = vmatpush1.bf16.msra.mxu1 %v10662_v44  ;;  %v1356_v7 = vpop.f32.mrb[41].mxu0  ;;  %v1471_v51 = vpop.f32.mrb[26].mxu1  ;;  %v10707_v44 = vld [vmem:[%s15156_s5 + $0x780] ss:$48 sps:$4 sm:$0xff]   ;;  %v10679_v23 = vld [vmem:[%s15156_s5 + $0x54c] ss:$48 sps:$4 sm:$0xff]  }
 0x1d5   :  { %v12423_v17 = vpack.c.bf16 %v1962_v2, %v1957_v60  ;;  %v1357_v24 = vadd.f32 %v1356_v7, %v12354_v4  ;;  %v1358_v59 = vpop.f32.mrb[42].mxu0  ;;  %v1473_v15 = vpop.f32.mrb[27].mxu1  ;;  %5305 = vmatprep.subr.bf16.mxu1 %v10667_v57  ;;  %5062 = vmatpush1.bf16.msra.mxu0 %v10689_v42 }
 0x1d6   :  { %v1468_v26 = vadd.f32 %v1467_v21, %v1355_v62  ;;  %v1359_v27 = vadd.f32 %v1358_v59, %v12348_v0  ;;  %v1360_v28 = vpop.f32.mrb[43].mxu0  ;;  %5063 = vmatprep.subr.bf16.mxu0 %v10697_v25  ;;  %v10674_v25 = vld [vmem:[%s15156_s5 + $0x4e8] ss:$48 sps:$4 sm:$0xff]   ;;  %v10713_v21 = vld [vmem:[%s15156_s5 + $0x7e0] ss:$48 sps:$4 sm:$0xff]  }
 0x1d7   :  { %v1470_v30 = vadd.f32 %v1469_v20, %v1357_v24  ;;  %v1361_v31 = vadd.f32 %v1360_v28, %v12354_v4  ;;  %4988 = vmatprep.mubr.bf16.mxu0 %v12423_v17  ;;  %v10721_v20 = vld [vmem:[%s15156_s5 + $0x844] ss:$48 sps:$4 sm:$0xff]  }
 0x1d8   :  { %v1472_v18 = vadd.f32 %v1471_v51, %v1359_v27  ;;  %5306 = vmatpush1.bf16.msra.mxu1 %v10665_v63  ;;  %4989 = vmatmul.mubr.bf16.gmra.mrb[100].mxu0 %v12417_v6  ;;  %v1966_v32 = vmax.f32 %v1468_v26, 0.0 }
 0x1d9   :  { %v1474_v33 = vadd.f32 %v1473_v15, %v1361_v31  ;;  %5307 = vmatprep.subr.bf16.mxu1 %v10670_v61  ;;  %5064 = vmatpush1.bf16.msra.mxu0 %v10695_v5  ;;  %v1967_v48 = vmax.f32 %v1470_v30, 0.0  ;;  %v10677_v15 = vld [vmem:[%s15156_s5 + $0x548] ss:$48 sps:$4 sm:$0xff]   ;;  %v10682_v30 = vld [vmem:[%s15156_s5 + $0x5ac] ss:$48 sps:$4 sm:$0xff]  }
 0x1da   :  { %v1971_v12 = vmax.f32 %v1472_v18, 0.0  ;;  %v1477_v50 = vpop.f32.mrb[28].mxu1  ;;  %5065 = vmatprep.subr.bf16.mxu0 %v10703_v8  ;;  %v10719_v31 = vld [vmem:[%s15156_s5 + $0x840] ss:$48 sps:$4 sm:$0xff]  }
 0x1db   :  { %v1972_v37 = vmax.f32 %v1474_v33, 0.0  ;;  %v1364_v49 = vpop.f32.mrb[44].mxu0  ;;  %v1479_v14 = vpop.f32.mrb[29].mxu1  ;;  %v10727_v33 = vld [vmem:[%s15156_s5 + $0x8a4] ss:$48 sps:$4 sm:$0xff]  }
 0x1dc   :  { %v12445_v38 = vpack.c.bf16 %v1971_v12, %v1966_v32  ;;  %v1365_v19 = vadd.f32 %v1364_v49, %v12348_v0  ;;  %5308 = vmatpush1.bf16.msra.mxu1 %v10668_v29  ;;  %v1366_v40 = vpop.f32.mrb[45].mxu0  ;;  %v1481_v16 = vpop.f32.mrb[30].mxu1  ;;  %v10680_v12 = vld [vmem:[%s15156_s5 + $0x5a8] ss:$48 sps:$4 sm:$0xff]  }
 0x1dd   :  { %v12448_v39 = vpack.c.bf16 %v1972_v37, %v1967_v48  ;;  %v1367_v47 = vadd.f32 %v1366_v40, %v12354_v4  ;;  %v1368_v52 = vpop.f32.mrb[46].mxu0  ;;  %v1483_v53 = vpop.f32.mrb[31].mxu1  ;;  %5309 = vmatprep.subr.bf16.mxu1 %v10673_v46  ;;  %5066 = vmatpush1.bf16.msra.mxu0 %v10701_v34  ;;  %v10725_v37 = vld [vmem:[%s15156_s5 + $0x8a0] ss:$48 sps:$4 sm:$0xff]   ;;  %v10733_v40 = vld [vmem:[%s15156_s5 + $0x904] ss:$48 sps:$4 sm:$0xff]  }
 0x1de   :  { %v1478_v55 = vadd.f32 %v1477_v50, %v1365_v19  ;;  %v1369_v56 = vadd.f32 %v1368_v52, %v12348_v0  ;;  %v1370_v57 = vpop.f32.mrb[47].mxu0  ;;  %5067 = vmatprep.subr.bf16.mxu0 %v10709_v35 }
 0x1df   :  { %v1480_v45 = vadd.f32 %v1479_v14, %v1367_v47  ;;  %v1371_v58 = vadd.f32 %v1370_v57, %v12354_v4  ;;  %4998 = vmatprep.mubr.bf16.mxu0 %v12448_v39 }
 0x1e0   :  { %v1482_v42 = vadd.f32 %v1481_v16, %v1369_v56  ;;  %5310 = vmatpush1.bf16.msra.mxu1 %v10671_v36  ;;  %4999 = vmatmul.mubr.bf16.gmra.mrb[104].mxu0 %v12445_v38  ;;  %v1976_v63 = vmax.f32 %v1478_v55, 0.0  ;;  %v10688_v36 = vld [vmem:[%s15156_s5 + $0x60c] ss:$48 sps:$4 sm:$0xff]  }
 0x1e1   :  { %v1484_v60 = vadd.f32 %v1483_v53, %v1371_v58  ;;  %5311 = vmatprep.subr.bf16.mxu1 %v10676_v54  ;;  %5068 = vmatpush1.bf16.msra.mxu0 %v10707_v44  ;;  %v1977_v61 = vmax.f32 %v1480_v45, 0.0 }
 0x1e2   :  { %v1981_v2 = vmax.f32 %v1482_v42, 0.0  ;;  %v1487_v3 = vpop.f32.mrb[32].mxu1  ;;  %5069 = vmatprep.subr.bf16.mxu0 %v10715_v41  ;;  %v10686_v42 = vld [vmem:[%s15156_s5 + $0x608] ss:$48 sps:$4 sm:$0xff]  }
 0x1e3   :  { %v1982_v5 = vmax.f32 %v1484_v60, 0.0  ;;  %v1374_v62 = vpop.f32.mrb[48].mxu0  ;;  %v1489_v7 = vpop.f32.mrb[33].mxu1 }
 0x1e4   :  { %v12476_v51 = vpack.c.bf16 %v1981_v2, %v1976_v63  ;;  %v1375_v8 = vadd.f32 %v1374_v62, %v12348_v0  ;;  %5312 = vmatpush1.bf16.msra.mxu1 %v10674_v25  ;;  %v1376_v24 = vpop.f32.mrb[49].mxu0  ;;  %v1491_v59 = vpop.f32.mrb[34].mxu1  ;;  %v10731_v25 = vld [vmem:[%s15156_s5 + $0x900] ss:$48 sps:$4 sm:$0xff]   ;;  %v10694_v63 = vld [vmem:[%s15156_s5 + $0x66c] ss:$48 sps:$4 sm:$0xff]  }
 0x1e5   :  { %v12482_v26 = vpack.c.bf16 %v1982_v5, %v1977_v61  ;;  %v1377_v27 = vadd.f32 %v1376_v24, %v12354_v4  ;;  %v1378_v28 = vpop.f32.mrb[50].mxu0  ;;  %v1493_v29 = vpop.f32.mrb[35].mxu1  ;;  %5313 = vmatprep.subr.bf16.mxu1 %v10679_v23  ;;  %5070 = vmatpush1.bf16.msra.mxu0 %v10713_v21  ;;  %v10739_v2 = vld [vmem:[%s15156_s5 + $0x964] ss:$48 sps:$4 sm:$0xff]   ;;  %v10692_v62 = vld [vmem:[%s15156_s5 + $0x668] ss:$48 sps:$4 sm:$0xff]  }
 0x1e6   :  { %v1488_v46 = vadd.f32 %v1487_v3, %v1375_v8  ;;  %v1379_v18 = vadd.f32 %v1378_v28, %v12348_v0  ;;  %v1380_v32 = vpop.f32.mrb[51].mxu0  ;;  %5071 = vmatprep.subr.bf16.mxu0 %v10721_v20  ;;  %v10737_v8 = vld [vmem:[%s15156_s5 + $0x960] ss:$48 sps:$4 sm:$0xff]  }
 0x1e7   :  { %v1490_v34 = vadd.f32 %v1489_v7, %v1377_v27  ;;  %v1381_v35 = vadd.f32 %v1380_v32, %v12354_v4  ;;  %5008 = vmatprep.mubr.bf16.mxu0 %v12482_v26  ;;  %v10700_v7 = vld [vmem:[%s15156_s5 + $0x6cc] ss:$48 sps:$4 sm:$0xff]   ;;  %v10745_v27 = vld [vmem:[%s15156_s5 + $0x9c4] ss:$48 sps:$4 sm:$0xff]  }
 0x1e8   :  { %v1492_v48 = vadd.f32 %v1491_v59, %v1379_v18  ;;  %5314 = vmatpush1.bf16.msra.mxu1 %v10677_v15  ;;  %5009 = vmatmul.mubr.bf16.gmra.mrb[108].mxu0 %v12476_v51  ;;  %v1986_v49 = vmax.f32 %v1488_v46, 0.0 }
 0x1e9   :  { %v1494_v50 = vadd.f32 %v1493_v29, %v1381_v35  ;;  %5315 = vmatprep.subr.bf16.mxu1 %v10682_v30  ;;  %5072 = vmatpush1.bf16.msra.mxu0 %v10719_v31  ;;  %v1987_v16 = vmax.f32 %v1490_v34, 0.0 }
 0x1ea   :  { %v1991_v14 = vmax.f32 %v1492_v48, 0.0  ;;  %v1497_v19 = vpop.f32.mrb[36].mxu1  ;;  %5073 = vmatprep.subr.bf16.mxu0 %v10727_v33 }
 0x1eb   :  { %v1992_v47 = vmax.f32 %v1494_v50, 0.0  ;;  %v1384_v52 = vpop.f32.mrb[52].mxu0  ;;  %v1499_v53 = vpop.f32.mrb[37].mxu1  ;;  %v10698_v50 = vld [vmem:[%s15156_s5 + $0x6c8] ss:$48 sps:$4 sm:$0xff]  }
 0x1ec   :  { %v12510_v54 = vpack.c.bf16 %v1991_v14, %v1986_v49  ;;  %v1385_v44 = vadd.f32 %v1384_v52, %v12348_v0  ;;  %5316 = vmatpush1.bf16.msra.mxu1 %v10680_v12  ;;  %v1386_v55 = vpop.f32.mrb[53].mxu0  ;;  %v1501_v56 = vpop.f32.mrb[38].mxu1 }
 0x1ed   :  { %v12513_v57 = vpack.c.bf16 %v1992_v47, %v1987_v16  ;;  %v1387_v41 = vadd.f32 %v1386_v55, %v12354_v4  ;;  %v1388_v45 = vpop.f32.mrb[54].mxu0  ;;  %v1503_v58 = vpop.f32.mrb[39].mxu1  ;;  %5398 = vmatprep.subr.bf16.mxu1 %v10688_v36  ;;  %5074 = vmatpush1.bf16.msra.mxu0 %v10725_v37  ;;  %v10743_v36 = vld [vmem:[%s15156_s5 + $0x9c0] ss:$48 sps:$4 sm:$0xff]   ;;  %v10712_v55 = vld [vmem:[%s15156_s5 + $0x78c] ss:$48 sps:$4 sm:$0xff]  }
 0x1ee   :  { %v1498_v60 = vadd.f32 %v1497_v19, %v1385_v44  ;;  %v1389_v23 = vadd.f32 %v1388_v45, %v12348_v0  ;;  %v1390_v21 = vpop.f32.mrb[55].mxu0  ;;  %5075 = vmatprep.subr.bf16.mxu0 %v10733_v40  ;;  %v10706_v19 = vld [vmem:[%s15156_s5 + $0x72c] ss:$48 sps:$4 sm:$0xff]   ;;  %v10751_v40 = vld [vmem:[%s15156_s5 + $0xa24] ss:$48 sps:$4 sm:$0xff]  }
 0x1ef   :  { %v1500_v3 = vadd.f32 %v1499_v53, %v1387_v41  ;;  %v1391_v20 = vadd.f32 %v1390_v21, %v12354_v4  ;;  %5318 = vmatmul.mubr.bf16.vlgmr.msra.gmra.mrb[96].mxu1 %v12382_v22  ;;  %5018 = vmatprep.mubr.bf16.mxu0 %v12513_v57  ;;  %v10704_v44 = vld [vmem:[%s15156_s5 + $0x728] ss:$48 sps:$4 sm:$0xff]  }
 0x1f0   :  { %v1502_v61 = vadd.f32 %v1501_v56, %v1389_v23  ;;  %5327 = vmatprep.mubr.bf16.mxu1 %v12423_v17  ;;  %5019 = vmatmul.mubr.bf16.gmra.mrb[112].mxu0 %v12510_v54  ;;  %v1996_v24 = vmax.f32 %v1498_v60, 0.0  ;;  %v10749_v56 = vld [vmem:[%s15156_s5 + $0xa20] ss:$48 sps:$4 sm:$0xff]  }
 0x1f1   :  { %v1504_v5 = vadd.f32 %v1503_v58, %v1391_v20  ;;  %5399 = vmatpush1.bf16.msra.mxu1 %v10686_v42  ;;  %5076 = vmatpush1.bf16.msra.mxu0 %v10731_v25  ;;  %v1997_v28 = vmax.f32 %v1500_v3, 0.0  ;;  %v10757_v42 = vld [vmem:[%s15156_s5 + $0xa84] ss:$48 sps:$4 sm:$0xff]  }
 0x1f2   :  { %v2001_v59 = vmax.f32 %v1502_v61, 0.0  ;;  %v1507_v15 = vpop.f32.mrb[40].mxu1  ;;  %5400 = vmatprep.subr.bf16.mxu1 %v10694_v63  ;;  %5077 = vmatprep.subr.bf16.mxu0 %v10739_v2 }
 0x1f3   :  { %v2002_v29 = vmax.f32 %v1504_v5, 0.0  ;;  %v1394_v30 = vpop.f32.mrb[56].mxu0  ;;  %v1509_v31 = vpop.f32.mrb[41].mxu1 }
 0x1f4   :  { %v12546_v46 = vpack.c.bf16 %v2001_v59, %v1996_v24  ;;  %v1395_v18 = vadd.f32 %v1394_v30, %v12348_v0  ;;  %v1396_v32 = vpop.f32.mrb[57].mxu0  ;;  %v1511_v33 = vpop.f32.mrb[42].mxu1  ;;  %v10755_v24 = vld [vmem:[%s15156_s5 + $0xa80] ss:$48 sps:$4 sm:$0xff]  }
 0x1f5   :  { %v12549_v34 = vpack.c.bf16 %v2002_v29, %v1997_v28  ;;  %v1397_v35 = vadd.f32 %v1396_v32, %v12354_v4  ;;  %v1398_v48 = vpop.f32.mrb[58].mxu0  ;;  %v1513_v12 = vpop.f32.mrb[43].mxu1  ;;  %5401 = vmatpush1.bf16.msra.mxu1 %v10692_v62  ;;  %5078 = vmatpush1.bf16.msra.mxu0 %v10737_v8  ;;  %v10710_v8 = vld [vmem:[%s15156_s5 + $0x788] ss:$48 sps:$4 sm:$0xff]   ;;  %v10718_v28 = vld [vmem:[%s15156_s5 + $0x7ec] ss:$48 sps:$4 sm:$0xff]  }
 0x1f6   :  { %v1508_v37 = vadd.f32 %v1507_v15, %v1395_v18  ;;  %v1399_v49 = vadd.f32 %v1398_v48, %v12348_v0  ;;  %v1400_v14 = vpop.f32.mrb[59].mxu0  ;;  %5402 = vmatprep.subr.bf16.mxu1 %v10700_v7  ;;  %5079 = vmatprep.subr.bf16.mxu0 %v10745_v27  ;;  %v10763_v29 = vld [vmem:[%s15156_s5 + $0xae4] ss:$48 sps:$4 sm:$0xff]   ;;  %v10716_v32 = vld [vmem:[%s15156_s5 + $0x7e8] ss:$48 sps:$4 sm:$0xff]  }
 0x1f7   :  { %v1510_v16 = vadd.f32 %v1509_v31, %v1397_v35  ;;  %v1401_v47 = vadd.f32 %v1400_v14, %v12354_v4  ;;  %5328 = vmatmul.mubr.bf16.gmra.mrb[100].mxu1 %v12417_v6  ;;  %5028 = vmatprep.mubr.bf16.mxu0 %v12549_v34  ;;  %v10724_v48 = vld [vmem:[%s15156_s5 + $0x84c] ss:$48 sps:$4 sm:$0xff]  }
 0x1f8   :  { %v1512_v52 = vadd.f32 %v1511_v33, %v1399_v49  ;;  %5337 = vmatprep.mubr.bf16.mxu1 %v12448_v39  ;;  %5029 = vmatmul.mubr.bf16.gmra.mrb[116].mxu0 %v12546_v46  ;;  %v2006_v41 = vmax.f32 %v1508_v37, 0.0 }
 0x1f9   :  { %v1514_v53 = vadd.f32 %v1513_v12, %v1401_v47  ;;  %5403 = vmatpush1.bf16.msra.mxu1 %v10698_v50  ;;  %5080 = vmatpush1.bf16.msra.mxu0 %v10743_v36  ;;  %v2007_v25 = vmax.f32 %v1510_v16, 0.0  ;;  %v10769_v12 = vld [vmem:[%s15156_s5 + $0xb44] ss:$48 sps:$4 sm:$0xff]   ;;  %v10722_v47 = vld [vmem:[%s15156_s5 + $0x848] ss:$48 sps:$4 sm:$0xff]  }
 0x1fa   :  { %v2011_v45 = vmax.f32 %v1512_v52, 0.0  ;;  %v1517_v58 = vpop.f32.mrb[44].mxu1  ;;  %5404 = vmatprep.subr.bf16.mxu1 %v10706_v19  ;;  %5081 = vmatprep.subr.bf16.mxu0 %v10751_v40  ;;  %v10767_v52 = vld [vmem:[%s15156_s5 + $0xb40] ss:$48 sps:$4 sm:$0xff]  }
 0x1fb   :  { %v2012_v60 = vmax.f32 %v1514_v53, 0.0  ;;  %v1404_v23 = vpop.f32.mrb[60].mxu0  ;;  %v1519_v21 = vpop.f32.mrb[45].mxu1 }
 0x1fc   :  { %v12582_v63 = vpack.c.bf16 %v2011_v45, %v2006_v41  ;;  %v1405_v2 = vadd.f32 %v1404_v23, %v12348_v0  ;;  %v1406_v3 = vpop.f32.mrb[61].mxu0  ;;  %v1521_v20 = vpop.f32.mrb[46].mxu1  ;;  %v10728_v41 = vld [vmem:[%s15156_s5 + $0x8a8] ss:$48 sps:$4 sm:$0xff]   ;;  %v10773_v45 = vld [vmem:[%s15156_s5 + $0xba0] ss:$48 sps:$4 sm:$0xff]  }
 0x1fd   :  { %v12585_v61 = vpack.c.bf16 %v2012_v60, %v2007_v25  ;;  %v1407_v5 = vadd.f32 %v1406_v3, %v12354_v4  ;;  %v1408_v62 = vpop.f32.mrb[62].mxu0  ;;  %v1523_v7 = vpop.f32.mrb[47].mxu1  ;;  %5405 = vmatpush1.bf16.msra.mxu1 %v10704_v44  ;;  %5082 = vmatpush1.bf16.msra.mxu0 %v10749_v56  ;;  %v10730_v44 = vld [vmem:[%s15156_s5 + $0x8ac] ss:$48 sps:$4 sm:$0xff]  }
 0x1fe   :  { %v1518_v59 = vadd.f32 %v1517_v58, %v1405_v2  ;;  %v1409_v15 = vadd.f32 %v1408_v62, %v12348_v0  ;;  %v1410_v27 = vpop.f32.mrb[63].mxu0  ;;  %5406 = vmatprep.subr.bf16.mxu1 %v10712_v55  ;;  %5083 = vmatprep.subr.bf16.mxu0 %v10757_v42  ;;  %v10775_v55 = vld [vmem:[%s15156_s5 + $0xba4] ss:$48 sps:$4 sm:$0xff]   ;;  %v10736_v58 = vld [vmem:[%s15156_s5 + $0x90c] ss:$48 sps:$4 sm:$0xff]  }
 0x1ff   :  { %v1520_v30 = vadd.f32 %v1519_v21, %v1407_v5  ;;  %v1411_v31 = vadd.f32 %v1410_v27, %v12354_v4  ;;  %5338 = vmatmul.mubr.bf16.gmra.mrb[104].mxu1 %v12445_v38  ;;  %5038 = vmatprep.mubr.bf16.mxu0 %v12585_v61  ;;  %v10761_v4 = vld [vmem:[%s15156_s5 + $0xae0] ss:$48 sps:$4 sm:$0xff]   ;;  %v10781_v42 = vld [vmem:[%s15156_s5 + $0xc04] ss:$48 sps:$4 sm:$0xff]   ;;  %v10734_v2 = vld [vmem:[%s15156_s5 + $0x908] ss:$48 sps:$4 sm:$0xff]  }
 0x200   :  { %v1522_v18 = vadd.f32 %v1521_v20, %v1409_v15  ;;  %5347 = vmatprep.mubr.bf16.mxu1 %v12482_v26  ;;  %5039 = vmatmul.mubr.bf16.gmra.mrb[120].mxu0 %v12582_v63  ;;  %v2016_v33 = vmax.f32 %v1518_v59, 0.0  ;;  %v10742_v20 = vld [vmem:[%s15156_s5 + $0x96c] ss:$48 sps:$4 sm:$0xff]   ;;  %v10740_v62 = vld [vmem:[%s15156_s5 + $0x968] ss:$48 sps:$4 sm:$0xff]  }
 0x201   :  { %v1524_v0 = vadd.f32 %v1523_v7, %v1411_v31  ;;  %5407 = vmatpush1.bf16.msra.mxu1 %v10710_v8  ;;  %5084 = vmatpush1.bf16.msra.mxu0 %v10755_v24  ;;  %v2017_v50 = vmax.f32 %v1520_v30, 0.0  ;;  %v10748_v7 = vld [vmem:[%s15156_s5 + $0x9cc] ss:$48 sps:$4 sm:$0xff]   ;;  %v10746_v27 = vld [vmem:[%s15156_s5 + $0x9c8] ss:$48 sps:$4 sm:$0xff]  }
 0x202   :  { %v2021_v35 = vmax.f32 %v1522_v18, 0.0  ;;  %5408 = vmatprep.subr.bf16.mxu1 %v10718_v28  ;;  %5085 = vmatprep.subr.bf16.mxu0 %v10763_v29  ;;  %v10754_v29 = vld [vmem:[%s15156_s5 + $0xa2c] ss:$48 sps:$4 sm:$0xff]   ;;  %v10752_v31 = vld [vmem:[%s15156_s5 + $0xa28] ss:$48 sps:$4 sm:$0xff]  }
 0x203   :  { %v2022_v36 = vmax.f32 %v1524_v0, 0.0  ;;  %v9554_v37 = vpop.f32.mrb[64].mxu0  ;;  %v10760_v18 = vld [vmem:[%s15156_s5 + $0xa8c] ss:$48 sps:$4 sm:$0xff]  }
 0x204   :  { %v12618_v49 = vpack.c.bf16 %v2021_v35, %v2016_v33  ;;  %v9555_v14 = vpop.f32.mrb[65].mxu0  ;;  %v10758_v35 = vld [vmem:[%s15156_s5 + $0xa88] ss:$48 sps:$4 sm:$0xff]  }
 0x205   :  { %v12620_v19 = vpack.c.bf16 %v2022_v36, %v2017_v50  ;;  %v12622_v40 = vadd.f32 %v9555_v14, %v9554_v37  ;;  %v9557_v16 = vpop.f32.mrb[66].mxu0  ;;  %5409 = vmatpush1.bf16.msra.mxu1 %v10716_v32  ;;  %5086 = vmatpush1.bf16.msra.mxu0 %v10761_v4  ;;  %v10764_v36 = vld [vmem:[%s15156_s5 + $0xae8] ss:$48 sps:$4 sm:$0xff]   ;;  %v10772_v37 = vld [vmem:[%s15156_s5 + $0xb4c] ss:$48 sps:$4 sm:$0xff]  }
 0x206   :  { %v9558_v53 = vpop.f32.mrb[67].mxu0  ;;  %5410 = vmatprep.subr.bf16.mxu1 %v10724_v48  ;;  %5087 = vmatprep.subr.bf16.mxu0 %v10769_v12  ;;  %v10766_v12 = vld [vmem:[%s15156_s5 + $0xaec] ss:$48 sps:$4 sm:$0xff]  }
 0x207   :  { %v12636_v56 = vadd.f32 %v9558_v53, %v9557_v16  ;;  %5348 = vmatmul.mubr.bf16.gmra.mrb[108].mxu1 %v12476_v51  ;;  %5048 = vmatprep.mubr.bf16.mxu0 %v12620_v19  ;;  %v10770_v53 = vld [vmem:[%s15156_s5 + $0xb48] ss:$48 sps:$4 sm:$0xff]  }
 0x208   :  { %5357 = vmatprep.mubr.bf16.mxu1 %v12513_v57  ;;  %5049 = vmatmul.mubr.bf16.gmra.mrb[124].mxu0 %v12618_v49 }
 0x209   :  { %5411 = vmatpush1.bf16.msra.mxu1 %v10722_v47  ;;  %5088 = vmatpush1.bf16.msra.mxu0 %v10767_v52 }
 0x20a   :  { %5412 = vmatprep.subr.bf16.mxu1 %v10730_v44  ;;  %5089 = vmatprep.subr.bf16.mxu0 %v10775_v55  ;;  %v10778_v55 = vld [vmem:[%s15156_s5 + $0xbac] ss:$48 sps:$4 sm:$0xff]  }
 0x20b   :  { %v9560_v25 = vpop.f32.mrb[68].mxu0 }
 0x20c   :  { %v9561_v60 = vpop.f32.mrb[69].mxu0 }
 0x20d   :  { %v12654_v23 = vadd.f32 %v9561_v60, %v9560_v25  ;;  %v9563_v21 = vpop.f32.mrb[70].mxu0  ;;  %5413 = vmatpush1.bf16.msra.mxu1 %v10728_v41  ;;  %5090 = vmatpush1.bf16.msra.mxu0 %v10773_v45  ;;  %v10776_v45 = vld [vmem:[%s15156_s5 + $0xba8] ss:$48 sps:$4 sm:$0xff]  }
 0x20e   :  { %v9564_v3 = vpop.f32.mrb[71].mxu0  ;;  %5414 = vmatprep.subr.bf16.mxu1 %v10736_v58  ;;  %5172 = vmatprep.subr.bf16.mxu0 %v10781_v42  ;;  %v10796_v58 = vld [vmem:[%s15156_s5 + $0xc0c] ss:$48 sps:$4 sm:$0xff]  }
 0x20f   :  { %v12662_v5 = vadd.f32 %v9564_v3, %v9563_v21  ;;  %5358 = vmatmul.mubr.bf16.gmra.mrb[112].mxu1 %v12510_v54 }
 0x210   :  { %5367 = vmatprep.mubr.bf16.mxu1 %v12549_v34 }
 0x211   :  { %5415 = vmatpush1.bf16.msra.mxu1 %v10734_v2 }
 0x212   :  { %5416 = vmatprep.subr.bf16.mxu1 %v10742_v20 }
 0x213   :  { %v9566_v8 = vpop.f32.mrb[72].mxu0 }
 0x214   :  { %v9567_v24 = vpop.f32.mrb[73].mxu0 }
 0x215   :  { %v12672_v59 = vadd.f32 %v9567_v24, %v9566_v8  ;;  %v9569_v15 = vpop.f32.mrb[74].mxu0  ;;  %5417 = vmatpush1.bf16.msra.mxu1 %v10740_v62 }
 0x216   :  { %v9570_v28 = vpop.f32.mrb[75].mxu0  ;;  %5418 = vmatprep.subr.bf16.mxu1 %v10748_v7 }
 0x217   :  { %v12680_v30 = vadd.f32 %v9570_v28, %v9569_v15  ;;  %5368 = vmatmul.mubr.bf16.gmra.mrb[116].mxu1 %v12546_v46 }
 0x218   :  { %5377 = vmatprep.mubr.bf16.mxu1 %v12585_v61 }
 0x219   :  { %5419 = vmatpush1.bf16.msra.mxu1 %v10746_v27 }
 0x21a   :  { %5420 = vmatprep.subr.bf16.mxu1 %v10754_v29  ;;  %v15166_v29 = vsub.s32 3, %v11794_v9 }
 0x21b   :  { %v9572_v0 = vpop.f32.mrb[76].mxu0 }
 0x21c   :  { %v9573_v32 = vpop.f32.mrb[77].mxu0 }
 0x21d   :  { %v12690_v4 = vadd.f32 %v9573_v32, %v9572_v0  ;;  %v9575_v33 = vpop.f32.mrb[78].mxu0  ;;  %5421 = vmatpush1.bf16.msra.mxu1 %v10752_v31 }
 0x21e   :  { %v9576_v48 = vpop.f32.mrb[79].mxu0  ;;  %5422 = vmatprep.subr.bf16.mxu1 %v10760_v18 }
 0x21f   :  { %v12698_v50 = vadd.f32 %v9576_v48, %v9575_v33  ;;  %5378 = vmatmul.mubr.bf16.gmra.mrb[120].mxu1 %v12582_v63  ;;  %v12741_v33 = vld [vmem:[%s15157_s4] sm:$0x1f] }
 0x220   :  { %5387 = vmatprep.mubr.bf16.mxu1 %v12620_v19  ;;  %v12750_v48 = vrot.slane %v12741_v33, %v15166_v29 }
 0x221   :  { %5423 = vmatpush1.bf16.msra.mxu1 %v10758_v35  ;;  %v12745_v35 = vrot.slane %v12741_v33, %v11800_v11 }
 0x222   :  { %5424 = vmatprep.subr.bf16.mxu1 %v10766_v12 }
 0x223   :  { %v9578_v14 = vpop.f32.mrb[80].mxu0 }
 0x224   :  { %v9579_v16 = vpop.f32.mrb[81].mxu0 }
 0x225   :  { %v12708_v47 = vadd.f32 %v9579_v16, %v9578_v14  ;;  %v9581_v52 = vpop.f32.mrb[82].mxu0  ;;  %5425 = vmatpush1.bf16.msra.mxu1 %v10764_v36 }
 0x226   :  { %v9582_v44 = vpop.f32.mrb[83].mxu0  ;;  %5426 = vmatprep.subr.bf16.mxu1 %v10772_v37 }
 0x227   :  { %v12716_v41 = vadd.f32 %v9582_v44, %v9581_v52  ;;  %5388 = vmatmul.mubr.bf16.gmra.mrb[124].mxu1 %v12618_v49 }
 0x229   :  { %5427 = vmatpush1.bf16.msra.mxu1 %v10770_v53 }
 0x22a   :  { %5428 = vmatprep.subr.bf16.mxu1 %v10778_v55 }
 0x22b   :  { %v9584_v42 = vpop.f32.mrb[84].mxu0 }
 0x22c   :  { %v9585_v25 = vpop.f32.mrb[85].mxu0 }
 0x22d   :  { %v12725_v60 = vadd.f32 %v9585_v25, %v9584_v42  ;;  %v9587_v21 = vpop.f32.mrb[86].mxu0  ;;  %5429 = vmatpush1.bf16.msra.mxu1 %v10776_v45 }
 0x22e   :  { %v9588_v2 = vpop.f32.mrb[87].mxu0  ;;  %5511 = vmatprep.subr.bf16.mxu1 %v10796_v58 }
 0x22f   :  { %v12727_v3 = vadd.f32 %v9588_v2, %v9587_v21 }
 0x233   :  { %v9590_v20 = vpop.f32.mrb[88].mxu0 }
 0x234   :  { %v9591_v62 = vpop.f32.mrb[89].mxu0 }
 0x235   :  { %v12729_v7 = vadd.f32 %v9591_v62, %v9590_v20  ;;  %v9593_v8 = vpop.f32.mrb[90].mxu0  ;;  %v10779_v20 = vld [vmem:[%s15156_s5 + $0xc00] ss:$48 sps:$4 sm:$0xff]   ;;  %v10794_v62 = vld [vmem:[%s15156_s5 + $0xc08] ss:$48 sps:$4 sm:$0xff]  }
 0x236   :  { %v9594_v24 = vpop.f32.mrb[91].mxu0 }
 0x237   :  { %v12731_v15 = vadd.f32 %v9594_v24, %v9593_v8 }
 0x23b   :  { %v9596_v27 = vpop.f32.mrb[92].mxu0 }
 0x23c   :  { %v9597_v28 = vpop.f32.mrb[93].mxu0 }
 0x23d   :  { %v12734_v31 = vadd.f32 %v9597_v28, %v9596_v27  ;;  %v9599_v18 = vpop.f32.mrb[94].mxu0  ;;  %v10784_v27 = vld [vmem:[%s15156_s5 + $0xc64] ss:$48 sps:$4 sm:$0xff]   ;;  %v10799_v28 = vld [vmem:[%s15156_s5 + $0xc6c] ss:$48 sps:$4 sm:$0xff]  }
 0x23e   :  { %v9600_v0 = vpop.f32.mrb[95].mxu0 }
 0x23f   :  { %v12736_v32 = vadd.f32 %v9600_v0, %v9599_v18 }
 0x242   :  { %v1673_v12 = vpop.f32.mrb[48].mxu1 }
 0x243   :  { %v9850_v36 = vadd.f32 %v1673_v12, %v12745_v35  ;;  %v1675_v37 = vpop.f32.mrb[49].mxu1 }
 0x244   :  { %v9851_v14 = vadd.f32 %v1675_v37, %v12750_v48  ;;  %v1677_v16 = vpop.f32.mrb[50].mxu1 }
 0x245   :  { %v9852_v52 = vadd.f32 %v1677_v16, %v12745_v35  ;;  %v1679_v53 = vpop.f32.mrb[51].mxu1  ;;  %v1948_v55 = vmax.f32 %v9850_v36, 0.0  ;;  %v10797_v16 = vld [vmem:[%s15156_s5 + $0xc68] ss:$48 sps:$4 sm:$0xff]  }
 0x246   :  { %v9853_v44 = vadd.f32 %v1679_v53, %v12750_v48  ;;  %v1949_v58 = vmax.f32 %v9851_v14, 0.0  ;;  %v10782_v14 = vld [vmem:[%s15156_s5 + $0xc60] ss:$48 sps:$4 sm:$0xff]  }
 0x247   :  { %v1953_v45 = vmax.f32 %v9852_v52, 0.0 }
 0x248   :  { %v1954_v42 = vmax.f32 %v9853_v44, 0.0  ;;  %v10787_v44 = vld [vmem:[%s15156_s5 + $0xcc4] ss:$48 sps:$4 sm:$0xff]  }
 0x249   :  { %v12756_v25 = vpack.c.bf16 %v1953_v45, %v1948_v55  ;;  %v10805_v55 = vld [vmem:[%s15156_s5 + $0xccc] ss:$48 sps:$4 sm:$0xff]  }
 0x24a   :  { %v12758_v21 = vpack.c.bf16 %v1954_v42, %v1949_v58  ;;  %v1683_v2 = vpop.f32.mrb[52].mxu1 }
 0x24b   :  { %v9854_v8 = vadd.f32 %v1683_v2, %v12745_v35  ;;  %v1685_v24 = vpop.f32.mrb[53].mxu1 }
 0x24c   :  { %v9855_v18 = vadd.f32 %v1685_v24, %v12750_v48  ;;  %v1687_v0 = vpop.f32.mrb[54].mxu1  ;;  %5091 = vmatprep.mubr.bf16.mxu0 %v12758_v21  ;;  %5430 = vmatprep.mubr.bf16.mxu1 %v12758_v21 }
 0x24d   :  { %v9856_v12 = vadd.f32 %v1687_v0, %v12745_v35  ;;  %v1689_v36 = vpop.f32.mrb[55].mxu1  ;;  %5092 = vmatmul.mubr.bf16.vlgmr.msra.gmra.mrb[96].mxu0 %v12756_v25  ;;  %5431 = vmatmul.mubr.bf16.vlgmr.msra.gmra.mrb[96].mxu1 %v12756_v25  ;;  %v1958_v52 = vmax.f32 %v9854_v8, 0.0  ;;  %v10803_v8 = vld [vmem:[%s15156_s5 + $0xcc8] ss:$48 sps:$4 sm:$0xff]  }
 0x24e   :  { %v9857_v37 = vadd.f32 %v1689_v36, %v12750_v48  ;;  %5173 = vmatpush1.bf16.msra.mxu0 %v10779_v20  ;;  %5512 = vmatpush1.bf16.msra.mxu1 %v10794_v62  ;;  %v1959_v45 = vmax.f32 %v9855_v18, 0.0  ;;  %v10785_v62 = vld [vmem:[%s15156_s5 + $0xcc0] ss:$48 sps:$4 sm:$0xff]   ;;  %v10808_v18 = vld [vmem:[%s15156_s5 + $0xd2c] ss:$48 sps:$4 sm:$0xff]  }
 0x24f   :  { %v1963_v53 = vmax.f32 %v9856_v12, 0.0  ;;  %5174 = vmatprep.subr.bf16.mxu0 %v10784_v27  ;;  %5513 = vmatprep.subr.bf16.mxu1 %v10799_v28  ;;  %v10790_v28 = vld [vmem:[%s15156_s5 + $0xd24] ss:$48 sps:$4 sm:$0xff]  }
 0x250   :  { %v1964_v58 = vmax.f32 %v9857_v37, 0.0 }
 0x251   :  { %v12792_v42 = vpack.c.bf16 %v1963_v53, %v1958_v52  ;;  %v10806_v52 = vld [vmem:[%s15156_s5 + $0xd28] ss:$48 sps:$4 sm:$0xff]  }
 0x252   :  { %v12794_v2 = vpack.c.bf16 %v1964_v58, %v1959_v45  ;;  %v1693_v20 = vpop.f32.mrb[56].mxu1  ;;  %5175 = vmatpush1.bf16.msra.mxu0 %v10782_v14  ;;  %5514 = vmatpush1.bf16.msra.mxu1 %v10797_v16  ;;  %v10788_v16 = vld [vmem:[%s15156_s5 + $0xd20] ss:$48 sps:$4 sm:$0xff]   ;;  %v10814_v45 = vld [vmem:[%s15156_s5 + $0xd8c] ss:$48 sps:$4 sm:$0xff]  }
 0x253   :  { %v9858_v24 = vadd.f32 %v1693_v20, %v12745_v35  ;;  %v1695_v27 = vpop.f32.mrb[57].mxu1  ;;  %5176 = vmatprep.subr.bf16.mxu0 %v10787_v44  ;;  %5515 = vmatprep.subr.bf16.mxu1 %v10805_v55  ;;  %v10793_v55 = vld [vmem:[%s15156_s5 + $0xd84] ss:$48 sps:$4 sm:$0xff]  }
 0x254   :  { %v9859_v0 = vadd.f32 %v1695_v27, %v12750_v48  ;;  %v1697_v12 = vpop.f32.mrb[58].mxu1  ;;  %5101 = vmatprep.mubr.bf16.mxu0 %v12794_v2  ;;  %5440 = vmatprep.mubr.bf16.mxu1 %v12794_v2 }
 0x255   :  { %v9860_v36 = vadd.f32 %v1697_v12, %v12745_v35  ;;  %v1699_v37 = vpop.f32.mrb[59].mxu1  ;;  %5102 = vmatmul.mubr.bf16.gmra.mrb[100].mxu0 %v12792_v42  ;;  %5441 = vmatmul.mubr.bf16.gmra.mrb[100].mxu1 %v12792_v42  ;;  %v1968_v53 = vmax.f32 %v9858_v24, 0.0  ;;  %v10791_v24 = vld [vmem:[%s15156_s5 + $0xd80] ss:$48 sps:$4 sm:$0xff]  }
 0x256   :  { %v9861_v14 = vadd.f32 %v1699_v37, %v12750_v48  ;;  %5177 = vmatpush1.bf16.msra.mxu0 %v10785_v62  ;;  %5516 = vmatpush1.bf16.msra.mxu1 %v10803_v8  ;;  %v1969_v58 = vmax.f32 %v9859_v0, 0.0  ;;  %v10802_v0 = vld [vmem:[%s15156_s5 + $0xde4] ss:$48 sps:$4 sm:$0xff]  }
 0x257   :  { %v1973_v44 = vmax.f32 %v9860_v36, 0.0  ;;  %5178 = vmatprep.subr.bf16.mxu0 %v10790_v28  ;;  %5517 = vmatprep.subr.bf16.mxu1 %v10808_v18  ;;  %v10812_v28 = vld [vmem:[%s15156_s5 + $0xd88] ss:$48 sps:$4 sm:$0xff]   ;;  %v10817_v36 = vld [vmem:[%s15156_s5 + $0xdec] ss:$48 sps:$4 sm:$0xff]  }
 0x258   :  { %v1974_v20 = vmax.f32 %v9861_v14, 0.0 }
 0x259   :  { %v12828_v62 = vpack.c.bf16 %v1973_v44, %v1968_v53  ;;  %v10800_v44 = vld [vmem:[%s15156_s5 + $0xde0] ss:$48 sps:$4 sm:$0xff]  }
 0x25a   :  { %v12830_v8 = vpack.c.bf16 %v1974_v20, %v1969_v58  ;;  %v1703_v27 = vpop.f32.mrb[60].mxu1  ;;  %5179 = vmatpush1.bf16.msra.mxu0 %v10788_v16  ;;  %5518 = vmatpush1.bf16.msra.mxu1 %v10806_v52  ;;  %v10811_v20 = vld [vmem:[%s15156_s5 + $0xe44] ss:$48 sps:$4 sm:$0xff]  }
 0x25b   :  { %v9862_v18 = vadd.f32 %v1703_v27, %v12745_v35  ;;  %v1705_v12 = vpop.f32.mrb[61].mxu1  ;;  %5180 = vmatprep.subr.bf16.mxu0 %v10793_v55  ;;  %5519 = vmatprep.subr.bf16.mxu1 %v10814_v45  ;;  %v10815_v55 = vld [vmem:[%s15156_s5 + $0xde8] ss:$48 sps:$4 sm:$0xff]   ;;  %v10823_v27 = vld [vmem:[%s15156_s5 + $0xe4c] ss:$48 sps:$4 sm:$0xff]  }
 0x25c   :  { %v9863_v37 = vadd.f32 %v1705_v12, %v12750_v48  ;;  %v1707_v14 = vpop.f32.mrb[62].mxu1  ;;  %5111 = vmatprep.mubr.bf16.mxu0 %v12830_v8  ;;  %5450 = vmatprep.mubr.bf16.mxu1 %v12830_v8 }
 0x25d   :  { %v9864_v16 = vadd.f32 %v1707_v14, %v12745_v35  ;;  %v1709_v52 = vpop.f32.mrb[63].mxu1  ;;  %5112 = vmatmul.mubr.bf16.gmra.mrb[104].mxu0 %v12828_v62  ;;  %5451 = vmatmul.mubr.bf16.gmra.mrb[104].mxu1 %v12828_v62  ;;  %v1978_v45 = vmax.f32 %v9862_v18, 0.0  ;;  %v10809_v18 = vld [vmem:[%s15156_s5 + $0xe40] ss:$48 sps:$4 sm:$0xff]  }
 0x25e   :  { %v9865_v53 = vadd.f32 %v1709_v52, %v12750_v48  ;;  %5181 = vmatpush1.bf16.msra.mxu0 %v10791_v24  ;;  %5520 = vmatpush1.bf16.msra.mxu1 %v10812_v28  ;;  %v1979_v24 = vmax.f32 %v9863_v37, 0.0  ;;  %v10820_v37 = vld [vmem:[%s15156_s5 + $0xea4] ss:$48 sps:$4 sm:$0xff]  }
 0x25f   :  { %v1983_v58 = vmax.f32 %v9864_v16, 0.0  ;;  %5182 = vmatprep.subr.bf16.mxu0 %v10802_v0  ;;  %5521 = vmatprep.subr.bf16.mxu1 %v10817_v36  ;;  %v10821_v0 = vld [vmem:[%s15156_s5 + $0xe48] ss:$48 sps:$4 sm:$0xff]  }
 0x260   :  { %v1984_v12 = vmax.f32 %v9865_v53, 0.0  ;;  %v10826_v53 = vld [vmem:[%s15156_s5 + $0xeac] ss:$48 sps:$4 sm:$0xff]  }
 0x261   :  { %v12864_v14 = vpack.c.bf16 %v1983_v58, %v1978_v45 }
 0x262   :  { %v12866_v28 = vpack.c.bf16 %v1984_v12, %v1979_v24  ;;  %v1713_v52 = vpop.f32.mrb[64].mxu1  ;;  %5183 = vmatpush1.bf16.msra.mxu0 %v10800_v44  ;;  %5522 = vmatpush1.bf16.msra.mxu1 %v10815_v55  ;;  %v10824_v24 = vld [vmem:[%s15156_s5 + $0xea8] ss:$48 sps:$4 sm:$0xff]  }
 0x263   :  { %v9866_v36 = vadd.f32 %v1713_v52, %v12745_v35  ;;  %v1715_v16 = vpop.f32.mrb[65].mxu1  ;;  %5184 = vmatprep.subr.bf16.mxu0 %v10811_v20  ;;  %5523 = vmatprep.subr.bf16.mxu1 %v10823_v27  ;;  %v10818_v27 = vld [vmem:[%s15156_s5 + $0xea0] ss:$48 sps:$4 sm:$0xff]  }
 0x264   :  { %v9867_v44 = vadd.f32 %v1715_v16, %v12750_v48  ;;  %v1717_v55 = vpop.f32.mrb[66].mxu1  ;;  %5121 = vmatprep.mubr.bf16.mxu0 %v12866_v28  ;;  %5460 = vmatprep.mubr.bf16.mxu1 %v12866_v28  ;;  %v10829_v16 = vld [vmem:[%s15156_s5 + $0x14] ss:$48 sps:$4 sm:$0xff]  }
 0x265   :  { %v9868_v45 = vadd.f32 %v1717_v55, %v12745_v35  ;;  %v1719_v58 = vpop.f32.mrb[67].mxu1  ;;  %5122 = vmatmul.mubr.bf16.gmra.mrb[108].mxu0 %v12864_v14  ;;  %5461 = vmatmul.mubr.bf16.gmra.mrb[108].mxu1 %v12864_v14  ;;  %v1988_v12 = vmax.f32 %v9866_v36, 0.0 }
 0x266   :  { %v9869_v20 = vadd.f32 %v1719_v58, %v12750_v48  ;;  %5185 = vmatpush1.bf16.msra.mxu0 %v10809_v18  ;;  %5524 = vmatpush1.bf16.msra.mxu1 %v10821_v0  ;;  %v10832_v18 = vld [vmem:[%s15156_s5 + $0x1c] ss:$48 sps:$4 sm:$0xff]   ;;  %v1989_v55 = vmax.f32 %v9867_v44, 0.0 }
 0x267   :  { %v1993_v52 = vmax.f32 %v9868_v45, 0.0  ;;  %5186 = vmatprep.subr.bf16.mxu0 %v10820_v37  ;;  %5525 = vmatprep.subr.bf16.mxu1 %v10826_v53 }
 0x268   :  { %v1994_v58 = vmax.f32 %v9869_v20, 0.0 }
 0x269   :  { %v12900_v29 = vpack.c.bf16 %v1993_v52, %v1988_v12 }
 0x26a   :  { %v12902_v0 = vpack.c.bf16 %v1994_v58, %v1989_v55  ;;  %v1723_v1 = vpop.f32.mrb[68].mxu1  ;;  %5187 = vmatpush1.bf16.msra.mxu0 %v10818_v27  ;;  %5526 = vmatpush1.bf16.msra.mxu1 %v10824_v24 }
 0x26b   :  { %v9870_v36 = vadd.f32 %v1723_v1, %v12745_v35  ;;  %v1725_v37 = vpop.f32.mrb[69].mxu1  ;;  %5624 = vmatprep.subr.bf16.mxu0 %v10829_v16  ;;  %5963 = vmatprep.subr.bf16.mxu1 %v10832_v18 }
 0x26c   :  { %v9871_v53 = vadd.f32 %v1725_v37, %v12750_v48  ;;  %v1727_v45 = vpop.f32.mrb[70].mxu1  ;;  %5131 = vmatprep.mubr.bf16.mxu0 %v12902_v0  ;;  %5470 = vmatprep.mubr.bf16.mxu1 %v12902_v0 }
 0x26d   :  { %v9872_v44 = vadd.f32 %v1727_v45, %v12745_v35  ;;  %v1729_v20 = vpop.f32.mrb[71].mxu1  ;;  %5132 = vmatmul.mubr.bf16.gmra.mrb[112].mxu0 %v12900_v29  ;;  %5471 = vmatmul.mubr.bf16.gmra.mrb[112].mxu1 %v12900_v29  ;;  %v1998_v1 = vmax.f32 %v9870_v36, 0.0 }
 0x26e   :  { %v9873_v27 = vadd.f32 %v1729_v20, %v12750_v48  ;;  %v1999_v12 = vmax.f32 %v9871_v53, 0.0 }
 0x26f   :  { %v2003_v24 = vmax.f32 %v9872_v44, 0.0 }
 0x270   :  { %v2004_v52 = vmax.f32 %v9873_v27, 0.0 }
 0x271   :  { %v12912_v16 = vpack.c.bf16 %v2003_v24, %v1998_v1 }
 0x272   :  { %v12914_v18 = vpack.c.bf16 %v2004_v52, %v1999_v12  ;;  %v1733_v55 = vpop.f32.mrb[72].mxu1 }
 0x273   :  { %v9874_v58 = vadd.f32 %v1733_v55, %v12745_v35  ;;  %v1735_v37 = vpop.f32.mrb[73].mxu1 }
 0x274   :  { %15187 = vst [vmem:[#allocation6_spill] sm:$0xff] %v12914_v18  ;;  %v9875_v45 = vadd.f32 %v1735_v37, %v12750_v48  ;;  %v1737_v11 = vpop.f32.mrb[74].mxu1  ;;  %5141 = vmatprep.mubr.bf16.mxu0 %v12914_v18  ;;  %5480 = vmatprep.mubr.bf16.mxu1 %v12914_v18  ;;  %v15176_v37 = vsub.s32 4, %v11794_v9 }
 0x275   :  { %v9876_v36 = vadd.f32 %v1737_v11, %v12745_v35  ;;  %v1739_v44 = vpop.f32.mrb[75].mxu1  ;;  %5142 = vmatmul.mubr.bf16.gmra.mrb[116].mxu0 %v12912_v16  ;;  %5481 = vmatmul.mubr.bf16.gmra.mrb[116].mxu1 %v12912_v16  ;;  %v2008_v20 = vmax.f32 %v9874_v58, 0.0 }
 0x276   :  { %v9877_v53 = vadd.f32 %v1739_v44, %v12750_v48  ;;  %v2009_v1 = vmax.f32 %v9875_v45, 0.0  ;;  %v12940_v44 = vrot.slane %v12741_v33, %v15176_v37 }
 0x277   :  { %v2013_v27 = vmax.f32 %v9876_v36, 0.0 }
 0x278   :  { %v2014_v24 = vmax.f32 %v9877_v53, 0.0  ;;  %v1798_v33 = vadd.f32 %v12662_v5, %v12940_v44 }
 0x279   :  { %v12924_v12 = vpack.c.bf16 %v2013_v27, %v2008_v20 }
 0x27a   :  { %v12926_v52 = vpack.c.bf16 %v2014_v24, %v2009_v1  ;;  %v1743_v55 = vpop.f32.mrb[76].mxu1 }
 0x27b   :  { %v9878_v11 = vadd.f32 %v1743_v55, %v12745_v35  ;;  %v1745_v13 = vpop.f32.mrb[77].mxu1 }
 0x27c   :  { %v9879_v10 = vadd.f32 %v1745_v13, %v12750_v48  ;;  %v1747_v18 = vpop.f32.mrb[78].mxu1  ;;  %5151 = vmatprep.mubr.bf16.mxu0 %v12926_v52  ;;  %5490 = vmatprep.mubr.bf16.mxu1 %v12926_v52 }
 0x27d   :  { %v9880_v58 = vadd.f32 %v1747_v18, %v12745_v35  ;;  %v1749_v45 = vpop.f32.mrb[79].mxu1  ;;  %5152 = vmatmul.mubr.bf16.gmra.mrb[120].mxu0 %v12924_v12  ;;  %5491 = vmatmul.mubr.bf16.gmra.mrb[120].mxu1 %v12924_v12  ;;  %v2018_v13 = vmax.f32 %v9878_v11, 0.0  ;;  %v1795_v35 = vadd.f32 %v12654_v23, %v12940_v44 }
 0x27e   :  { %v9881_v36 = vadd.f32 %v1749_v45, %v12750_v48  ;;  %v2019_v20 = vmax.f32 %v9879_v10, 0.0  ;;  %v1787_v48 = vadd.f32 %v12622_v40, %v12940_v44  ;;  %v1790_v10 = vadd.f32 %v12636_v56, %v12940_v44 }
 0x27f   :  { %v2023_v53 = vmax.f32 %v9880_v58, 0.0  ;;  %v1811_v56 = vadd.f32 %v12690_v4, %v12940_v44  ;;  %v10835_v4 = vld [vmem:[%s15156_s5 + $0x74] ss:$48 sps:$4 sm:$0xff]  }
 0x280   :  { %v2024_v27 = vmax.f32 %v9881_v36, 0.0 }
 0x281   :  { %v12942_v1 = vpack.c.bf16 %v2023_v53, %v2018_v13  ;;  %v15188_v13 = vmov 0  }
 0x282   :  { %v12946_v18 = vpack.c.bf16 %v2024_v27, %v2019_v20  ;;  %v9740_v24 = vpop.f32.mrb[80].mxu1 }
 0x283   :  { %v1892_v55 = vadd.f32 %v9740_v24, %v1795_v35  ;;  %v1883_v45 = vpop.f32.mrb[81].mxu1 }
 0x284   :  { %v1884_v11 = vadd.f32 %v1883_v45, %v1787_v48  ;;  %v9741_v58 = vpop.f32.mrb[82].mxu1  ;;  %5161 = vmatprep.mubr.bf16.mxu0 %v12946_v18  ;;  %5500 = vmatprep.mubr.bf16.mxu1 %v12946_v18  ;;  %v1803_v45 = vadd.f32 %v12672_v59, %v12940_v44  ;;  %v10838_v59 = vld [vmem:[%s15156_s5 + $0x7c] ss:$48 sps:$4 sm:$0xff]  }
 0x285   :  { %v1895_v23 = vadd.f32 %v9741_v58, %v1798_v33  ;;  %v1886_v36 = vpop.f32.mrb[83].mxu1  ;;  %5162 = vmatmul.mubr.bf16.gmra.mrb[124].mxu0 %v12942_v1  ;;  %5501 = vmatmul.mubr.bf16.gmra.mrb[124].mxu1 %v12942_v1  ;;  %v1960_v5 = vmax.f32 %v1892_v55, 0.0  ;;  %v10827_v33 = vld [vmem:[%s15156_s5 + $0x10] ss:$48 sps:$4 sm:$0xff]   ;;  %v10830_v55 = vld [vmem:[%s15156_s5 + $0x18] ss:$48 sps:$4 sm:$0xff]  }
 0x286   :  { %v1887_v40 = vadd.f32 %v1886_v36, %v1790_v10  ;;  %5204 = vmatprep.mubr.bf16.mxu0 %v15188_v13  ;;  %5543 = vmatprep.mubr.bf16.mxu1 %v15188_v13  ;;  %v1950_v20 = vmax.f32 %v1884_v11, 0.0  ;;  %v1814_v10 = vadd.f32 %v12698_v50, %v12940_v44 }
 0x287   :  { %v1965_v53 = vmax.f32 %v1895_v23, 0.0 }
 0x288   :  { %v1955_v27 = vmax.f32 %v1887_v40, 0.0  ;;  %v1806_v40 = vadd.f32 %v12680_v30, %v12940_v44  ;;  %v10841_v30 = vld [vmem:[%s15156_s5 + $0xd4] ss:$48 sps:$4 sm:$0xff]  }
 0x289   :  { %v12960_v35 = vpack.c.bf16 %v1965_v53, %v1960_v5 }
 0x28a   :  { %v12964_v24 = vpack.c.bf16 %v1955_v27, %v1950_v20  ;;  %v9744_v48 = vpop.f32.mrb[84].mxu1  ;;  %v10833_v20 = vld [vmem:[%s15156_s5 + $0x70] ss:$48 sps:$4 sm:$0xff]   ;;  %v10836_v27 = vld [vmem:[%s15156_s5 + $0x78] ss:$48 sps:$4 sm:$0xff]  }
 0x28b   :  { %v1908_v11 = vadd.f32 %v9744_v48, %v1811_v56  ;;  %v1899_v58 = vpop.f32.mrb[85].mxu1 }
 0x28c   :  { %v1900_v23 = vadd.f32 %v1899_v58, %v1803_v45  ;;  %v9745_v36 = vpop.f32.mrb[86].mxu1  ;;  %v10844_v45 = vld [vmem:[%s15156_s5 + $0xdc] ss:$48 sps:$4 sm:$0xff]  }
 0x28d   :  { %v1911_v5 = vadd.f32 %v9745_v36, %v1814_v10  ;;  %v1902_v53 = vpop.f32.mrb[87].mxu1  ;;  %5205 = vmatmul.mubr.bf16.vlgmr.msra.gmra.mrb[96].mxu0 %v12964_v24  ;;  %5544 = vmatmul.mubr.bf16.vlgmr.msra.gmra.mrb[96].mxu1 %v12964_v24  ;;  %v1980_v56 = vmax.f32 %v1908_v11, 0.0  ;;  %v1827_v11 = vadd.f32 %v12725_v60, %v12940_v44  ;;  %v10842_v36 = vld [vmem:[%s15156_s5 + $0xd8] ss:$48 sps:$4 sm:$0xff]   ;;  %v1830_v60 = vadd.f32 %v12727_v3, %v12940_v44 }
 0x28e   :  { %v1903_v50 = vadd.f32 %v1902_v53, %v1806_v40  ;;  %5625 = vmatpush1.bf16.msra.mxu0 %v10827_v33  ;;  %5964 = vmatpush1.bf16.msra.mxu1 %v10830_v55  ;;  %v1970_v33 = vmax.f32 %v1900_v23, 0.0  ;;  %v10839_v23 = vld [vmem:[%s15156_s5 + $0xd0] ss:$48 sps:$4 sm:$0xff]   ;;  %v10847_v53 = vld [vmem:[%s15156_s5 + $0x134] ss:$48 sps:$4 sm:$0xff]  }
 0x28f   :  { %v1985_v48 = vmax.f32 %v1911_v5, 0.0  ;;  %5626 = vmatprep.subr.bf16.mxu0 %v10835_v4  ;;  %5965 = vmatprep.subr.bf16.mxu1 %v10838_v59  ;;  %v1819_v59 = vadd.f32 %v12708_v47, %v12940_v44  ;;  %v10850_v47 = vld [vmem:[%s15156_s5 + $0x13c] ss:$48 sps:$4 sm:$0xff]  }
 0x290   :  { %v1975_v55 = vmax.f32 %v1903_v50, 0.0  ;;  %5214 = vmatprep.mubr.bf16.mxu0 %v15188_v13  ;;  %5553 = vmatprep.mubr.bf16.mxu1 %v15188_v13 }
 0x291   :  { %v13000_v58 = vpack.c.bf16 %v1985_v48, %v1980_v56 }
 0x292   :  { %v13004_v10 = vpack.c.bf16 %v1975_v55, %v1970_v33  ;;  %5627 = vmatpush1.bf16.msra.mxu0 %v10833_v20  ;;  %v9748_v4 = vpop.f32.mrb[88].mxu1  ;;  %5966 = vmatpush1.bf16.msra.mxu1 %v10836_v27  ;;  %v1822_v27 = vadd.f32 %v12716_v41, %v12940_v44  ;;  %v10853_v41 = vld [vmem:[%s15156_s5 + $0x194] ss:$48 sps:$4 sm:$0xff]  }
 0x293   :  { %v1924_v40 = vadd.f32 %v9748_v4, %v1827_v11  ;;  %v1915_v5 = vpop.f32.mrb[89].mxu1  ;;  %5628 = vmatprep.subr.bf16.mxu0 %v10841_v30  ;;  %5967 = vmatprep.subr.bf16.mxu1 %v10844_v45  ;;  %v10845_v30 = vld [vmem:[%s15156_s5 + $0x130] ss:$48 sps:$4 sm:$0xff]   ;;  %v10848_v45 = vld [vmem:[%s15156_s5 + $0x138] ss:$48 sps:$4 sm:$0xff]  }
 0x294   :  { %v1916_v50 = vadd.f32 %v1915_v5, %v1819_v59  ;;  %v9749_v20 = vpop.f32.mrb[90].mxu1  ;;  %v10856_v11 = vld [vmem:[%s15156_s5 + $0x19c] ss:$48 sps:$4 sm:$0xff]  }
 0x295   :  { %v1927_v56 = vadd.f32 %v9749_v20, %v1830_v60  ;;  %v1918_v48 = vpop.f32.mrb[91].mxu1  ;;  %5215 = vmatmul.mubr.bf16.gmra.mrb[100].mxu0 %v12960_v35  ;;  %5554 = vmatmul.mubr.bf16.gmra.mrb[100].mxu1 %v12960_v35  ;;  %v2000_v33 = vmax.f32 %v1924_v40, 0.0  ;;  %v1835_v60 = vadd.f32 %v12729_v7, %v12940_v44  ;;  %v10862_v7 = vld [vmem:[%s15156_s5 + $0x1fc] ss:$48 sps:$4 sm:$0xff]  }
 0x296   :  { %v1919_v3 = vadd.f32 %v1918_v48, %v1822_v27  ;;  %5629 = vmatpush1.bf16.msra.mxu0 %v10839_v23  ;;  %5968 = vmatpush1.bf16.msra.mxu1 %v10842_v36  ;;  %v1990_v4 = vmax.f32 %v1916_v50, 0.0  ;;  %v1843_v36 = vadd.f32 %v12734_v31, %v12940_v44  ;;  %v1846_v31 = vadd.f32 %v12736_v32, %v12940_v44  ;;  %v10859_v27 = vld [vmem:[%s15156_s5 + $0x1f4] ss:$48 sps:$4 sm:$0xff]  }
 0x297   :  { %v2005_v55 = vmax.f32 %v1927_v56, 0.0  ;;  %5630 = vmatprep.subr.bf16.mxu0 %v10847_v53  ;;  %5969 = vmatprep.subr.bf16.mxu1 %v10850_v47  ;;  %v10851_v53 = vld [vmem:[%s15156_s5 + $0x190] ss:$48 sps:$4 sm:$0xff]   ;;  %v10854_v47 = vld [vmem:[%s15156_s5 + $0x198] ss:$48 sps:$4 sm:$0xff]  }
 0x298   :  { %v1995_v59 = vmax.f32 %v1919_v3, 0.0  ;;  %5224 = vmatprep.mubr.bf16.mxu0 %v15188_v13  ;;  %5563 = vmatprep.mubr.bf16.mxu1 %v15188_v13  ;;  %v1838_v3 = vadd.f32 %v12731_v15, %v12940_v44  ;;  %v10865_v15 = vld [vmem:[%s15156_s5 + $0x254] ss:$48 sps:$4 sm:$0xff]   ;;  %v10868_v44 = vld [vmem:[%s15156_s5 + $0x25c] ss:$48 sps:$4 sm:$0xff]  }
 0x299   :  { %v13040_v23 = vpack.c.bf16 %v2005_v55, %v2000_v33  ;;  %v10857_v33 = vld [vmem:[%s15156_s5 + $0x1f0] ss:$48 sps:$4 sm:$0xff]   ;;  %v10860_v55 = vld [vmem:[%s15156_s5 + $0x1f8] ss:$48 sps:$4 sm:$0xff]  }
 0x29a   :  { %v13044_v40 = vpack.c.bf16 %v1995_v59, %v1990_v4  ;;  %5631 = vmatpush1.bf16.msra.mxu0 %v10845_v30  ;;  %v9752_v5 = vpop.f32.mrb[92].mxu1  ;;  %5970 = vmatpush1.bf16.msra.mxu1 %v10848_v45 }
 0x29b   :  { %v1940_v50 = vadd.f32 %v9752_v5, %v1843_v36  ;;  %v1931_v20 = vpop.f32.mrb[93].mxu1  ;;  %5632 = vmatprep.subr.bf16.mxu0 %v10853_v41  ;;  %5971 = vmatprep.subr.bf16.mxu1 %v10856_v11 }
 0x29c   :  { %v1932_v56 = vadd.f32 %v1931_v20, %v1835_v60  ;;  %v9753_v48 = vpop.f32.mrb[94].mxu1  ;;  %v10863_v60 = vld [vmem:[%s15156_s5 + $0x250] ss:$48 sps:$4 sm:$0xff]  }
 0x29d   :  { %v1943_v30 = vadd.f32 %v9753_v48, %v1846_v31  ;;  %v1934_v45 = vpop.f32.mrb[95].mxu1  ;;  %5225 = vmatmul.mubr.bf16.gmra.mrb[104].mxu0 %v13004_v10  ;;  %5564 = vmatmul.mubr.bf16.gmra.mrb[104].mxu1 %v13004_v10  ;;  %v2020_v41 = vmax.f32 %v1940_v50, 0.0  ;;  %v10874_v50 = vld [vmem:[%s15156_s5 + $0x2bc] ss:$48 sps:$4 sm:$0xff]   ;;  %v10869_v20 = vld [vmem:[%s15156_s5 + $0x2b0] ss:$48 sps:$4 sm:$0xff]  }
 0x29e   :  { %v1935_v32 = vadd.f32 %v1934_v45, %v1838_v3  ;;  %5633 = vmatpush1.bf16.msra.mxu0 %v10851_v53  ;;  %5972 = vmatpush1.bf16.msra.mxu1 %v10854_v47  ;;  %v2010_v4 = vmax.f32 %v1932_v56, 0.0  ;;  %v10866_v53 = vld [vmem:[%s15156_s5 + $0x258] ss:$48 sps:$4 sm:$0xff]   ;;  %v10871_v47 = vld [vmem:[%s15156_s5 + $0x2b4] ss:$48 sps:$4 sm:$0xff]  }
 0x29f   :  { %v2025_v11 = vmax.f32 %v1943_v30, 0.0  ;;  %5634 = vmatprep.subr.bf16.mxu0 %v10859_v27  ;;  %5973 = vmatprep.subr.bf16.mxu1 %v10862_v7  ;;  %v10872_v31 = vld [vmem:[%s15156_s5 + $0x2b8] ss:$48 sps:$4 sm:$0xff]   ;;  %v10877_v27 = vld [vmem:[%s15156_s5 + $0x314] ss:$48 sps:$4 sm:$0xff]  }
 0x2a0   :  { %v2015_v59 = vmax.f32 %v1935_v32, 0.0  ;;  %5234 = vmatprep.mubr.bf16.mxu0 %v15188_v13  ;;  %5573 = vmatprep.mubr.bf16.mxu1 %v15188_v13  ;;  %v10880_v7 = vld [vmem:[%s15156_s5 + $0x31c] ss:$48 sps:$4 sm:$0xff]   ;;  %v10875_v56 = vld [vmem:[%s15156_s5 + $0x310] ss:$48 sps:$4 sm:$0xff]  }
 0x2a1   :  { %v13080_v36 = vpack.c.bf16 %v2025_v11, %v2020_v41  ;;  %v10878_v48 = vld [vmem:[%s15156_s5 + $0x318] ss:$48 sps:$4 sm:$0xff]   ;;  %v10883_v3 = vld [vmem:[%s15156_s5 + $0x374] ss:$48 sps:$4 sm:$0xff]   ;;  %v10886_v30 = vld [vmem:[%s15156_s5 + $0x37c] ss:$48 sps:$4 sm:$0xff]  }
 0x2a2   :  { %v13082_v5 = vpack.c.bf16 %v2015_v59, %v2010_v4  ;;  %5635 = vmatpush1.bf16.msra.mxu0 %v10857_v33  ;;  %5974 = vmatpush1.bf16.msra.mxu1 %v10860_v55  ;;  %v10881_v45 = vld [vmem:[%s15156_s5 + $0x370] ss:$48 sps:$4 sm:$0xff]   ;;  %v10884_v32 = vld [vmem:[%s15156_s5 + $0x378] ss:$48 sps:$4 sm:$0xff]   ;;  %v10889_v33 = vld [vmem:[%s15156_s5 + $0x3d4] ss:$48 sps:$4 sm:$0xff]  }
 0x2a3   :  { %15189 = vst [vmem:[#allocation7_spill] sm:$0xff] %v13080_v36  ;;  %5636 = vmatprep.subr.bf16.mxu0 %v10865_v15  ;;  %5975 = vmatprep.subr.bf16.mxu1 %v10868_v44  ;;  %v10892_v55 = vld [vmem:[%s15156_s5 + $0x3dc] ss:$48 sps:$4 sm:$0xff]   ;;  %v10887_v41 = vld [vmem:[%s15156_s5 + $0x3d0] ss:$48 sps:$4 sm:$0xff]  }
 0x2a4   :  { %15190 = vst [vmem:[#allocation8_spill] sm:$0xff] %v13082_v5  ;;  %v10890_v11 = vld [vmem:[%s15156_s5 + $0x3d8] ss:$48 sps:$4 sm:$0xff]   ;;  %v10895_v15 = vld [vmem:[%s15156_s5 + $0x434] ss:$48 sps:$4 sm:$0xff]  }
 0x2a5   :  { %5235 = vmatmul.mubr.bf16.gmra.mrb[108].mxu0 %v13000_v58  ;;  %5574 = vmatmul.mubr.bf16.gmra.mrb[108].mxu1 %v13000_v58  ;;  %v10898_v44 = vld [vmem:[%s15156_s5 + $0x43c] ss:$48 sps:$4 sm:$0xff]   ;;  %v10893_v4 = vld [vmem:[%s15156_s5 + $0x430] ss:$48 sps:$4 sm:$0xff]   ;;  %v10896_v59 = vld [vmem:[%s15156_s5 + $0x438] ss:$48 sps:$4 sm:$0xff]  }
 0x2a6   :  { %5637 = vmatpush1.bf16.msra.mxu0 %v10863_v60  ;;  %5976 = vmatpush1.bf16.msra.mxu1 %v10866_v53  ;;  %v10901_v60 = vld [vmem:[%s15156_s5 + $0x494] ss:$48 sps:$4 sm:$0xff]   ;;  %v10904_v53 = vld [vmem:[%s15156_s5 + $0x49c] ss:$48 sps:$4 sm:$0xff]  }
 0x2a7   :  { %5638 = vmatprep.subr.bf16.mxu0 %v10871_v47  ;;  %5977 = vmatprep.subr.bf16.mxu1 %v10874_v50  ;;  %v10899_v47 = vld [vmem:[%s15156_s5 + $0x490] ss:$48 sps:$4 sm:$0xff]   ;;  %v10902_v50 = vld [vmem:[%s15156_s5 + $0x498] ss:$48 sps:$4 sm:$0xff]  }
 0x2a8   :  { %5244 = vmatprep.mubr.bf16.mxu0 %v15188_v13  ;;  %5583 = vmatprep.mubr.bf16.mxu1 %v15188_v13 }
 0x2aa   :  { %5639 = vmatpush1.bf16.msra.mxu0 %v10869_v20  ;;  %5978 = vmatpush1.bf16.msra.mxu1 %v10872_v31  ;;  %v10907_v20 = vld [vmem:[%s15156_s5 + $0x4f4] ss:$48 sps:$4 sm:$0xff]   ;;  %v10910_v31 = vld [vmem:[%s15156_s5 + $0x4fc] ss:$48 sps:$4 sm:$0xff]  }
 0x2ab   :  { %5640 = vmatprep.subr.bf16.mxu0 %v10877_v27  ;;  %5979 = vmatprep.subr.bf16.mxu1 %v10880_v7  ;;  %v10905_v27 = vld [vmem:[%s15156_s5 + $0x4f0] ss:$48 sps:$4 sm:$0xff]   ;;  %v10908_v7 = vld [vmem:[%s15156_s5 + $0x4f8] ss:$48 sps:$4 sm:$0xff]  }
 0x2ad   :  { %5245 = vmatmul.mubr.bf16.gmra.mrb[112].mxu0 %v13044_v40  ;;  %5584 = vmatmul.mubr.bf16.gmra.mrb[112].mxu1 %v13044_v40 }
 0x2ae   :  { %5641 = vmatpush1.bf16.msra.mxu0 %v10875_v56  ;;  %5980 = vmatpush1.bf16.msra.mxu1 %v10878_v48  ;;  %v10913_v56 = vld [vmem:[%s15156_s5 + $0x554] ss:$48 sps:$4 sm:$0xff]   ;;  %v10916_v48 = vld [vmem:[%s15156_s5 + $0x55c] ss:$48 sps:$4 sm:$0xff]  }
 0x2af   :  { %5642 = vmatprep.subr.bf16.mxu0 %v10883_v3  ;;  %5981 = vmatprep.subr.bf16.mxu1 %v10886_v30  ;;  %v10911_v3 = vld [vmem:[%s15156_s5 + $0x550] ss:$48 sps:$4 sm:$0xff]   ;;  %v10914_v30 = vld [vmem:[%s15156_s5 + $0x558] ss:$48 sps:$4 sm:$0xff]  }
 0x2b0   :  { %5254 = vmatprep.mubr.bf16.mxu0 %v15188_v13  ;;  %5593 = vmatprep.mubr.bf16.mxu1 %v15188_v13 }
 0x2b2   :  { %5643 = vmatpush1.bf16.msra.mxu0 %v10881_v45  ;;  %5982 = vmatpush1.bf16.msra.mxu1 %v10884_v32  ;;  %v10919_v45 = vld [vmem:[%s15156_s5 + $0x5b4] ss:$48 sps:$4 sm:$0xff]   ;;  %v10922_v32 = vld [vmem:[%s15156_s5 + $0x5bc] ss:$48 sps:$4 sm:$0xff]  }
 0x2b3   :  { %5644 = vmatprep.subr.bf16.mxu0 %v10889_v33  ;;  %5983 = vmatprep.subr.bf16.mxu1 %v10892_v55  ;;  %v10917_v33 = vld [vmem:[%s15156_s5 + $0x5b0] ss:$48 sps:$4 sm:$0xff]   ;;  %v10920_v55 = vld [vmem:[%s15156_s5 + $0x5b8] ss:$48 sps:$4 sm:$0xff]  }
 0x2b5   :  { %5255 = vmatmul.mubr.bf16.gmra.mrb[116].mxu0 %v13040_v23  ;;  %5594 = vmatmul.mubr.bf16.gmra.mrb[116].mxu1 %v13040_v23 }
 0x2b6   :  { %5645 = vmatpush1.bf16.msra.mxu0 %v10887_v41  ;;  %5984 = vmatpush1.bf16.msra.mxu1 %v10890_v11  ;;  %v10925_v41 = vld [vmem:[%s15156_s5 + $0x614] ss:$48 sps:$4 sm:$0xff]   ;;  %v10928_v11 = vld [vmem:[%s15156_s5 + $0x61c] ss:$48 sps:$4 sm:$0xff]  }
 0x2b7   :  { %5646 = vmatprep.subr.bf16.mxu0 %v10895_v15  ;;  %5985 = vmatprep.subr.bf16.mxu1 %v10898_v44  ;;  %v10923_v15 = vld [vmem:[%s15156_s5 + $0x610] ss:$48 sps:$4 sm:$0xff]   ;;  %v10926_v44 = vld [vmem:[%s15156_s5 + $0x618] ss:$48 sps:$4 sm:$0xff]  }
 0x2b8   :  { %5264 = vmatprep.mubr.bf16.mxu0 %v15188_v13  ;;  %5603 = vmatprep.mubr.bf16.mxu1 %v15188_v13 }
 0x2ba   :  { %5647 = vmatpush1.bf16.msra.mxu0 %v10893_v4  ;;  %5986 = vmatpush1.bf16.msra.mxu1 %v10896_v59  ;;  %v10931_v4 = vld [vmem:[%s15156_s5 + $0x674] ss:$48 sps:$4 sm:$0xff]   ;;  %v10934_v59 = vld [vmem:[%s15156_s5 + $0x67c] ss:$48 sps:$4 sm:$0xff]  }
 0x2bb   :  { %5648 = vmatprep.subr.bf16.mxu0 %v10901_v60  ;;  %5987 = vmatprep.subr.bf16.mxu1 %v10904_v53  ;;  %v10929_v60 = vld [vmem:[%s15156_s5 + $0x670] ss:$48 sps:$4 sm:$0xff]   ;;  %v10937_v53 = vld [vmem:[%s15156_s5 + $0x6d4] ss:$48 sps:$4 sm:$0xff]  }
 0x2bd   :  { %5265 = vmatmul.mubr.bf16.gmra.mrb[120].mxu0 %v13082_v5  ;;  %5604 = vmatmul.mubr.bf16.gmra.mrb[120].mxu1 %v13082_v5 }
 0x2be   :  { %5649 = vmatpush1.bf16.msra.mxu0 %v10899_v47  ;;  %5988 = vmatpush1.bf16.msra.mxu1 %v10902_v50  ;;  %v10932_v47 = vld [vmem:[%s15156_s5 + $0x678] ss:$48 sps:$4 sm:$0xff]   ;;  %v10940_v50 = vld [vmem:[%s15156_s5 + $0x6dc] ss:$48 sps:$4 sm:$0xff]  }
 0x2bf   :  { %5650 = vmatprep.subr.bf16.mxu0 %v10907_v20  ;;  %5989 = vmatprep.subr.bf16.mxu1 %v10910_v31  ;;  %v10935_v20 = vld [vmem:[%s15156_s5 + $0x6d0] ss:$48 sps:$4 sm:$0xff]   ;;  %v10938_v31 = vld [vmem:[%s15156_s5 + $0x6d8] ss:$48 sps:$4 sm:$0xff]  }
 0x2c0   :  { %5274 = vmatprep.mubr.bf16.mxu0 %v15188_v13  ;;  %5613 = vmatprep.mubr.bf16.mxu1 %v15188_v13 }
 0x2c2   :  { %5651 = vmatpush1.bf16.msra.mxu0 %v10905_v27  ;;  %5990 = vmatpush1.bf16.msra.mxu1 %v10908_v7  ;;  %v10943_v27 = vld [vmem:[%s15156_s5 + $0x734] ss:$48 sps:$4 sm:$0xff]   ;;  %v10946_v7 = vld [vmem:[%s15156_s5 + $0x73c] ss:$48 sps:$4 sm:$0xff]  }
 0x2c3   :  { %5652 = vmatprep.subr.bf16.mxu0 %v10913_v56  ;;  %5991 = vmatprep.subr.bf16.mxu1 %v10916_v48  ;;  %v10941_v56 = vld [vmem:[%s15156_s5 + $0x730] ss:$48 sps:$4 sm:$0xff]   ;;  %v10949_v48 = vld [vmem:[%s15156_s5 + $0x794] ss:$48 sps:$4 sm:$0xff]  }
 0x2c5   :  { %5275 = vmatmul.mubr.bf16.gmra.mrb[124].mxu0 %v13080_v36  ;;  %5614 = vmatmul.mubr.bf16.gmra.mrb[124].mxu1 %v13080_v36 }
 0x2c6   :  { %5653 = vmatpush1.bf16.msra.mxu0 %v10911_v3  ;;  %5656 = vmatprep.mubr.bf16.mxu0 %v12388_v43  ;;  %v10944_v3 = vld [vmem:[%s15156_s5 + $0x738] ss:$48 sps:$4 sm:$0xff]  }
 0x2c7   :  { %5992 = vmatpush1.bf16.msra.mxu1 %v10914_v30  ;;  %5995 = vmatprep.mubr.bf16.mxu1 %v12388_v43  ;;  %v10952_v30 = vld [vmem:[%s15156_s5 + $0x79c] ss:$48 sps:$4 sm:$0xff]  }
 0x2c8   :  { %5654 = vmatprep.subr.bf16.mxu0 %v10919_v45  ;;  %5993 = vmatprep.subr.bf16.mxu1 %v10922_v32  ;;  %v10947_v45 = vld [vmem:[%s15156_s5 + $0x790] ss:$48 sps:$4 sm:$0xff]   ;;  %v10950_v32 = vld [vmem:[%s15156_s5 + $0x798] ss:$48 sps:$4 sm:$0xff]  }
 0x2ca   :  { %5655 = vmatpush1.bf16.msra.mxu0 %v10917_v33  ;;  %v10955_v33 = vld [vmem:[%s15156_s5 + $0x7f4] ss:$48 sps:$4 sm:$0xff]  }
 0x2cb   :  { %5994 = vmatpush1.bf16.msra.mxu1 %v10920_v55  ;;  %5737 = vmatprep.subr.bf16.mxu0 %v10925_v41  ;;  %v10958_v55 = vld [vmem:[%s15156_s5 + $0x7fc] ss:$48 sps:$4 sm:$0xff]   ;;  %v10953_v41 = vld [vmem:[%s15156_s5 + $0x7f0] ss:$48 sps:$4 sm:$0xff]  }
 0x2cc   :  { %6076 = vmatprep.subr.bf16.mxu1 %v10928_v11  ;;  %v10961_v11 = vld [vmem:[%s15156_s5 + $0x854] ss:$48 sps:$4 sm:$0xff]  }
 0x2cd   :  { %5657 = vmatmul.mubr.bf16.vlgmr.msra.gmra.mrb[128].mxu0 %v12382_v22 }
 0x2ce   :  { %5738 = vmatpush1.bf16.msra.mxu0 %v10923_v15  ;;  %5996 = vmatmul.mubr.bf16.vlgmr.msra.gmra.mrb[128].mxu1 %v12382_v22  ;;  %v10956_v15 = vld [vmem:[%s15156_s5 + $0x7f8] ss:$48 sps:$4 sm:$0xff]  }
 0x2cf   :  { %5666 = vmatprep.mubr.bf16.mxu0 %v12423_v17  ;;  %6005 = vmatprep.mubr.bf16.mxu1 %v12423_v17 }
 0x2d0   :  { %6077 = vmatpush1.bf16.msra.mxu1 %v10926_v44  ;;  %5739 = vmatprep.subr.bf16.mxu0 %v10931_v4  ;;  %v10964_v44 = vld [vmem:[%s15156_s5 + $0x85c] ss:$48 sps:$4 sm:$0xff]   ;;  %v10959_v4 = vld [vmem:[%s15156_s5 + $0x850] ss:$48 sps:$4 sm:$0xff]  }
 0x2d1   :  { %6078 = vmatprep.subr.bf16.mxu1 %v10934_v59  ;;  %v10962_v59 = vld [vmem:[%s15156_s5 + $0x858] ss:$48 sps:$4 sm:$0xff]  }
 0x2d2   :  { %5740 = vmatpush1.bf16.msra.mxu0 %v10929_v60  ;;  %v10967_v60 = vld [vmem:[%s15156_s5 + $0x8b4] ss:$48 sps:$4 sm:$0xff]  }
 0x2d3   :  { %5741 = vmatprep.subr.bf16.mxu0 %v10937_v53  ;;  %v10970_v53 = vld [vmem:[%s15156_s5 + $0x8bc] ss:$48 sps:$4 sm:$0xff]  }
 0x2d4   :  { %6079 = vmatpush1.bf16.msra.mxu1 %v10932_v47  ;;  %v10965_v47 = vld [vmem:[%s15156_s5 + $0x8b0] ss:$48 sps:$4 sm:$0xff]  }
 0x2d5   :  { %5667 = vmatmul.mubr.bf16.gmra.mrb[132].mxu0 %v12417_v6  ;;  %6080 = vmatprep.subr.bf16.mxu1 %v10940_v50  ;;  %v10973_v50 = vld [vmem:[%s15156_s5 + $0x914] ss:$48 sps:$4 sm:$0xff]  }
 0x2d6   :  { %5742 = vmatpush1.bf16.msra.mxu0 %v10935_v20  ;;  %6006 = vmatmul.mubr.bf16.gmra.mrb[132].mxu1 %v12417_v6  ;;  %v10968_v20 = vld [vmem:[%s15156_s5 + $0x8b8] ss:$48 sps:$4 sm:$0xff]  }
 0x2d7   :  { %5676 = vmatprep.mubr.bf16.mxu0 %v12448_v39  ;;  %6015 = vmatprep.mubr.bf16.mxu1 %v12448_v39 }
 0x2d8   :  { %6081 = vmatpush1.bf16.msra.mxu1 %v10938_v31  ;;  %5743 = vmatprep.subr.bf16.mxu0 %v10943_v27  ;;  %v10976_v31 = vld [vmem:[%s15156_s5 + $0x91c] ss:$48 sps:$4 sm:$0xff]   ;;  %v10971_v27 = vld [vmem:[%s15156_s5 + $0x910] ss:$48 sps:$4 sm:$0xff]  }
 0x2d9   :  { %6082 = vmatprep.subr.bf16.mxu1 %v10946_v7  ;;  %v10974_v7 = vld [vmem:[%s15156_s5 + $0x918] ss:$48 sps:$4 sm:$0xff]  }
 0x2da   :  { %5744 = vmatpush1.bf16.msra.mxu0 %v10941_v56  ;;  %v10979_v56 = vld [vmem:[%s15156_s5 + $0x974] ss:$48 sps:$4 sm:$0xff]  }
 0x2db   :  { %5745 = vmatprep.subr.bf16.mxu0 %v10949_v48  ;;  %v10982_v48 = vld [vmem:[%s15156_s5 + $0x97c] ss:$48 sps:$4 sm:$0xff]  }
 0x2dc   :  { %6083 = vmatpush1.bf16.msra.mxu1 %v10944_v3  ;;  %v10977_v3 = vld [vmem:[%s15156_s5 + $0x970] ss:$48 sps:$4 sm:$0xff]  }
 0x2dd   :  { %5677 = vmatmul.mubr.bf16.gmra.mrb[136].mxu0 %v12445_v38  ;;  %6084 = vmatprep.subr.bf16.mxu1 %v10952_v30  ;;  %v10985_v30 = vld [vmem:[%s15156_s5 + $0x9d4] ss:$48 sps:$4 sm:$0xff]  }
 0x2de   :  { %5746 = vmatpush1.bf16.msra.mxu0 %v10947_v45  ;;  %6016 = vmatmul.mubr.bf16.gmra.mrb[136].mxu1 %v12445_v38  ;;  %v10980_v45 = vld [vmem:[%s15156_s5 + $0x978] ss:$48 sps:$4 sm:$0xff]  }
 0x2df   :  { %5686 = vmatprep.mubr.bf16.mxu0 %v12482_v26  ;;  %6025 = vmatprep.mubr.bf16.mxu1 %v12482_v26 }
 0x2e0   :  { %6085 = vmatpush1.bf16.msra.mxu1 %v10950_v32  ;;  %5747 = vmatprep.subr.bf16.mxu0 %v10955_v33  ;;  %v10988_v32 = vld [vmem:[%s15156_s5 + $0x9dc] ss:$48 sps:$4 sm:$0xff]   ;;  %v10983_v33 = vld [vmem:[%s15156_s5 + $0x9d0] ss:$48 sps:$4 sm:$0xff]  }
 0x2e1   :  { %6086 = vmatprep.subr.bf16.mxu1 %v10958_v55  ;;  %v10986_v55 = vld [vmem:[%s15156_s5 + $0x9d8] ss:$48 sps:$4 sm:$0xff]  }
 0x2e2   :  { %5748 = vmatpush1.bf16.msra.mxu0 %v10953_v41  ;;  %v10991_v41 = vld [vmem:[%s15156_s5 + $0xa34] ss:$48 sps:$4 sm:$0xff]  }
 0x2e3   :  { %5749 = vmatprep.subr.bf16.mxu0 %v10961_v11  ;;  %v10994_v11 = vld [vmem:[%s15156_s5 + $0xa3c] ss:$48 sps:$4 sm:$0xff]  }
 0x2e4   :  { %6087 = vmatpush1.bf16.msra.mxu1 %v10956_v15  ;;  %v10989_v15 = vld [vmem:[%s15156_s5 + $0xa30] ss:$48 sps:$4 sm:$0xff]  }
 0x2e5   :  { %5687 = vmatmul.mubr.bf16.gmra.mrb[140].mxu0 %v12476_v51  ;;  %6088 = vmatprep.subr.bf16.mxu1 %v10964_v44  ;;  %v10997_v44 = vld [vmem:[%s15156_s5 + $0xa94] ss:$48 sps:$4 sm:$0xff]  }
 0x2e6   :  { %5750 = vmatpush1.bf16.msra.mxu0 %v10959_v4  ;;  %6026 = vmatmul.mubr.bf16.gmra.mrb[140].mxu1 %v12476_v51  ;;  %v10992_v4 = vld [vmem:[%s15156_s5 + $0xa38] ss:$48 sps:$4 sm:$0xff]  }
 0x2e7   :  { %5696 = vmatprep.mubr.bf16.mxu0 %v12513_v57  ;;  %6035 = vmatprep.mubr.bf16.mxu1 %v12513_v57 }
 0x2e8   :  { %6089 = vmatpush1.bf16.msra.mxu1 %v10962_v59  ;;  %5751 = vmatprep.subr.bf16.mxu0 %v10967_v60  ;;  %v11000_v59 = vld [vmem:[%s15156_s5 + $0xa9c] ss:$48 sps:$4 sm:$0xff]   ;;  %v10995_v60 = vld [vmem:[%s15156_s5 + $0xa90] ss:$48 sps:$4 sm:$0xff]  }
 0x2e9   :  { %6090 = vmatprep.subr.bf16.mxu1 %v10970_v53  ;;  %v10998_v53 = vld [vmem:[%s15156_s5 + $0xa98] ss:$48 sps:$4 sm:$0xff]  }
 0x2ea   :  { %5752 = vmatpush1.bf16.msra.mxu0 %v10965_v47  ;;  %v11003_v47 = vld [vmem:[%s15156_s5 + $0xaf4] ss:$48 sps:$4 sm:$0xff]  }
 0x2eb   :  { %5753 = vmatprep.subr.bf16.mxu0 %v10973_v50  ;;  %v11006_v50 = vld [vmem:[%s15156_s5 + $0xafc] ss:$48 sps:$4 sm:$0xff]  }
 0x2ec   :  { %6091 = vmatpush1.bf16.msra.mxu1 %v10968_v20  ;;  %v11001_v20 = vld [vmem:[%s15156_s5 + $0xaf0] ss:$48 sps:$4 sm:$0xff]  }
 0x2ed   :  { %5697 = vmatmul.mubr.bf16.gmra.mrb[144].mxu0 %v12510_v54  ;;  %6092 = vmatprep.subr.bf16.mxu1 %v10976_v31  ;;  %v11009_v31 = vld [vmem:[%s15156_s5 + $0xb54] ss:$48 sps:$4 sm:$0xff]  }
 0x2ee   :  { %5754 = vmatpush1.bf16.msra.mxu0 %v10971_v27  ;;  %6036 = vmatmul.mubr.bf16.gmra.mrb[144].mxu1 %v12510_v54  ;;  %v11004_v27 = vld [vmem:[%s15156_s5 + $0xaf8] ss:$48 sps:$4 sm:$0xff]  }
 0x2ef   :  { %5706 = vmatprep.mubr.bf16.mxu0 %v12549_v34  ;;  %6045 = vmatprep.mubr.bf16.mxu1 %v12549_v34 }
 0x2f0   :  { %6093 = vmatpush1.bf16.msra.mxu1 %v10974_v7  ;;  %5755 = vmatprep.subr.bf16.mxu0 %v10979_v56  ;;  %v11012_v7 = vld [vmem:[%s15156_s5 + $0xb5c] ss:$48 sps:$4 sm:$0xff]   ;;  %v11007_v56 = vld [vmem:[%s15156_s5 + $0xb50] ss:$48 sps:$4 sm:$0xff]  }
 0x2f1   :  { %6094 = vmatprep.subr.bf16.mxu1 %v10982_v48  ;;  %v11010_v48 = vld [vmem:[%s15156_s5 + $0xb58] ss:$48 sps:$4 sm:$0xff]  }
 0x2f2   :  { %5756 = vmatpush1.bf16.msra.mxu0 %v10977_v3  ;;  %v11015_v3 = vld [vmem:[%s15156_s5 + $0xbb4] ss:$48 sps:$4 sm:$0xff]  }
 0x2f3   :  { %5757 = vmatprep.subr.bf16.mxu0 %v10985_v30  ;;  %v11018_v30 = vld [vmem:[%s15156_s5 + $0xbbc] ss:$48 sps:$4 sm:$0xff]  }
 0x2f4   :  { %6095 = vmatpush1.bf16.msra.mxu1 %v10980_v45  ;;  %v11013_v45 = vld [vmem:[%s15156_s5 + $0xbb0] ss:$48 sps:$4 sm:$0xff]  }
 0x2f5   :  { %5707 = vmatmul.mubr.bf16.gmra.mrb[148].mxu0 %v12546_v46  ;;  %6096 = vmatprep.subr.bf16.mxu1 %v10988_v32  ;;  %v11021_v32 = vld [vmem:[%s15156_s5 + $0xc14] ss:$48 sps:$4 sm:$0xff]  }
 0x2f6   :  { %5758 = vmatpush1.bf16.msra.mxu0 %v10983_v33  ;;  %6046 = vmatmul.mubr.bf16.gmra.mrb[148].mxu1 %v12546_v46  ;;  %v11016_v33 = vld [vmem:[%s15156_s5 + $0xbb8] ss:$48 sps:$4 sm:$0xff]  }
 0x2f7   :  { %5716 = vmatprep.mubr.bf16.mxu0 %v12585_v61  ;;  %6055 = vmatprep.mubr.bf16.mxu1 %v12585_v61 }
 0x2f8   :  { %6097 = vmatpush1.bf16.msra.mxu1 %v10986_v55  ;;  %5759 = vmatprep.subr.bf16.mxu0 %v10991_v41  ;;  %v11036_v55 = vld [vmem:[%s15156_s5 + $0xc1c] ss:$48 sps:$4 sm:$0xff]   ;;  %v11019_v41 = vld [vmem:[%s15156_s5 + $0xc10] ss:$48 sps:$4 sm:$0xff]  }
 0x2f9   :  { %6098 = vmatprep.subr.bf16.mxu1 %v10994_v11  ;;  %v11024_v11 = vld [vmem:[%s15156_s5 + $0xc74] ss:$48 sps:$4 sm:$0xff]  }
 0x2fa   :  { %5760 = vmatpush1.bf16.msra.mxu0 %v10989_v15  ;;  %v11034_v15 = vld [vmem:[%s15156_s5 + $0xc18] ss:$48 sps:$4 sm:$0xff]  }
 0x2fb   :  { %5761 = vmatprep.subr.bf16.mxu0 %v10997_v44  ;;  %v11039_v44 = vld [vmem:[%s15156_s5 + $0xc7c] ss:$48 sps:$4 sm:$0xff]  }
 0x2fc   :  { %6099 = vmatpush1.bf16.msra.mxu1 %v10992_v4  ;;  %v11022_v4 = vld [vmem:[%s15156_s5 + $0xc70] ss:$48 sps:$4 sm:$0xff]  }
 0x2fd   :  { %5717 = vmatmul.mubr.bf16.gmra.mrb[152].mxu0 %v12582_v63  ;;  %6100 = vmatprep.subr.bf16.mxu1 %v11000_v59  ;;  %v11027_v59 = vld [vmem:[%s15156_s5 + $0xcd4] ss:$48 sps:$4 sm:$0xff]  }
 0x2fe   :  { %5762 = vmatpush1.bf16.msra.mxu0 %v10995_v60  ;;  %6056 = vmatmul.mubr.bf16.gmra.mrb[152].mxu1 %v12582_v63  ;;  %v11037_v60 = vld [vmem:[%s15156_s5 + $0xc78] ss:$48 sps:$4 sm:$0xff]  }
 0x2ff   :  { %5726 = vmatprep.mubr.bf16.mxu0 %v12620_v19  ;;  %6065 = vmatprep.mubr.bf16.mxu1 %v12620_v19 }
 0x300   :  { %6101 = vmatpush1.bf16.msra.mxu1 %v10998_v53  ;;  %5763 = vmatprep.subr.bf16.mxu0 %v11003_v47  ;;  %v11045_v53 = vld [vmem:[%s15156_s5 + $0xcdc] ss:$48 sps:$4 sm:$0xff]   ;;  %v11025_v47 = vld [vmem:[%s15156_s5 + $0xcd0] ss:$48 sps:$4 sm:$0xff]  }
 0x301   :  { %6102 = vmatprep.subr.bf16.mxu1 %v11006_v50  ;;  %v11030_v50 = vld [vmem:[%s15156_s5 + $0xd34] ss:$48 sps:$4 sm:$0xff]  }
 0x302   :  { %5764 = vmatpush1.bf16.msra.mxu0 %v11001_v20  ;;  %v11043_v20 = vld [vmem:[%s15156_s5 + $0xcd8] ss:$48 sps:$4 sm:$0xff]  }
 0x303   :  { %5765 = vmatprep.subr.bf16.mxu0 %v11009_v31  ;;  %v11048_v31 = vld [vmem:[%s15156_s5 + $0xd3c] ss:$48 sps:$4 sm:$0xff]  }
 0x304   :  { %6103 = vmatpush1.bf16.msra.mxu1 %v11004_v27  ;;  %v11028_v27 = vld [vmem:[%s15156_s5 + $0xd30] ss:$48 sps:$4 sm:$0xff]  }
 0x305   :  { %5727 = vmatmul.mubr.bf16.gmra.mrb[156].mxu0 %v12618_v49  ;;  %6104 = vmatprep.subr.bf16.mxu1 %v11012_v7  ;;  %v11033_v7 = vld [vmem:[%s15156_s5 + $0xd94] ss:$48 sps:$4 sm:$0xff]  }
 0x306   :  { %5766 = vmatpush1.bf16.msra.mxu0 %v11007_v56  ;;  %6066 = vmatmul.mubr.bf16.gmra.mrb[156].mxu1 %v12618_v49  ;;  %v11046_v56 = vld [vmem:[%s15156_s5 + $0xd38] ss:$48 sps:$4 sm:$0xff]  }
 0x307   :  { %5769 = vmatprep.mubr.bf16.mxu0 %v12758_v21  ;;  %6108 = vmatprep.mubr.bf16.mxu1 %v12758_v21 }
 0x308   :  { %6105 = vmatpush1.bf16.msra.mxu1 %v11010_v48  ;;  %5767 = vmatprep.subr.bf16.mxu0 %v11015_v3  ;;  %v11054_v48 = vld [vmem:[%s15156_s5 + $0xd9c] ss:$48 sps:$4 sm:$0xff]   ;;  %v11031_v3 = vld [vmem:[%s15156_s5 + $0xd90] ss:$48 sps:$4 sm:$0xff]  }
 0x309   :  { %6106 = vmatprep.subr.bf16.mxu1 %v11018_v30  ;;  %v11042_v30 = vld [vmem:[%s15156_s5 + $0xdf4] ss:$48 sps:$4 sm:$0xff]  }
 0x30a   :  { %5768 = vmatpush1.bf16.msra.mxu0 %v11013_v45  ;;  %v11052_v45 = vld [vmem:[%s15156_s5 + $0xd98] ss:$48 sps:$4 sm:$0xff]  }
 0x30b   :  { %5850 = vmatprep.subr.bf16.mxu0 %v11021_v32  ;;  %v11057_v32 = vld [vmem:[%s15156_s5 + $0xdfc] ss:$48 sps:$4 sm:$0xff]  }
 0x30c   :  { %6107 = vmatpush1.bf16.msra.mxu1 %v11016_v33  ;;  %v11040_v33 = vld [vmem:[%s15156_s5 + $0xdf0] ss:$48 sps:$4 sm:$0xff]  }
 0x30d   :  { %5770 = vmatmul.mubr.bf16.vlgmr.msra.gmra.mrb[128].mxu0 %v12756_v25  ;;  %6189 = vmatprep.subr.bf16.mxu1 %v11036_v55  ;;  %v11051_v55 = vld [vmem:[%s15156_s5 + $0xe54] ss:$48 sps:$4 sm:$0xff]  }
 0x30e   :  { %5851 = vmatpush1.bf16.msra.mxu0 %v11019_v41  ;;  %5779 = vmatprep.mubr.bf16.mxu0 %v12794_v2  ;;  %v11055_v41 = vld [vmem:[%s15156_s5 + $0xdf8] ss:$48 sps:$4 sm:$0xff]  }
 0x30f   :  { %6109 = vmatmul.mubr.bf16.vlgmr.msra.gmra.mrb[128].mxu1 %v12756_v25  ;;  %5852 = vmatprep.subr.bf16.mxu0 %v11024_v11  ;;  %v11063_v11 = vld [vmem:[%s15156_s5 + $0xe5c] ss:$48 sps:$4 sm:$0xff]  }
 0x310   :  { %6118 = vmatprep.mubr.bf16.mxu1 %v12794_v2  ;;  %6190 = vmatpush1.bf16.msra.mxu1 %v11034_v15  ;;  %v11049_v15 = vld [vmem:[%s15156_s5 + $0xe50] ss:$48 sps:$4 sm:$0xff]  }
 0x311   :  { %6191 = vmatprep.subr.bf16.mxu1 %v11039_v44  ;;  %v11060_v44 = vld [vmem:[%s15156_s5 + $0xeb4] ss:$48 sps:$4 sm:$0xff]  }
 0x312   :  { %5853 = vmatpush1.bf16.msra.mxu0 %v11022_v4  ;;  %v11061_v4 = vld [vmem:[%s15156_s5 + $0xe58] ss:$48 sps:$4 sm:$0xff]  }
 0x313   :  { %5854 = vmatprep.subr.bf16.mxu0 %v11027_v59  ;;  %v11066_v59 = vld [vmem:[%s15156_s5 + $0xebc] ss:$48 sps:$4 sm:$0xff]  }
 0x314   :  { %6192 = vmatpush1.bf16.msra.mxu1 %v11037_v60  ;;  %v11058_v60 = vld [vmem:[%s15156_s5 + $0xeb0] ss:$48 sps:$4 sm:$0xff]  }
 0x315   :  { %5780 = vmatmul.mubr.bf16.gmra.mrb[132].mxu0 %v12792_v42  ;;  %6193 = vmatprep.subr.bf16.mxu1 %v11045_v53  ;;  %v11069_v53 = vld [vmem:[%s15156_s5 + $0x24] ss:$48 sps:$4 sm:$0xff]  }
 0x316   :  { %5789 = vmatprep.mubr.bf16.mxu0 %v12830_v8  ;;  %5855 = vmatpush1.bf16.msra.mxu0 %v11025_v47  ;;  %v11064_v47 = vld [vmem:[%s15156_s5 + $0xeb8] ss:$48 sps:$4 sm:$0xff]  }
 0x317   :  { %6119 = vmatmul.mubr.bf16.gmra.mrb[132].mxu1 %v12792_v42  ;;  %5856 = vmatprep.subr.bf16.mxu0 %v11030_v50  ;;  %v11072_v50 = vld [vmem:[%s15156_s5 + $0x2c] ss:$48 sps:$4 sm:$0xff]  }
 0x318   :  { %6128 = vmatprep.mubr.bf16.mxu1 %v12830_v8  ;;  %6194 = vmatpush1.bf16.msra.mxu1 %v11043_v20  ;;  %v15191_v20 = vld [vmem:[#allocation6_spill] sm:$0xff] }
 0x319   :  { %6195 = vmatprep.subr.bf16.mxu1 %v11048_v31  ;;  %v11067_v31 = vld [vmem:[%s15156_s5 + $0x20] ss:$48 sps:$4 sm:$0xff]  }
 0x31a   :  { %5857 = vmatpush1.bf16.msra.mxu0 %v11028_v27  ;;  %v11075_v27 = vld [vmem:[%s15156_s5 + $0x84] ss:$48 sps:$4 sm:$0xff]  }
 0x31b   :  { %5858 = vmatprep.subr.bf16.mxu0 %v11033_v7  ;;  %v11070_v7 = vld [vmem:[%s15156_s5 + $0x28] ss:$48 sps:$4 sm:$0xff]  }
 0x31c   :  { %6196 = vmatpush1.bf16.msra.mxu1 %v11046_v56  ;;  %v11078_v56 = vld [vmem:[%s15156_s5 + $0x8c] ss:$48 sps:$4 sm:$0xff]  }
 0x31d   :  { %5790 = vmatmul.mubr.bf16.gmra.mrb[136].mxu0 %v12828_v62  ;;  %6197 = vmatprep.subr.bf16.mxu1 %v11054_v48  ;;  %v11073_v48 = vld [vmem:[%s15156_s5 + $0x80] ss:$48 sps:$4 sm:$0xff]  }
 0x31e   :  { %5799 = vmatprep.mubr.bf16.mxu0 %v12866_v28  ;;  %5859 = vmatpush1.bf16.msra.mxu0 %v11031_v3  ;;  %v11081_v3 = vld [vmem:[%s15156_s5 + $0xe4] ss:$48 sps:$4 sm:$0xff]  }
 0x31f   :  { %6129 = vmatmul.mubr.bf16.gmra.mrb[136].mxu1 %v12828_v62  ;;  %5860 = vmatprep.subr.bf16.mxu0 %v11042_v30  ;;  %v11076_v30 = vld [vmem:[%s15156_s5 + $0x88] ss:$48 sps:$4 sm:$0xff]  }
 0x320   :  { %6138 = vmatprep.mubr.bf16.mxu1 %v12866_v28  ;;  %6198 = vmatpush1.bf16.msra.mxu1 %v11052_v45  ;;  %v11084_v45 = vld [vmem:[%s15156_s5 + $0xec] ss:$48 sps:$4 sm:$0xff]  }
 0x321   :  { %6199 = vmatprep.subr.bf16.mxu1 %v11057_v32  ;;  %v11079_v32 = vld [vmem:[%s15156_s5 + $0xe0] ss:$48 sps:$4 sm:$0xff]  }
 0x322   :  { %5861 = vmatpush1.bf16.msra.mxu0 %v11040_v33  ;;  %v11087_v33 = vld [vmem:[%s15156_s5 + $0x144] ss:$48 sps:$4 sm:$0xff]  }
 0x323   :  { %5862 = vmatprep.subr.bf16.mxu0 %v11051_v55  ;;  %v11082_v55 = vld [vmem:[%s15156_s5 + $0xe8] ss:$48 sps:$4 sm:$0xff]  }
 0x324   :  { %6200 = vmatpush1.bf16.msra.mxu1 %v11055_v41  ;;  %v11090_v41 = vld [vmem:[%s15156_s5 + $0x14c] ss:$48 sps:$4 sm:$0xff]  }
 0x325   :  { %5800 = vmatmul.mubr.bf16.gmra.mrb[140].mxu0 %v12864_v14  ;;  %6201 = vmatprep.subr.bf16.mxu1 %v11063_v11  ;;  %v11085_v11 = vld [vmem:[%s15156_s5 + $0x140] ss:$48 sps:$4 sm:$0xff]  }
 0x326   :  { %5809 = vmatprep.mubr.bf16.mxu0 %v12902_v0  ;;  %5863 = vmatpush1.bf16.msra.mxu0 %v11049_v15  ;;  %v11093_v15 = vld [vmem:[%s15156_s5 + $0x1a4] ss:$48 sps:$4 sm:$0xff]  }
 0x327   :  { %6139 = vmatmul.mubr.bf16.gmra.mrb[140].mxu1 %v12864_v14  ;;  %5864 = vmatprep.subr.bf16.mxu0 %v11060_v44  ;;  %v11088_v44 = vld [vmem:[%s15156_s5 + $0x148] ss:$48 sps:$4 sm:$0xff]  }
 0x328   :  { %6148 = vmatprep.mubr.bf16.mxu1 %v12902_v0  ;;  %6202 = vmatpush1.bf16.msra.mxu1 %v11061_v4  ;;  %v11096_v4 = vld [vmem:[%s15156_s5 + $0x1ac] ss:$48 sps:$4 sm:$0xff]  }
 0x329   :  { %6203 = vmatprep.subr.bf16.mxu1 %v11066_v59  ;;  %v11091_v59 = vld [vmem:[%s15156_s5 + $0x1a0] ss:$48 sps:$4 sm:$0xff]  }
 0x32a   :  { %5865 = vmatpush1.bf16.msra.mxu0 %v11058_v60  ;;  %v11099_v60 = vld [vmem:[%s15156_s5 + $0x204] ss:$48 sps:$4 sm:$0xff]  }
 0x32b   :  { %6302 = vmatprep.subr.bf16.mxu0 %v11069_v53  ;;  %v11094_v53 = vld [vmem:[%s15156_s5 + $0x1a8] ss:$48 sps:$4 sm:$0xff]  }
 0x32c   :  { %6204 = vmatpush1.bf16.msra.mxu1 %v11064_v47  ;;  %v11102_v47 = vld [vmem:[%s15156_s5 + $0x20c] ss:$48 sps:$4 sm:$0xff]  }
 0x32d   :  { %5810 = vmatmul.mubr.bf16.gmra.mrb[144].mxu0 %v12900_v29  ;;  %6641 = vmatprep.subr.bf16.mxu1 %v11072_v50  ;;  %v11097_v50 = vld [vmem:[%s15156_s5 + $0x200] ss:$48 sps:$4 sm:$0xff]  }
 0x32e   :  { %5819 = vmatprep.mubr.bf16.mxu0 %v15191_v20 }
 0x32f   :  { %6149 = vmatmul.mubr.bf16.gmra.mrb[144].mxu1 %v12900_v29 }
 0x330   :  { %6158 = vmatprep.mubr.bf16.mxu1 %v15191_v20 }
 0x335   :  { %5820 = vmatmul.mubr.bf16.gmra.mrb[148].mxu0 %v12912_v16 }
 0x336   :  { %5829 = vmatprep.mubr.bf16.mxu0 %v12926_v52 }
 0x337   :  { %6159 = vmatmul.mubr.bf16.gmra.mrb[148].mxu1 %v12912_v16 }
 0x338   :  { %6168 = vmatprep.mubr.bf16.mxu1 %v12926_v52 }
 0x33d   :  { %5830 = vmatmul.mubr.bf16.gmra.mrb[152].mxu0 %v12924_v12 }
 0x33e   :  { %5839 = vmatprep.mubr.bf16.mxu0 %v12946_v18 }
 0x33f   :  { %6169 = vmatmul.mubr.bf16.gmra.mrb[152].mxu1 %v12924_v12 }
 0x340   :  { %6178 = vmatprep.mubr.bf16.mxu1 %v12946_v18 }
 0x345   :  { %5840 = vmatmul.mubr.bf16.gmra.mrb[156].mxu0 %v12942_v1 }
 0x346   :  { %5882 = vmatprep.mubr.bf16.mxu0 %v15188_v13 }
 0x347   :  { %6179 = vmatmul.mubr.bf16.gmra.mrb[156].mxu1 %v12942_v1 }
 0x348   :  { %6221 = vmatprep.mubr.bf16.mxu1 %v15188_v13 }
 0x34d   :  { %5883 = vmatmul.mubr.bf16.vlgmr.msra.gmra.mrb[128].mxu0 %v12964_v24 }
 0x34e   :  { %6303 = vmatpush1.bf16.msra.mxu0 %v11067_v31  ;;  %5892 = vmatprep.mubr.bf16.mxu0 %v15188_v13  ;;  %v11105_v31 = vld [vmem:[%s15156_s5 + $0x264] ss:$48 sps:$4 sm:$0xff]  }
 0x34f   :  { %6222 = vmatmul.mubr.bf16.vlgmr.msra.gmra.mrb[128].mxu1 %v12964_v24  ;;  %6304 = vmatprep.subr.bf16.mxu0 %v11075_v27 }
 0x350   :  { %6642 = vmatpush1.bf16.msra.mxu1 %v11070_v7  ;;  %6231 = vmatprep.mubr.bf16.mxu1 %v15188_v13 }
 0x351   :  { %6643 = vmatprep.subr.bf16.mxu1 %v11078_v56  ;;  %v11100_v56 = vld [vmem:[%s15156_s5 + $0x208] ss:$48 sps:$4 sm:$0xff]  }
 0x352   :  { %6305 = vmatpush1.bf16.msra.mxu0 %v11073_v48 }
 0x353   :  { %6306 = vmatprep.subr.bf16.mxu0 %v11081_v3 }
 0x354   :  { %6644 = vmatpush1.bf16.msra.mxu1 %v11076_v30  ;;  %v11108_v30 = vld [vmem:[%s15156_s5 + $0x26c] ss:$48 sps:$4 sm:$0xff]  }
 0x355   :  { %5893 = vmatmul.mubr.bf16.gmra.mrb[132].mxu0 %v12960_v35  ;;  %6645 = vmatprep.subr.bf16.mxu1 %v11084_v45 }
 0x356   :  { %6307 = vmatpush1.bf16.msra.mxu0 %v11079_v32  ;;  %5902 = vmatprep.mubr.bf16.mxu0 %v15188_v13 }
 0x357   :  { %6232 = vmatmul.mubr.bf16.gmra.mrb[132].mxu1 %v12960_v35  ;;  %6308 = vmatprep.subr.bf16.mxu0 %v11087_v33  ;;  %v11103_v33 = vld [vmem:[%s15156_s5 + $0x260] ss:$48 sps:$4 sm:$0xff]  }
 0x358   :  { %6646 = vmatpush1.bf16.msra.mxu1 %v11082_v55  ;;  %6241 = vmatprep.mubr.bf16.mxu1 %v15188_v13 }
 0x359   :  { %6647 = vmatprep.subr.bf16.mxu1 %v11090_v41 }
 0x35a   :  { %6309 = vmatpush1.bf16.msra.mxu0 %v11085_v11  ;;  %v11111_v11 = vld [vmem:[%s15156_s5 + $0x2c4] ss:$48 sps:$4 sm:$0xff]  }
 0x35b   :  { %6310 = vmatprep.subr.bf16.mxu0 %v11093_v15  ;;  %v11106_v15 = vld [vmem:[%s15156_s5 + $0x268] ss:$48 sps:$4 sm:$0xff]  }
 0x35c   :  { %6648 = vmatpush1.bf16.msra.mxu1 %v11088_v44  ;;  %v11114_v44 = vld [vmem:[%s15156_s5 + $0x2cc] ss:$48 sps:$4 sm:$0xff]  }
 0x35d   :  { %5903 = vmatmul.mubr.bf16.gmra.mrb[136].mxu0 %v13004_v10  ;;  %6649 = vmatprep.subr.bf16.mxu1 %v11096_v4  ;;  %v11109_v4 = vld [vmem:[%s15156_s5 + $0x2c0] ss:$48 sps:$4 sm:$0xff]  }
 0x35e   :  { %6311 = vmatpush1.bf16.msra.mxu0 %v11091_v59  ;;  %5912 = vmatprep.mubr.bf16.mxu0 %v15188_v13  ;;  %v11117_v59 = vld [vmem:[%s15156_s5 + $0x324] ss:$48 sps:$4 sm:$0xff]  }
 0x35f   :  { %6242 = vmatmul.mubr.bf16.gmra.mrb[136].mxu1 %v13004_v10  ;;  %6312 = vmatprep.subr.bf16.mxu0 %v11099_v60 }
 0x360   :  { %6650 = vmatpush1.bf16.msra.mxu1 %v11094_v53  ;;  %v13653_v27 = vpop.f32.mrb[96].mxu0  ;;  %v13655_v7 = vpop.f32.mrb[96].mxu1  ;;  %6251 = vmatprep.mubr.bf16.mxu1 %v15188_v13 }
 0x361   :  { %15192 = vst [vmem:[#allocation6_spill] sm:$0xff] %v13655_v7  ;;  %v13661_v48 = vpop.f32.mrb[97].mxu0  ;;  %v13663_v3 = vpop.f32.mrb[97].mxu1  ;;  %6651 = vmatprep.subr.bf16.mxu1 %v11102_v47  ;;  %v11112_v47 = vld [vmem:[%s15156_s5 + $0x2c8] ss:$48 sps:$4 sm:$0xff]  }
 0x362   :  { %15193 = vst [vmem:[#allocation9_spill] sm:$0xff] %v13663_v3  ;;  %6313 = vmatpush1.bf16.msra.mxu0 %v11097_v50  ;;  %v13668_v45 = vpop.f32.mrb[98].mxu0  ;;  %v13670_v32 = vpop.f32.mrb[98].mxu1 }
 0x363   :  { %15194 = vst [vmem:[#allocation10_spill] sm:$0xff] %v13670_v32  ;;  %v13675_v55 = vpop.f32.mrb[99].mxu0  ;;  %v13677_v41 = vpop.f32.mrb[99].mxu1  ;;  %6314 = vmatprep.subr.bf16.mxu0 %v11105_v31 }
 0x364   :  { %15195 = vst [vmem:[#allocation11_spill] sm:$0xff] %v13677_v41  ;;  %6652 = vmatpush1.bf16.msra.mxu1 %v11100_v56  ;;  %v11120_v56 = vld [vmem:[%s15156_s5 + $0x32c] ss:$48 sps:$4 sm:$0xff]  }
 0x365   :  { %5913 = vmatmul.mubr.bf16.gmra.mrb[140].mxu0 %v13000_v58  ;;  %6653 = vmatprep.subr.bf16.mxu1 %v11108_v30 }
 0x366   :  { %6315 = vmatpush1.bf16.msra.mxu0 %v11103_v33  ;;  %5922 = vmatprep.mubr.bf16.mxu0 %v15188_v13 }
 0x367   :  { %6252 = vmatmul.mubr.bf16.gmra.mrb[140].mxu1 %v13000_v58  ;;  %6316 = vmatprep.subr.bf16.mxu0 %v11111_v11  ;;  %v11115_v11 = vld [vmem:[%s15156_s5 + $0x320] ss:$48 sps:$4 sm:$0xff]  }
 0x368   :  { %6654 = vmatpush1.bf16.msra.mxu1 %v11106_v15  ;;  %v13697_v60 = vpop.f32.mrb[100].mxu0  ;;  %v13699_v53 = vpop.f32.mrb[100].mxu1  ;;  %6261 = vmatprep.mubr.bf16.mxu1 %v15188_v13 }
 0x369   :  { %15196 = vst [vmem:[#allocation12_spill] sm:$0xff] %v13699_v53  ;;  %v13705_v50 = vpop.f32.mrb[101].mxu0  ;;  %v13707_v31 = vpop.f32.mrb[101].mxu1  ;;  %6655 = vmatprep.subr.bf16.mxu1 %v11114_v44  ;;  %v11123_v44 = vld [vmem:[%s15156_s5 + $0x384] ss:$48 sps:$4 sm:$0xff]  }
 0x36a   :  { %15197 = vst [vmem:[#allocation13_spill] sm:$0xff] %v13707_v31  ;;  %6317 = vmatpush1.bf16.msra.mxu0 %v11109_v4  ;;  %v13712_v30 = vpop.f32.mrb[102].mxu0  ;;  %v13714_v33 = vpop.f32.mrb[102].mxu1  ;;  %v11118_v4 = vld [vmem:[%s15156_s5 + $0x328] ss:$48 sps:$4 sm:$0xff]  }
 0x36b   :  { %15198 = vst [vmem:[#allocation14_spill] sm:$0xff] %v13714_v33  ;;  %v13719_v15 = vpop.f32.mrb[103].mxu0  ;;  %v13721_v37 = vpop.f32.mrb[103].mxu1  ;;  %6318 = vmatprep.subr.bf16.mxu0 %v11117_v59  ;;  %v11126_v33 = vld [vmem:[%s15156_s5 + $0x38c] ss:$48 sps:$4 sm:$0xff]  }
 0x36c   :  { %15199 = vst [vmem:[#allocation15_spill] sm:$0xff] %v13721_v37  ;;  %6656 = vmatpush1.bf16.msra.mxu1 %v11112_v47  ;;  %v11121_v59 = vld [vmem:[%s15156_s5 + $0x380] ss:$48 sps:$4 sm:$0xff]   ;;  %v11129_v47 = vld [vmem:[%s15156_s5 + $0x3e4] ss:$48 sps:$4 sm:$0xff]  }
 0x36d   :  { %5923 = vmatmul.mubr.bf16.gmra.mrb[144].mxu0 %v13044_v40  ;;  %6657 = vmatprep.subr.bf16.mxu1 %v11120_v56 }
 0x36e   :  { %6319 = vmatpush1.bf16.msra.mxu0 %v11115_v11  ;;  %5932 = vmatprep.mubr.bf16.mxu0 %v15188_v13  ;;  %v11124_v11 = vld [vmem:[%s15156_s5 + $0x388] ss:$48 sps:$4 sm:$0xff]  }
 0x36f   :  { %6262 = vmatmul.mubr.bf16.gmra.mrb[144].mxu1 %v13044_v40  ;;  %6320 = vmatprep.subr.bf16.mxu0 %v11123_v44  ;;  %v11132_v44 = vld [vmem:[%s15156_s5 + $0x3ec] ss:$48 sps:$4 sm:$0xff]  }
 0x370   :  { %6658 = vmatpush1.bf16.msra.mxu1 %v11118_v4  ;;  %v13741_v56 = vpop.f32.mrb[104].mxu0  ;;  %v13743_v37 = vpop.f32.mrb[104].mxu1  ;;  %6271 = vmatprep.mubr.bf16.mxu1 %v15188_v13 }
 0x371   :  { %15200 = vst [vmem:[#allocation16_spill] sm:$0xff] %v13743_v37  ;;  %v13749_v31 = vpop.f32.mrb[105].mxu0  ;;  %v13751_v53 = vpop.f32.mrb[105].mxu1  ;;  %6659 = vmatprep.subr.bf16.mxu1 %v11126_v33  ;;  %v11127_v37 = vld [vmem:[%s15156_s5 + $0x3e0] ss:$48 sps:$4 sm:$0xff]  }
 0x372   :  { %15201 = vst [vmem:[#allocation17_spill] sm:$0xff] %v13751_v53  ;;  %6321 = vmatpush1.bf16.msra.mxu0 %v11121_v59  ;;  %v13756_v4 = vpop.f32.mrb[106].mxu0  ;;  %v13758_v41 = vpop.f32.mrb[106].mxu1  ;;  %v11135_v33 = vld [vmem:[%s15156_s5 + $0x444] ss:$48 sps:$4 sm:$0xff]  }
 0x373   :  { %15202 = vst [vmem:[#allocation18_spill] sm:$0xff] %v13758_v41  ;;  %v13763_v32 = vpop.f32.mrb[107].mxu0  ;;  %v13765_v3 = vpop.f32.mrb[107].mxu1  ;;  %6322 = vmatprep.subr.bf16.mxu0 %v11129_v47  ;;  %v11130_v59 = vld [vmem:[%s15156_s5 + $0x3e8] ss:$48 sps:$4 sm:$0xff]  }
 0x374   :  { %15203 = vst [vmem:[#allocation19_spill] sm:$0xff] %v13763_v32  ;;  %15204 = vst [vmem:[#allocation20_spill] sm:$0xff] %v13765_v3  ;;  %6660 = vmatpush1.bf16.msra.mxu1 %v11124_v11  ;;  %v11138_v41 = vld [vmem:[%s15156_s5 + $0x44c] ss:$48 sps:$4 sm:$0xff]   ;;  %v11133_v47 = vld [vmem:[%s15156_s5 + $0x440] ss:$48 sps:$4 sm:$0xff]  }
 0x375   :  { %5933 = vmatmul.mubr.bf16.gmra.mrb[148].mxu0 %v13040_v23  ;;  %6661 = vmatprep.subr.bf16.mxu1 %v11132_v44  ;;  %v11141_v11 = vld [vmem:[%s15156_s5 + $0x4a4] ss:$48 sps:$4 sm:$0xff]  }
 0x376   :  { %6323 = vmatpush1.bf16.msra.mxu0 %v11127_v37  ;;  %5942 = vmatprep.mubr.bf16.mxu0 %v15188_v13  ;;  %v11136_v37 = vld [vmem:[%s15156_s5 + $0x448] ss:$48 sps:$4 sm:$0xff]  }
 0x377   :  { %6272 = vmatmul.mubr.bf16.gmra.mrb[148].mxu1 %v13040_v23  ;;  %6324 = vmatprep.subr.bf16.mxu0 %v11135_v33  ;;  %v11144_v33 = vld [vmem:[%s15156_s5 + $0x4ac] ss:$48 sps:$4 sm:$0xff]  }
 0x378   :  { %6662 = vmatpush1.bf16.msra.mxu1 %v11130_v59  ;;  %v13785_v44 = vpop.f32.mrb[108].mxu0  ;;  %v13787_v3 = vpop.f32.mrb[108].mxu1  ;;  %6281 = vmatprep.mubr.bf16.mxu1 %v15188_v13 }
 0x379   :  { %15205 = vst [vmem:[#allocation21_spill] sm:$0xff] %v13785_v44  ;;  %15206 = vst [vmem:[#allocation22_spill] sm:$0xff] %v13787_v3  ;;  %v13793_v53 = vpop.f32.mrb[109].mxu0  ;;  %v13795_v7 = vpop.f32.mrb[109].mxu1  ;;  %6663 = vmatprep.subr.bf16.mxu1 %v11138_v41  ;;  %v11139_v3 = vld [vmem:[%s15156_s5 + $0x4a0] ss:$48 sps:$4 sm:$0xff]  }
 0x37a   :  { %15207 = vst [vmem:[#allocation23_spill] sm:$0xff] %v13795_v7  ;;  %6325 = vmatpush1.bf16.msra.mxu0 %v11133_v47  ;;  %v13800_v59 = vpop.f32.mrb[110].mxu0  ;;  %v13802_v9 = vpop.f32.mrb[110].mxu1  ;;  %v11147_v41 = vld [vmem:[%s15156_s5 + $0x504] ss:$48 sps:$4 sm:$0xff]  }
 0x37b   :  { %15208 = vst [vmem:[#allocation24_spill] sm:$0xff] %v13800_v59  ;;  %15209 = vst [vmem:[#allocation25_spill] sm:$0xff] %v13802_v9  ;;  %v13807_v44 = vpop.f32.mrb[111].mxu0  ;;  %v13809_v32 = vpop.f32.mrb[111].mxu1  ;;  %6326 = vmatprep.subr.bf16.mxu0 %v11141_v11  ;;  %v11142_v47 = vld [vmem:[%s15156_s5 + $0x4a8] ss:$48 sps:$4 sm:$0xff]  }
 0x37c   :  { %15210 = vst [vmem:[#allocation26_spill] sm:$0xff] %v13807_v44  ;;  %15211 = vst [vmem:[#allocation27_spill] sm:$0xff] %v13809_v32  ;;  %6664 = vmatpush1.bf16.msra.mxu1 %v11136_v37  ;;  %v11150_v9 = vld [vmem:[%s15156_s5 + $0x50c] ss:$48 sps:$4 sm:$0xff]   ;;  %v11145_v11 = vld [vmem:[%s15156_s5 + $0x500] ss:$48 sps:$4 sm:$0xff]  }
 0x37d   :  { %5943 = vmatmul.mubr.bf16.gmra.mrb[152].mxu0 %v13082_v5  ;;  %6665 = vmatprep.subr.bf16.mxu1 %v11144_v33  ;;  %v11153_v37 = vld [vmem:[%s15156_s5 + $0x564] ss:$48 sps:$4 sm:$0xff]  }
 0x37e   :  { %6327 = vmatpush1.bf16.msra.mxu0 %v11139_v3  ;;  %5952 = vmatprep.mubr.bf16.mxu0 %v15188_v13  ;;  %v11148_v3 = vld [vmem:[%s15156_s5 + $0x508] ss:$48 sps:$4 sm:$0xff]  }
 0x37f   :  { %6282 = vmatmul.mubr.bf16.gmra.mrb[152].mxu1 %v13082_v5  ;;  %6328 = vmatprep.subr.bf16.mxu0 %v11147_v41  ;;  %v11156_v41 = vld [vmem:[%s15156_s5 + $0x56c] ss:$48 sps:$4 sm:$0xff]  }
 0x380   :  { %6666 = vmatpush1.bf16.msra.mxu1 %v11142_v47  ;;  %v13829_v33 = vpop.f32.mrb[112].mxu0  ;;  %v13831_v32 = vpop.f32.mrb[112].mxu1  ;;  %6291 = vmatprep.mubr.bf16.mxu1 %v15188_v13 }
 0x381   :  { %15212 = vst [vmem:[#allocation28_spill] sm:$0xff] %v13829_v33  ;;  %15213 = vst [vmem:[#allocation29_spill] sm:$0xff] %v13831_v32  ;;  %v13837_v7 = vpop.f32.mrb[113].mxu0  ;;  %v13839_v44 = vpop.f32.mrb[113].mxu1  ;;  %6667 = vmatprep.subr.bf16.mxu1 %v11150_v9  ;;  %v11151_v32 = vld [vmem:[%s15156_s5 + $0x560] ss:$48 sps:$4 sm:$0xff]  }
 0x382   :  { %15214 = vst [vmem:[#allocation30_spill] sm:$0xff] %v13839_v44  ;;  %6329 = vmatpush1.bf16.msra.mxu0 %v11145_v11  ;;  %v13844_v47 = vpop.f32.mrb[114].mxu0  ;;  %v13846_v33 = vpop.f32.mrb[114].mxu1  ;;  %v11159_v9 = vld [vmem:[%s15156_s5 + $0x5c4] ss:$48 sps:$4 sm:$0xff]  }
 0x383   :  { %15215 = vst [vmem:[#allocation31_spill] sm:$0xff] %v13846_v33  ;;  %v13851_v5 = vpop.f32.mrb[115].mxu0  ;;  %v13853_v59 = vpop.f32.mrb[115].mxu1  ;;  %6330 = vmatprep.subr.bf16.mxu0 %v11153_v37  ;;  %v11154_v11 = vld [vmem:[%s15156_s5 + $0x568] ss:$48 sps:$4 sm:$0xff]  }
 0x384   :  { %15216 = vst [vmem:[#allocation32_spill] sm:$0xff] %v13851_v5  ;;  %15217 = vst [vmem:[#allocation33_spill] sm:$0xff] %v13853_v59  ;;  %6668 = vmatpush1.bf16.msra.mxu1 %v11148_v3  ;;  %v11162_v33 = vld [vmem:[%s15156_s5 + $0x5cc] ss:$48 sps:$4 sm:$0xff]   ;;  %v11157_v37 = vld [vmem:[%s15156_s5 + $0x5c0] ss:$48 sps:$4 sm:$0xff]  }
 0x385   :  { %5953 = vmatmul.mubr.bf16.gmra.mrb[156].mxu0 %v13080_v36  ;;  %6669 = vmatprep.subr.bf16.mxu1 %v11156_v41  ;;  %v11165_v3 = vld [vmem:[%s15156_s5 + $0x624] ss:$48 sps:$4 sm:$0xff]  }
 0x386   :  { %6331 = vmatpush1.bf16.msra.mxu0 %v11151_v32  ;;  %6334 = vmatprep.mubr.bf16.mxu0 %v12388_v43  ;;  %v11160_v32 = vld [vmem:[%s15156_s5 + $0x5c8] ss:$48 sps:$4 sm:$0xff]  }
 0x387   :  { %6292 = vmatmul.mubr.bf16.gmra.mrb[156].mxu1 %v13080_v36  ;;  %6332 = vmatprep.subr.bf16.mxu0 %v11159_v9  ;;  %v11168_v9 = vld [vmem:[%s15156_s5 + $0x62c] ss:$48 sps:$4 sm:$0xff]  }
 0x388   :  { %6670 = vmatpush1.bf16.msra.mxu1 %v11154_v11  ;;  %6673 = vmatprep.mubr.bf16.mxu1 %v12388_v43  ;;  %v13874_v41 = vpop.f32.mrb[116].mxu0  ;;  %v13876_v59 = vpop.f32.mrb[116].mxu1 }
 0x389   :  { %15218 = vst [vmem:[#allocation34_spill] sm:$0xff] %v13874_v41  ;;  %15219 = vst [vmem:[#allocation35_spill] sm:$0xff] %v13876_v59  ;;  %v13881_v44 = vpop.f32.mrb[117].mxu0  ;;  %v13883_v5 = vpop.f32.mrb[117].mxu1  ;;  %6671 = vmatprep.subr.bf16.mxu1 %v11162_v33  ;;  %v11163_v59 = vld [vmem:[%s15156_s5 + $0x620] ss:$48 sps:$4 sm:$0xff]  }
 0x38a   :  { %15220 = vst [vmem:[#allocation36_spill] sm:$0xff] %v13881_v44  ;;  %15221 = vst [vmem:[#allocation37_spill] sm:$0xff] %v13883_v5  ;;  %6333 = vmatpush1.bf16.msra.mxu0 %v11157_v37  ;;  %v13888_v11 = vpop.f32.mrb[118].mxu0  ;;  %v13890_v43 = vpop.f32.mrb[118].mxu1  ;;  %v11171_v33 = vld [vmem:[%s15156_s5 + $0x684] ss:$48 sps:$4 sm:$0xff]  }
 0x38b   :  { %15222 = vst [vmem:[#allocation38_spill] sm:$0xff] %v13888_v11  ;;  %15223 = vst [vmem:[#allocation39_spill] sm:$0xff] %v13890_v43  ;;  %v13895_v41 = vpop.f32.mrb[119].mxu0  ;;  %v13897_v36 = vpop.f32.mrb[119].mxu1  ;;  %6415 = vmatprep.subr.bf16.mxu0 %v11165_v3  ;;  %v11166_v37 = vld [vmem:[%s15156_s5 + $0x628] ss:$48 sps:$4 sm:$0xff]  }
 0x38c   :  { %15224 = vst [vmem:[#allocation40_spill] sm:$0xff] %v13895_v41  ;;  %15225 = vst [vmem:[#allocation41_spill] sm:$0xff] %v13897_v36  ;;  %6672 = vmatpush1.bf16.msra.mxu1 %v11160_v32  ;;  %v11169_v43 = vld [vmem:[%s15156_s5 + $0x680] ss:$48 sps:$4 sm:$0xff]   ;;  %v11174_v3 = vld [vmem:[%s15156_s5 + $0x68c] ss:$48 sps:$4 sm:$0xff]  }
 0x38d   :  { %6335 = vmatmul.mubr.bf16.vlgmr.msra.gmra.mrb[160].mxu0 %v12382_v22  ;;  %6754 = vmatprep.subr.bf16.mxu1 %v11168_v9  ;;  %v11172_v32 = vld [vmem:[%s15156_s5 + $0x688] ss:$48 sps:$4 sm:$0xff]   ;;  %v11177_v36 = vld [vmem:[%s15156_s5 + $0x6e4] ss:$48 sps:$4 sm:$0xff]   ;;  %v11180_v9 = vld [vmem:[%s15156_s5 + $0x6ec] ss:$48 sps:$4 sm:$0xff]  }
 0x38e   :  { %6416 = vmatpush1.bf16.msra.mxu0 %v11163_v59  ;;  %6344 = vmatprep.mubr.bf16.mxu0 %v12423_v17  ;;  %v11183_v11 = vld [vmem:[%s15156_s5 + $0x744] ss:$48 sps:$4 sm:$0xff]  }
 0x38f   :  { %6674 = vmatmul.mubr.bf16.vlgmr.msra.gmra.mrb[160].mxu1 %v12382_v22  ;;  %6417 = vmatprep.subr.bf16.mxu0 %v11171_v33  ;;  %v11175_v22 = vld [vmem:[%s15156_s5 + $0x6e0] ss:$48 sps:$4 sm:$0xff]  }
 0x390   :  { %6683 = vmatprep.mubr.bf16.mxu1 %v12423_v17  ;;  %6755 = vmatpush1.bf16.msra.mxu1 %v11166_v37  ;;  %v13924_v59 = vpop.f32.mrb[120].mxu0  ;;  %v13926_v5 = vpop.f32.mrb[120].mxu1 }
 0x391   :  { %15226 = vst [vmem:[#allocation42_spill] sm:$0xff] %v13924_v59  ;;  %15227 = vst [vmem:[#allocation43_spill] sm:$0xff] %v13926_v5  ;;  %v13931_v33 = vpop.f32.mrb[121].mxu0  ;;  %v13933_v41 = vpop.f32.mrb[121].mxu1  ;;  %6756 = vmatprep.subr.bf16.mxu1 %v11174_v3  ;;  %v11178_v5 = vld [vmem:[%s15156_s5 + $0x6e8] ss:$48 sps:$4 sm:$0xff]  }
 0x392   :  { %15228 = vst [vmem:[#allocation44_spill] sm:$0xff] %v13933_v41  ;;  %6418 = vmatpush1.bf16.msra.mxu0 %v11169_v43  ;;  %v13938_v17 = vpop.f32.mrb[122].mxu0  ;;  %v13940_v37 = vpop.f32.mrb[122].mxu1  ;;  %v11181_v3 = vld [vmem:[%s15156_s5 + $0x740] ss:$48 sps:$4 sm:$0xff]  }
 0x393   :  { %15229 = vst [vmem:[#allocation45_spill] sm:$0xff] %v13940_v37  ;;  %v13945_v59 = vpop.f32.mrb[123].mxu0  ;;  %v13947_v44 = vpop.f32.mrb[123].mxu1  ;;  %6419 = vmatprep.subr.bf16.mxu0 %v11177_v36  ;;  %v11186_v43 = vld [vmem:[%s15156_s5 + $0x74c] ss:$48 sps:$4 sm:$0xff]  }
 0x394   :  { %15230 = vst [vmem:[#allocation46_spill] sm:$0xff] %v13945_v59  ;;  %15231 = vst [vmem:[#allocation47_spill] sm:$0xff] %v13947_v44  ;;  %6757 = vmatpush1.bf16.msra.mxu1 %v11172_v32  ;;  %v11184_v44 = vld [vmem:[%s15156_s5 + $0x748] ss:$48 sps:$4 sm:$0xff]   ;;  %v11189_v36 = vld [vmem:[%s15156_s5 + $0x7a4] ss:$48 sps:$4 sm:$0xff]  }
 0x395   :  { %6345 = vmatmul.mubr.bf16.gmra.mrb[164].mxu0 %v12417_v6  ;;  %6758 = vmatprep.subr.bf16.mxu1 %v11180_v9  ;;  %v11192_v32 = vld [vmem:[%s15156_s5 + $0x7ac] ss:$48 sps:$4 sm:$0xff]   ;;  %v11195_v41 = vld [vmem:[%s15156_s5 + $0x804] ss:$48 sps:$4 sm:$0xff]  }
 0x396   :  { %6420 = vmatpush1.bf16.msra.mxu0 %v11175_v22  ;;  %6354 = vmatprep.mubr.bf16.mxu0 %v12448_v39 }
 0x397   :  { %6684 = vmatmul.mubr.bf16.gmra.mrb[164].mxu1 %v12417_v6  ;;  %6421 = vmatprep.subr.bf16.mxu0 %v11183_v11  ;;  %v11187_v6 = vld [vmem:[%s15156_s5 + $0x7a0] ss:$48 sps:$4 sm:$0xff]  }
 0x398   :  { %6693 = vmatprep.mubr.bf16.mxu1 %v12448_v39  ;;  %6759 = vmatpush1.bf16.msra.mxu1 %v11178_v5  ;;  %v13968_v9 = vpop.f32.mrb[124].mxu0  ;;  %v13970_v22 = vpop.f32.mrb[124].mxu1 }
 0x399   :  { %15232 = vst [vmem:[#allocation48_spill] sm:$0xff] %v13968_v9  ;;  %15233 = vst [vmem:[#allocation49_spill] sm:$0xff] %v13970_v22  ;;  %v13975_v11 = vpop.f32.mrb[125].mxu0  ;;  %v13977_v37 = vpop.f32.mrb[125].mxu1  ;;  %6760 = vmatprep.subr.bf16.mxu1 %v11186_v43  ;;  %v11190_v22 = vld [vmem:[%s15156_s5 + $0x7a8] ss:$48 sps:$4 sm:$0xff]  }
 0x39a   :  { %6422 = vmatpush1.bf16.msra.mxu0 %v11181_v3  ;;  %v13982_v39 = vpop.f32.mrb[126].mxu0  ;;  %v13984_v5 = vpop.f32.mrb[126].mxu1  ;;  %v11193_v43 = vld [vmem:[%s15156_s5 + $0x800] ss:$48 sps:$4 sm:$0xff]   ;;  %v11198_v3 = vld [vmem:[%s15156_s5 + $0x80c] ss:$48 sps:$4 sm:$0xff]  }
 0x39b   :  { %v13989_v9 = vpop.f32.mrb[127].mxu0  ;;  %v13991_v59 = vpop.f32.mrb[127].mxu1  ;;  %6423 = vmatprep.subr.bf16.mxu0 %v11189_v36  ;;  %v11199_v36 = vld [vmem:[%s15156_s5 + $0x860] ss:$48 sps:$4 sm:$0xff]  }
 0x39c   :  { %15234 = vst [vmem:[#allocation50_spill] sm:$0xff] %v13991_v59  ;;  %6761 = vmatpush1.bf16.msra.mxu1 %v11184_v44  ;;  %v11196_v59 = vld [vmem:[%s15156_s5 + $0x808] ss:$48 sps:$4 sm:$0xff]   ;;  %v11201_v44 = vld [vmem:[%s15156_s5 + $0x864] ss:$48 sps:$4 sm:$0xff]  }
 0x39d   :  { %6355 = vmatmul.mubr.bf16.gmra.mrb[168].mxu0 %v12445_v38  ;;  %6762 = vmatprep.subr.bf16.mxu1 %v11192_v32  ;;  %v11204_v32 = vld [vmem:[%s15156_s5 + $0x86c] ss:$48 sps:$4 sm:$0xff]  }
 0x39e   :  { %6424 = vmatpush1.bf16.msra.mxu0 %v11187_v6  ;;  %6364 = vmatprep.mubr.bf16.mxu0 %v12482_v26  ;;  %v11202_v6 = vld [vmem:[%s15156_s5 + $0x868] ss:$48 sps:$4 sm:$0xff]  }
 0x39f   :  { %6694 = vmatmul.mubr.bf16.gmra.mrb[168].mxu1 %v12445_v38  ;;  %6425 = vmatprep.subr.bf16.mxu0 %v11195_v41  ;;  %v11207_v38 = vld [vmem:[%s15156_s5 + $0x8c4] ss:$48 sps:$4 sm:$0xff]   ;;  %v11210_v41 = vld [vmem:[%s15156_s5 + $0x8cc] ss:$48 sps:$4 sm:$0xff]  }
 0x3a0   :  { %6703 = vmatprep.mubr.bf16.mxu1 %v12482_v26  ;;  %6763 = vmatpush1.bf16.msra.mxu1 %v11190_v22  ;;  %v11205_v26 = vld [vmem:[%s15156_s5 + $0x8c0] ss:$48 sps:$4 sm:$0xff]   ;;  %v11208_v22 = vld [vmem:[%s15156_s5 + $0x8c8] ss:$48 sps:$4 sm:$0xff]  }
 0x3a1   :  { %6764 = vmatprep.subr.bf16.mxu1 %v11198_v3  ;;  %v11216_v3 = vld [vmem:[%s15156_s5 + $0x92c] ss:$48 sps:$4 sm:$0xff]  }
 0x3a2   :  { %6426 = vmatpush1.bf16.msra.mxu0 %v11193_v43  ;;  %v11211_v43 = vld [vmem:[%s15156_s5 + $0x920] ss:$48 sps:$4 sm:$0xff]  }
 0x3a3   :  { %6427 = vmatprep.subr.bf16.mxu0 %v11201_v44  ;;  %v11214_v44 = vld [vmem:[%s15156_s5 + $0x928] ss:$48 sps:$4 sm:$0xff]  }
 0x3a4   :  { %6765 = vmatpush1.bf16.msra.mxu1 %v11196_v59  ;;  %v11213_v59 = vld [vmem:[%s15156_s5 + $0x924] ss:$48 sps:$4 sm:$0xff]  }
 0x3a5   :  { %6365 = vmatmul.mubr.bf16.gmra.mrb[172].mxu0 %v12476_v51  ;;  %6766 = vmatprep.subr.bf16.mxu1 %v11204_v32  ;;  %v11220_v32 = vld [vmem:[%s15156_s5 + $0x988] ss:$48 sps:$4 sm:$0xff]  }
 0x3a6   :  { %6428 = vmatpush1.bf16.msra.mxu0 %v11199_v36  ;;  %6374 = vmatprep.mubr.bf16.mxu0 %v12513_v57  ;;  %v11222_v36 = vld [vmem:[%s15156_s5 + $0x98c] ss:$48 sps:$4 sm:$0xff]  }
 0x3a7   :  { %6704 = vmatmul.mubr.bf16.gmra.mrb[172].mxu1 %v12476_v51  ;;  %6429 = vmatprep.subr.bf16.mxu0 %v11207_v38  ;;  %v11219_v51 = vld [vmem:[%s15156_s5 + $0x984] ss:$48 sps:$4 sm:$0xff]   ;;  %v11223_v38 = vld [vmem:[%s15156_s5 + $0x9e0] ss:$48 sps:$4 sm:$0xff]  }
 0x3a8   :  { %6713 = vmatprep.mubr.bf16.mxu1 %v12513_v57  ;;  %6767 = vmatpush1.bf16.msra.mxu1 %v11202_v6  ;;  %v11217_v57 = vld [vmem:[%s15156_s5 + $0x980] ss:$48 sps:$4 sm:$0xff]   ;;  %v11225_v6 = vld [vmem:[%s15156_s5 + $0x9e4] ss:$48 sps:$4 sm:$0xff]  }
 0x3a9   :  { %6768 = vmatprep.subr.bf16.mxu1 %v11210_v41  ;;  %v11231_v41 = vld [vmem:[%s15156_s5 + $0xa44] ss:$48 sps:$4 sm:$0xff]  }
 0x3aa   :  { %6430 = vmatpush1.bf16.msra.mxu0 %v11205_v26  ;;  %v11228_v26 = vld [vmem:[%s15156_s5 + $0x9ec] ss:$48 sps:$4 sm:$0xff]  }
 0x3ab   :  { %6431 = vmatprep.subr.bf16.mxu0 %v11213_v59  ;;  %v11237_v59 = vld [vmem:[%s15156_s5 + $0xaa4] ss:$48 sps:$4 sm:$0xff]  }
 0x3ac   :  { %6769 = vmatpush1.bf16.msra.mxu1 %v11208_v22  ;;  %v11229_v22 = vld [vmem:[%s15156_s5 + $0xa40] ss:$48 sps:$4 sm:$0xff]  }
 0x3ad   :  { %6375 = vmatmul.mubr.bf16.gmra.mrb[176].mxu0 %v12510_v54  ;;  %6770 = vmatprep.subr.bf16.mxu1 %v11216_v3  ;;  %v11240_v3 = vld [vmem:[%s15156_s5 + $0xaac] ss:$48 sps:$4 sm:$0xff]  }
 0x3ae   :  { %6432 = vmatpush1.bf16.msra.mxu0 %v11211_v43  ;;  %6384 = vmatprep.mubr.bf16.mxu0 %v12549_v34  ;;  %v11232_v43 = vld [vmem:[%s15156_s5 + $0xa48] ss:$48 sps:$4 sm:$0xff]  }
 0x3af   :  { %6714 = vmatmul.mubr.bf16.gmra.mrb[176].mxu1 %v12510_v54  ;;  %6433 = vmatprep.subr.bf16.mxu0 %v11219_v51  ;;  %v11226_v54 = vld [vmem:[%s15156_s5 + $0x9e8] ss:$48 sps:$4 sm:$0xff]   ;;  %v11246_v51 = vld [vmem:[%s15156_s5 + $0xb0c] ss:$48 sps:$4 sm:$0xff]  }
 0x3b0   :  { %6723 = vmatprep.mubr.bf16.mxu1 %v12549_v34  ;;  %6771 = vmatpush1.bf16.msra.mxu1 %v11214_v44  ;;  %v11234_v34 = vld [vmem:[%s15156_s5 + $0xa4c] ss:$48 sps:$4 sm:$0xff]   ;;  %v11238_v44 = vld [vmem:[%s15156_s5 + $0xaa8] ss:$48 sps:$4 sm:$0xff]  }
 0x3b1   :  { %6772 = vmatprep.subr.bf16.mxu1 %v11222_v36  ;;  %v11249_v36 = vld [vmem:[%s15156_s5 + $0xb64] ss:$48 sps:$4 sm:$0xff]  }
 0x3b2   :  { %6434 = vmatpush1.bf16.msra.mxu0 %v11217_v57  ;;  %v11241_v57 = vld [vmem:[%s15156_s5 + $0xb00] ss:$48 sps:$4 sm:$0xff]  }
 0x3b3   :  { %6435 = vmatprep.subr.bf16.mxu0 %v11225_v6  ;;  %v11252_v6 = vld [vmem:[%s15156_s5 + $0xb6c] ss:$48 sps:$4 sm:$0xff]  }
 0x3b4   :  { %6773 = vmatpush1.bf16.msra.mxu1 %v11220_v32  ;;  %v11244_v32 = vld [vmem:[%s15156_s5 + $0xb08] ss:$48 sps:$4 sm:$0xff]  }
 0x3b5   :  { %6385 = vmatmul.mubr.bf16.gmra.mrb[180].mxu0 %v12546_v46  ;;  %6774 = vmatprep.subr.bf16.mxu1 %v11228_v26  ;;  %v11258_v26 = vld [vmem:[%s15156_s5 + $0xbcc] ss:$48 sps:$4 sm:$0xff]  }
 0x3b6   :  { %6436 = vmatpush1.bf16.msra.mxu0 %v11223_v38  ;;  %6394 = vmatprep.mubr.bf16.mxu0 %v12585_v61  ;;  %v11250_v38 = vld [vmem:[%s15156_s5 + $0xb68] ss:$48 sps:$4 sm:$0xff]  }
 0x3b7   :  { %6724 = vmatmul.mubr.bf16.gmra.mrb[180].mxu1 %v12546_v46  ;;  %6437 = vmatprep.subr.bf16.mxu0 %v11231_v41  ;;  %v11235_v46 = vld [vmem:[%s15156_s5 + $0xaa0] ss:$48 sps:$4 sm:$0xff]  }
 0x3b8   :  { %6733 = vmatprep.mubr.bf16.mxu1 %v12585_v61  ;;  %6775 = vmatpush1.bf16.msra.mxu1 %v11226_v54  ;;  %v11243_v61 = vld [vmem:[%s15156_s5 + $0xb04] ss:$48 sps:$4 sm:$0xff]   ;;  %v11253_v41 = vld [vmem:[%s15156_s5 + $0xbc0] ss:$48 sps:$4 sm:$0xff]  }
 0x3b9   :  { %6776 = vmatprep.subr.bf16.mxu1 %v11234_v34  ;;  %v11261_v54 = vld [vmem:[%s15156_s5 + $0xc24] ss:$48 sps:$4 sm:$0xff]   ;;  %v11256_v34 = vld [vmem:[%s15156_s5 + $0xbc8] ss:$48 sps:$4 sm:$0xff]  }
 0x3ba   :  { %6438 = vmatpush1.bf16.msra.mxu0 %v11229_v22  ;;  %v11276_v22 = vld [vmem:[%s15156_s5 + $0xc2c] ss:$48 sps:$4 sm:$0xff]  }
 0x3bb   :  { %6439 = vmatprep.subr.bf16.mxu0 %v11237_v59  ;;  %v11264_v59 = vld [vmem:[%s15156_s5 + $0xc84] ss:$48 sps:$4 sm:$0xff]  }
 0x3bc   :  { %6777 = vmatpush1.bf16.msra.mxu1 %v11232_v43  ;;  %v11279_v43 = vld [vmem:[%s15156_s5 + $0xc8c] ss:$48 sps:$4 sm:$0xff]  }
 0x3bd   :  { %6395 = vmatmul.mubr.bf16.gmra.mrb[184].mxu0 %v12582_v63  ;;  %6778 = vmatprep.subr.bf16.mxu1 %v11240_v3  ;;  %v11262_v3 = vld [vmem:[%s15156_s5 + $0xc80] ss:$48 sps:$4 sm:$0xff]  }
 0x3be   :  { %6440 = vmatpush1.bf16.msra.mxu0 %v11235_v46  ;;  %6404 = vmatprep.mubr.bf16.mxu0 %v12620_v19  ;;  %v11267_v46 = vld [vmem:[%s15156_s5 + $0xce4] ss:$48 sps:$4 sm:$0xff]  }
 0x3bf   :  { %6734 = vmatmul.mubr.bf16.gmra.mrb[184].mxu1 %v12582_v63  ;;  %6441 = vmatprep.subr.bf16.mxu0 %v11243_v61  ;;  %v11247_v63 = vld [vmem:[%s15156_s5 + $0xb60] ss:$48 sps:$4 sm:$0xff]   ;;  %v11277_v61 = vld [vmem:[%s15156_s5 + $0xc88] ss:$48 sps:$4 sm:$0xff]  }
 0x3c0   :  { %6743 = vmatprep.mubr.bf16.mxu1 %v12620_v19  ;;  %6779 = vmatpush1.bf16.msra.mxu1 %v11238_v44  ;;  %v11255_v19 = vld [vmem:[%s15156_s5 + $0xbc4] ss:$48 sps:$4 sm:$0xff]   ;;  %v11285_v44 = vld [vmem:[%s15156_s5 + $0xcec] ss:$48 sps:$4 sm:$0xff]  }
 0x3c1   :  { %6780 = vmatprep.subr.bf16.mxu1 %v11246_v51  ;;  %v11283_v51 = vld [vmem:[%s15156_s5 + $0xce8] ss:$48 sps:$4 sm:$0xff]  }
 0x3c2   :  { %6442 = vmatpush1.bf16.msra.mxu0 %v11241_v57  ;;  %v11288_v57 = vld [vmem:[%s15156_s5 + $0xd4c] ss:$48 sps:$4 sm:$0xff]  }
 0x3c3   :  { %6443 = vmatprep.subr.bf16.mxu0 %v11249_v36  ;;  %v11268_v36 = vld [vmem:[%s15156_s5 + $0xd40] ss:$48 sps:$4 sm:$0xff]  }
 0x3c4   :  { %6781 = vmatpush1.bf16.msra.mxu1 %v11244_v32  ;;  %v11273_v32 = vld [vmem:[%s15156_s5 + $0xda4] ss:$48 sps:$4 sm:$0xff]  }
 0x3c5   :  { %6405 = vmatmul.mubr.bf16.gmra.mrb[188].mxu0 %v12618_v49  ;;  %6782 = vmatprep.subr.bf16.mxu1 %v11252_v6  ;;  %v11286_v6 = vld [vmem:[%s15156_s5 + $0xd48] ss:$48 sps:$4 sm:$0xff]  }
 0x3c6   :  { %6444 = vmatpush1.bf16.msra.mxu0 %v11247_v63  ;;  %6447 = vmatprep.mubr.bf16.mxu0 %v12758_v21  ;;  %v11294_v63 = vld [vmem:[%s15156_s5 + $0xdac] ss:$48 sps:$4 sm:$0xff]  }
 0x3c7   :  { %6744 = vmatmul.mubr.bf16.gmra.mrb[188].mxu1 %v12618_v49  ;;  %6445 = vmatprep.subr.bf16.mxu0 %v11255_v19  ;;  %v11259_v49 = vld [vmem:[%s15156_s5 + $0xc20] ss:$48 sps:$4 sm:$0xff]   ;;  %v11292_v19 = vld [vmem:[%s15156_s5 + $0xda8] ss:$48 sps:$4 sm:$0xff]  }
 0x3c8   :  { %6783 = vmatpush1.bf16.msra.mxu1 %v11250_v38  ;;  %6786 = vmatprep.mubr.bf16.mxu1 %v12758_v21  ;;  %v11274_v21 = vld [vmem:[%s15156_s5 + $0xc28] ss:$48 sps:$4 sm:$0xff]   ;;  %v11297_v38 = vld [vmem:[%s15156_s5 + $0xe0c] ss:$48 sps:$4 sm:$0xff]  }
 0x3c9   :  { %6784 = vmatprep.subr.bf16.mxu1 %v11258_v26  ;;  %v11280_v26 = vld [vmem:[%s15156_s5 + $0xe00] ss:$48 sps:$4 sm:$0xff]  }
 0x3ca   :  { %6446 = vmatpush1.bf16.msra.mxu0 %v11253_v41  ;;  %v11291_v41 = vld [vmem:[%s15156_s5 + $0xe64] ss:$48 sps:$4 sm:$0xff]  }
 0x3cb   :  { %6528 = vmatprep.subr.bf16.mxu0 %v11261_v54  ;;  %v11295_v54 = vld [vmem:[%s15156_s5 + $0xe08] ss:$48 sps:$4 sm:$0xff]  }
 0x3cc   :  { %6785 = vmatpush1.bf16.msra.mxu1 %v11256_v34  ;;  %v11303_v34 = vld [vmem:[%s15156_s5 + $0xe6c] ss:$48 sps:$4 sm:$0xff]  }
 0x3cd   :  { %6448 = vmatmul.mubr.bf16.vlgmr.msra.gmra.mrb[160].mxu0 %v12756_v25  ;;  %6867 = vmatprep.subr.bf16.mxu1 %v11276_v22  ;;  %v11301_v22 = vld [vmem:[%s15156_s5 + $0xe68] ss:$48 sps:$4 sm:$0xff]  }
 0x3ce   :  { %6529 = vmatpush1.bf16.msra.mxu0 %v11259_v49  ;;  %6457 = vmatprep.mubr.bf16.mxu0 %v12794_v2  ;;  %v11306_v49 = vld [vmem:[%s15156_s5 + $0xecc] ss:$48 sps:$4 sm:$0xff]  }
 0x3cf   :  { %6787 = vmatmul.mubr.bf16.vlgmr.msra.gmra.mrb[160].mxu1 %v12756_v25  ;;  %6530 = vmatprep.subr.bf16.mxu0 %v11264_v59  ;;  %v11265_v25 = vld [vmem:[%s15156_s5 + $0xce0] ss:$48 sps:$4 sm:$0xff]  }
 0x3d0   :  { %6796 = vmatprep.mubr.bf16.mxu1 %v12794_v2  ;;  %6868 = vmatpush1.bf16.msra.mxu1 %v11274_v21  ;;  %v11270_v2 = vld [vmem:[%s15156_s5 + $0xd44] ss:$48 sps:$4 sm:$0xff]   ;;  %v11298_v59 = vld [vmem:[%s15156_s5 + $0xec0] ss:$48 sps:$4 sm:$0xff]  }
 0x3d1   :  { %6869 = vmatprep.subr.bf16.mxu1 %v11279_v43  ;;  %v11309_v21 = vld [vmem:[%s15158_s7 + $0x4] ss:$8 sps:$4 sm:$0xff]   ;;  %v11304_v43 = vld [vmem:[%s15156_s5 + $0xec8] ss:$48 sps:$4 sm:$0xff]  }
 0x3d2   :  { %6531 = vmatpush1.bf16.msra.mxu0 %v11262_v3  ;;  %v11322_v3 = vld [vmem:[%s15158_s7 + $0x50] ss:$8 sps:$4 sm:$0xff]  }
 0x3d3   :  { %6532 = vmatprep.subr.bf16.mxu0 %v11267_v46  ;;  %v11327_v46 = vld [vmem:[%s15158_s7 + $0x64] ss:$8 sps:$4 sm:$0xff]  }
 0x3d4   :  { %6870 = vmatpush1.bf16.msra.mxu1 %v11277_v61 }
 0x3d5   :  { %6458 = vmatmul.mubr.bf16.gmra.mrb[164].mxu0 %v12792_v42  ;;  %6871 = vmatprep.subr.bf16.mxu1 %v11285_v44  ;;  %v15235_v44 = vld [vmem:[#allocation3_spill] sm:$0xff] }
 0x3d6   :  { %6467 = vmatprep.mubr.bf16.mxu0 %v12830_v8  ;;  %6533 = vmatpush1.bf16.msra.mxu0 %v11265_v25 }
 0x3d7   :  { %6797 = vmatmul.mubr.bf16.gmra.mrb[164].mxu1 %v12792_v42  ;;  %6534 = vmatprep.subr.bf16.mxu0 %v11270_v2  ;;  %v11271_v42 = vld [vmem:[%s15156_s5 + $0xda0] ss:$48 sps:$4 sm:$0xff]  }
 0x3d8   :  { %6806 = vmatprep.mubr.bf16.mxu1 %v12830_v8  ;;  %6872 = vmatpush1.bf16.msra.mxu1 %v11283_v51  ;;  %v11282_v8 = vld [vmem:[%s15156_s5 + $0xe04] ss:$48 sps:$4 sm:$0xff]  }
 0x3d9   :  { %6873 = vmatprep.subr.bf16.mxu1 %v11288_v57  ;;  %v15236_v57 = vld [vmem:[#allocation5_spill] sm:$0xff] }
 0x3da   :  { %6535 = vmatpush1.bf16.msra.mxu0 %v11268_v36 }
 0x3db   :  { %6536 = vmatprep.subr.bf16.mxu0 %v11273_v32  ;;  %v11325_v32 = vld [vmem:[%s15158_s7 + $0x60] ss:$8 sps:$4 sm:$0xff]  }
 0x3dc   :  { %6874 = vmatpush1.bf16.msra.mxu1 %v11286_v6 }
 0x3dd   :  { %6468 = vmatmul.mubr.bf16.gmra.mrb[168].mxu0 %v12828_v62  ;;  %6875 = vmatprep.subr.bf16.mxu1 %v11294_v63 }
 0x3de   :  { %6477 = vmatprep.mubr.bf16.mxu0 %v12866_v28  ;;  %6537 = vmatpush1.bf16.msra.mxu0 %v11271_v42 }
 0x3df   :  { %6807 = vmatmul.mubr.bf16.gmra.mrb[168].mxu1 %v12828_v62  ;;  %6538 = vmatprep.subr.bf16.mxu0 %v11282_v8  ;;  %v11289_v62 = vld [vmem:[%s15156_s5 + $0xe60] ss:$48 sps:$4 sm:$0xff]   ;;  %v11330_v8 = vld [vmem:[%s15158_s7 + $0x74] ss:$8 sps:$4 sm:$0xff]  }
 0x3e0   :  { %6816 = vmatprep.mubr.bf16.mxu1 %v12866_v28  ;;  %6876 = vmatpush1.bf16.msra.mxu1 %v11292_v19  ;;  %v11300_v28 = vld [vmem:[%s15156_s5 + $0xec4] ss:$48 sps:$4 sm:$0xff]  }
 0x3e1   :  { %6877 = vmatprep.subr.bf16.mxu1 %v11297_v38 }
 0x3e2   :  { %6539 = vmatpush1.bf16.msra.mxu0 %v11280_v26 }
 0x3e3   :  { %6540 = vmatprep.subr.bf16.mxu0 %v11291_v41 }
 0x3e4   :  { %6878 = vmatpush1.bf16.msra.mxu1 %v11295_v54 }
 0x3e5   :  { %6478 = vmatmul.mubr.bf16.gmra.mrb[172].mxu0 %v12864_v14  ;;  %6879 = vmatprep.subr.bf16.mxu1 %v11303_v34 }
 0x3e6   :  { %6487 = vmatprep.mubr.bf16.mxu0 %v12902_v0  ;;  %6541 = vmatpush1.bf16.msra.mxu0 %v11289_v62  ;;  %v11328_v62 = vld [vmem:[%s15158_s7 + $0x70] ss:$8 sps:$4 sm:$0xff]  }
 0x3e7   :  { %6817 = vmatmul.mubr.bf16.gmra.mrb[172].mxu1 %v12864_v14  ;;  %6542 = vmatprep.subr.bf16.mxu0 %v11300_v28  ;;  %v11312_v14 = vld [vmem:[%s15158_s7 + $0x14] ss:$8 sps:$4 sm:$0xff]  }
 0x3e8   :  { %6826 = vmatprep.mubr.bf16.mxu1 %v12902_v0  ;;  %6880 = vmatpush1.bf16.msra.mxu1 %v11301_v22  ;;  %v11310_v0 = vld [vmem:[%s15158_s7 + $0x10] ss:$8 sps:$4 sm:$0xff]  }
 0x3e9   :  { %6881 = vmatprep.subr.bf16.mxu1 %v11306_v49 }
 0x3ea   :  { %6543 = vmatpush1.bf16.msra.mxu0 %v11298_v59 }
 0x3eb   :  { %7936 = vmatprep.subr.bf16.mxu0 %v11309_v21 }
 0x3ec   :  { %6882 = vmatpush1.bf16.msra.mxu1 %v11304_v43 }
 0x3ed   :  { %6488 = vmatmul.mubr.bf16.gmra.mrb[176].mxu0 %v12900_v29 }
 0x3ee   :  { %6497 = vmatprep.mubr.bf16.mxu0 %v15191_v20 }
 0x3ef   :  { %6827 = vmatmul.mubr.bf16.gmra.mrb[176].mxu1 %v12900_v29  ;;  %v11307_v29 = vld [vmem:[%s15158_s7] ss:$8 sps:$4 sm:$0xff]  }
 0x3f0   :  { %6836 = vmatprep.mubr.bf16.mxu1 %v15191_v20  ;;  %v11324_v20 = vld [vmem:[%s15158_s7 + $0x54] ss:$8 sps:$4 sm:$0xff]  }
 0x3f5   :  { %6498 = vmatmul.mubr.bf16.gmra.mrb[180].mxu0 %v12912_v16 }
 0x3f6   :  { %6507 = vmatprep.mubr.bf16.mxu0 %v12926_v52 }
 0x3f7   :  { %6837 = vmatmul.mubr.bf16.gmra.mrb[180].mxu1 %v12912_v16  ;;  %v11315_v16 = vld [vmem:[%s15158_s7 + $0x24] ss:$8 sps:$4 sm:$0xff]  }
 0x3f8   :  { %6846 = vmatprep.mubr.bf16.mxu1 %v12926_v52  ;;  %v11318_v52 = vld [vmem:[%s15158_s7 + $0x34] ss:$8 sps:$4 sm:$0xff]  }
 0x3fd   :  { %6508 = vmatmul.mubr.bf16.gmra.mrb[184].mxu0 %v12924_v12 }
 0x3fe   :  { %6517 = vmatprep.mubr.bf16.mxu0 %v12946_v18 }
 0x3ff   :  { %6847 = vmatmul.mubr.bf16.gmra.mrb[184].mxu1 %v12924_v12  ;;  %v11313_v12 = vld [vmem:[%s15158_s7 + $0x20] ss:$8 sps:$4 sm:$0xff]  }
 0x400   :  { %6856 = vmatprep.mubr.bf16.mxu1 %v12946_v18  ;;  %v11321_v18 = vld [vmem:[%s15158_s7 + $0x44] ss:$8 sps:$4 sm:$0xff]  }
 0x405   :  { %6518 = vmatmul.mubr.bf16.gmra.mrb[188].mxu0 %v12942_v1 }
 0x406   :  { %6560 = vmatprep.mubr.bf16.mxu0 %v15188_v13 }
 0x407   :  { %6857 = vmatmul.mubr.bf16.gmra.mrb[188].mxu1 %v12942_v1  ;;  %v11316_v1 = vld [vmem:[%s15158_s7 + $0x30] ss:$8 sps:$4 sm:$0xff]  }
 0x408   :  { %6899 = vmatprep.mubr.bf16.mxu1 %v15188_v13 }
 0x40d   :  { %6561 = vmatmul.mubr.bf16.vlgmr.msra.gmra.mrb[160].mxu0 %v12964_v24 }
 0x40e   :  { %7937 = vmatpush1.bf16.msra.mxu0 %v11307_v29  ;;  %6570 = vmatprep.mubr.bf16.mxu0 %v15188_v13 }
 0x40f   :  { %6900 = vmatmul.mubr.bf16.vlgmr.msra.gmra.mrb[160].mxu1 %v12964_v24  ;;  %7938 = vmatprep.subr.bf16.mxu0 %v11312_v14  ;;  %v11319_v24 = vld [vmem:[%s15158_s7 + $0x40] ss:$8 sps:$4 sm:$0xff]  }
 0x410   :  { %6909 = vmatprep.mubr.bf16.mxu1 %v15188_v13 }
 0x412   :  { %7939 = vmatpush1.bf16.msra.mxu0 %v11310_v0 }
 0x413   :  { %7940 = vmatprep.subr.bf16.mxu0 %v11315_v16 }
 0x415   :  { %6571 = vmatmul.mubr.bf16.gmra.mrb[164].mxu0 %v12960_v35 }
 0x416   :  { %7941 = vmatpush1.bf16.msra.mxu0 %v11313_v12  ;;  %6580 = vmatprep.mubr.bf16.mxu0 %v15188_v13 }
 0x417   :  { %6910 = vmatmul.mubr.bf16.gmra.mrb[164].mxu1 %v12960_v35  ;;  %7942 = vmatprep.subr.bf16.mxu0 %v11318_v52  ;;  %v14319_v35 = vld [vmem:[%s15159_s6] sm:$0x3f] }
 0x418   :  { %6919 = vmatprep.mubr.bf16.mxu1 %v15188_v13  ;;  %v14334_v25 = vrot.slane %v14319_v35, %v15235_v44  ;;  %v14340_v36 = vrot.slane %v14319_v35, %v15236_v57 }
 0x41a   :  { %7943 = vmatpush1.bf16.msra.mxu0 %v11316_v1  ;;  %v11336_v1 = vld [vmem:[%s15158_s7 + $0x94] ss:$8 sps:$4 sm:$0xff]  }
 0x41b   :  { %7944 = vmatprep.subr.bf16.mxu0 %v11321_v18 }
 0x41d   :  { %6581 = vmatmul.mubr.bf16.gmra.mrb[168].mxu0 %v13004_v10 }
 0x41e   :  { %7945 = vmatpush1.bf16.msra.mxu0 %v11319_v24  ;;  %6590 = vmatprep.mubr.bf16.mxu0 %v15188_v13 }
 0x41f   :  { %6920 = vmatmul.mubr.bf16.gmra.mrb[168].mxu1 %v13004_v10  ;;  %7946 = vmatprep.subr.bf16.mxu0 %v11324_v20 }
 0x420   :  { %v14329_v61 = vpop.f32.mrb[128].mxu0  ;;  %6929 = vmatprep.mubr.bf16.mxu1 %v15188_v13 }
 0x421   :  { %v14336_v2 = vpop.f32.mrb[129].mxu0 }
 0x422   :  { %v6223_v51 = vpop.f32.mrb[128].mxu1  ;;  %v14342_v10 = vpop.f32.mrb[130].mxu0  ;;  %7947 = vmatpush1.bf16.msra.mxu0 %v11322_v3 }
 0x423   :  { %v6980_v6 = vmax.f32 %v13653_v27, %v6223_v51  ;;  %v6225_v63 = vpop.f32.mrb[129].mxu1  ;;  %v14348_v42 = vpop.f32.mrb[131].mxu0  ;;  %7948 = vmatprep.subr.bf16.mxu0 %v11327_v46 }
 0x424   :  { %v6981_v19 = vmax.f32 %v13661_v48, %v6225_v63  ;;  %v6227_v38 = vpop.f32.mrb[130].mxu1 }
 0x425   :  { %v7108_v26 = vadd.f32 %v14334_v25, %v6980_v6  ;;  %v6986_v41 = vmax.f32 %v13668_v45, %v6227_v38  ;;  %v6229_v54 = vpop.f32.mrb[131].mxu1  ;;  %6591 = vmatmul.mubr.bf16.gmra.mrb[172].mxu0 %v13000_v58  ;;  %v11333_v45 = vld [vmem:[%s15158_s7 + $0x84] ss:$8 sps:$4 sm:$0xff]   ;;  %v11334_v6 = vld [vmem:[%s15158_s7 + $0x90] ss:$8 sps:$4 sm:$0xff]  }
 0x426   :  { %v7109_v27 = vadd.f32 %v14340_v36, %v6981_v19  ;;  %v6987_v34 = vmax.f32 %v13675_v55, %v6229_v54  ;;  %7949 = vmatpush1.bf16.msra.mxu0 %v11325_v32  ;;  %6600 = vmatprep.mubr.bf16.mxu0 %v15188_v13 }
 0x427   :  { %v7114_v48 = vadd.f32 %v14334_v25, %v6986_v41  ;;  %6930 = vmatmul.mubr.bf16.gmra.mrb[172].mxu1 %v13000_v58  ;;  %7950 = vmatprep.subr.bf16.mxu0 %v11330_v8  ;;  %v7204_v55 = vmax.f32 %v7108_v26, 0.0  ;;  %v11331_v58 = vld [vmem:[%s15158_s7 + $0x80] ss:$8 sps:$4 sm:$0xff]  }
 0x428   :  { %v7115_v28 = vadd.f32 %v14340_v36, %v6987_v34  ;;  %v14369_v22 = vpop.f32.mrb[132].mxu0  ;;  %6939 = vmatprep.mubr.bf16.mxu1 %v15188_v13  ;;  %v7205_v21 = vmax.f32 %v7109_v27, 0.0 }
 0x429   :  { %v7210_v49 = vmax.f32 %v7114_v48, 0.0  ;;  %v14372_v59 = vpop.f32.mrb[133].mxu0 }
 0x42a   :  { %v7211_v43 = vmax.f32 %v7115_v28, 0.0  ;;  %v6233_v29 = vpop.f32.mrb[132].mxu1  ;;  %v14374_v14 = vpop.f32.mrb[134].mxu0  ;;  %7951 = vmatpush1.bf16.msra.mxu0 %v11328_v62 }
 0x42b   :  { %v14379_v0 = vpack.c.bf16 %v7210_v49, %v7204_v55  ;;  %v6992_v16 = vmax.f32 %v13697_v60, %v6233_v29  ;;  %v6235_v12 = vpop.f32.mrb[133].mxu1  ;;  %v14382_v52 = vpop.f32.mrb[135].mxu0  ;;  %7952 = vmatprep.subr.bf16.mxu0 %v11333_v45  ;;  %v11342_v45 = vld [vmem:[%s15158_s7 + $0xb4] ss:$8 sps:$4 sm:$0xff]  }
 0x42c   :  { %v6993_v18 = vmax.f32 %v13705_v50, %v6235_v12  ;;  %v6237_v24 = vpop.f32.mrb[134].mxu1  ;;  %v14388_v20 = vpack.c.bf16 %v7211_v43, %v7205_v21 }
 0x42d   :  { %v7120_v3 = vadd.f32 %v14334_v25, %v6992_v16  ;;  %v6998_v46 = vmax.f32 %v13712_v30, %v6237_v24  ;;  %v6239_v51 = vpop.f32.mrb[135].mxu1  ;;  %6601 = vmatmul.mubr.bf16.gmra.mrb[176].mxu0 %v13044_v40  ;;  %v11339_v30 = vld [vmem:[%s15158_s7 + $0xa4] ss:$8 sps:$4 sm:$0xff]   ;;  %v15237_v16 = vld [vmem:[#allocation19_spill] sm:$0xff] }
 0x42e   :  { %v7121_v60 = vadd.f32 %v14340_v36, %v6993_v18  ;;  %v6999_v32 = vmax.f32 %v13719_v15, %v6239_v51  ;;  %7953 = vmatpush1.bf16.msra.mxu0 %v11331_v58  ;;  %6610 = vmatprep.mubr.bf16.mxu0 %v15188_v13 }
 0x42f   :  { %v7126_v50 = vadd.f32 %v14334_v25, %v6998_v46  ;;  %6940 = vmatmul.mubr.bf16.gmra.mrb[176].mxu1 %v13044_v40  ;;  %7954 = vmatprep.subr.bf16.mxu0 %v11336_v1  ;;  %v7216_v15 = vmax.f32 %v7120_v3, 0.0  ;;  %v11337_v40 = vld [vmem:[%s15158_s7 + $0xa0] ss:$8 sps:$4 sm:$0xff]   ;;  %v11340_v1 = vld [vmem:[%s15158_s7 + $0xb0] ss:$8 sps:$4 sm:$0xff]  }
 0x430   :  { %v7127_v63 = vadd.f32 %v14340_v36, %v6999_v32  ;;  %v14405_v8 = vpop.f32.mrb[136].mxu0  ;;  %6949 = vmatprep.mubr.bf16.mxu1 %v15188_v13  ;;  %v7217_v26 = vmax.f32 %v7121_v60, 0.0 }
 0x431   :  { %v7222_v19 = vmax.f32 %v7126_v50, 0.0  ;;  %v14408_v38 = vpop.f32.mrb[137].mxu0 }
 0x432   :  { %v7223_v41 = vmax.f32 %v7127_v63, 0.0  ;;  %v6243_v54 = vpop.f32.mrb[136].mxu1  ;;  %v14410_v27 = vpop.f32.mrb[138].mxu0  ;;  %7955 = vmatpush1.bf16.msra.mxu0 %v11334_v6 }
 0x433   :  { %v7004_v34 = vmax.f32 %v13741_v56, %v6243_v54  ;;  %v6245_v62 = vpop.f32.mrb[137].mxu1  ;;  %v14416_v48 = vpop.f32.mrb[139].mxu0  ;;  %7956 = vmatprep.subr.bf16.mxu0 %v11339_v30  ;;  %v14421_v28 = vpack.c.bf16 %v7222_v19, %v7216_v15  ;;  %v15238_v30 = vld [vmem:[#allocation21_spill] sm:$0xff] }
 0x434   :  { %v7005_v55 = vmax.f32 %v13749_v31, %v6245_v62  ;;  %v6247_v49 = vpop.f32.mrb[138].mxu1  ;;  %v14424_v21 = vpack.c.bf16 %v7223_v41, %v7217_v26  ;;  %v11348_v26 = vld [vmem:[%s15158_s7 + $0xd4] ss:$8 sps:$4 sm:$0xff]  }
 0x435   :  { %v7132_v43 = vadd.f32 %v14334_v25, %v7004_v34  ;;  %v7010_v29 = vmax.f32 %v13756_v4, %v6247_v49  ;;  %v6249_v56 = vpop.f32.mrb[139].mxu1  ;;  %6611 = vmatmul.mubr.bf16.gmra.mrb[180].mxu0 %v13040_v23  ;;  %v11345_v4 = vld [vmem:[%s15158_s7 + $0xc4] ss:$8 sps:$4 sm:$0xff]  }
 0x436   :  { %v7133_v58 = vadd.f32 %v14340_v36, %v7005_v55  ;;  %v7011_v12 = vmax.f32 %v15237_v16, %v6249_v56  ;;  %7957 = vmatpush1.bf16.msra.mxu0 %v11337_v40  ;;  %6620 = vmatprep.mubr.bf16.mxu0 %v15188_v13  ;;  %v15241_v56 = vld [vmem:[#allocation26_spill] sm:$0xff]  ;;  %v11346_v16 = vld [vmem:[%s15158_s7 + $0xd0] ss:$8 sps:$4 sm:$0xff]  }
 0x437   :  { %v7138_v31 = vadd.f32 %v14334_v25, %v7010_v29  ;;  %6950 = vmatmul.mubr.bf16.gmra.mrb[180].mxu1 %v13040_v23  ;;  %7958 = vmatprep.subr.bf16.mxu0 %v11342_v45  ;;  %v7228_v3 = vmax.f32 %v7132_v43, 0.0  ;;  %v11343_v23 = vld [vmem:[%s15158_s7 + $0xc0] ss:$8 sps:$4 sm:$0xff]   ;;  %v15239_v45 = vld [vmem:[#allocation24_spill] sm:$0xff] }
 0x438   :  { %v7139_v18 = vadd.f32 %v14340_v36, %v7011_v12  ;;  %v14441_v24 = vpop.f32.mrb[140].mxu0  ;;  %6959 = vmatprep.mubr.bf16.mxu1 %v15188_v13  ;;  %v7229_v60 = vmax.f32 %v7133_v58, 0.0  ;;  %v15240_v43 = vld [vmem:[#allocation8_spill] sm:$0xff]  ;;  %v11351_v12 = vld [vmem:[%s15158_s7 + $0xe4] ss:$8 sps:$4 sm:$0xff]  }
 0x439   :  { %v7234_v46 = vmax.f32 %v7138_v31, 0.0  ;;  %v14444_v51 = vpop.f32.mrb[141].mxu0 }
 0x43a   :  { %v7235_v32 = vmax.f32 %v7139_v18, 0.0  ;;  %v6253_v6 = vpop.f32.mrb[140].mxu1  ;;  %v14446_v50 = vpop.f32.mrb[142].mxu0  ;;  %7959 = vmatpush1.bf16.msra.mxu0 %v11340_v1 }
 0x43b   :  { %v7016_v63 = vmax.f32 %v15238_v30, %v6253_v6  ;;  %v6255_v15 = vpop.f32.mrb[141].mxu1  ;;  %v14452_v19 = vpop.f32.mrb[143].mxu0  ;;  %7960 = vmatprep.subr.bf16.mxu0 %v11345_v4  ;;  %v14457_v41 = vpack.c.bf16 %v7234_v46, %v7228_v3  ;;  %v15242_v30 = vld [vmem:[#allocation28_spill] sm:$0xff] }
 0x43c   :  { %v7017_v54 = vmax.f32 %v13793_v53, %v6255_v15  ;;  %v6257_v40 = vpop.f32.mrb[142].mxu1  ;;  %v14460_v34 = vpack.c.bf16 %v7235_v32, %v7229_v60 }
 0x43d   :  { %v7144_v62 = vadd.f32 %v14334_v25, %v7016_v63  ;;  %v7022_v55 = vmax.f32 %v15239_v45, %v6257_v40  ;;  %v6259_v49 = vpop.f32.mrb[143].mxu1  ;;  %6621 = vmatmul.mubr.bf16.gmra.mrb[184].mxu0 %v15240_v43 }
 0x43e   :  { %v7145_v29 = vadd.f32 %v14340_v36, %v7017_v54  ;;  %v7023_v58 = vmax.f32 %v15241_v56, %v6259_v49  ;;  %7961 = vmatpush1.bf16.msra.mxu0 %v11343_v23  ;;  %6630 = vmatprep.mubr.bf16.mxu0 %v15188_v13  ;;  %v11349_v23 = vld [vmem:[%s15158_s7 + $0xe0] ss:$8 sps:$4 sm:$0xff]  }
 0x43f   :  { %v7150_v53 = vadd.f32 %v14334_v25, %v7022_v55  ;;  %6960 = vmatmul.mubr.bf16.gmra.mrb[184].mxu1 %v15240_v43  ;;  %7962 = vmatprep.subr.bf16.mxu0 %v11348_v26  ;;  %v7240_v4 = vmax.f32 %v7144_v62, 0.0 }
 0x440   :  { %v7151_v1 = vadd.f32 %v14340_v36, %v7023_v58  ;;  %v14477_v31 = vpop.f32.mrb[144].mxu0  ;;  %6969 = vmatprep.mubr.bf16.mxu1 %v15188_v13  ;;  %v7241_v46 = vmax.f32 %v7145_v29, 0.0  ;;  %v11354_v13 = vld [vmem:[%s15158_s7 + $0xf4] ss:$8 sps:$4 sm:$0xff]  }
 0x441   :  { %v7246_v18 = vmax.f32 %v7150_v53, 0.0  ;;  %v14480_v3 = vpop.f32.mrb[145].mxu0  ;;  %v15243_v29 = vld [vmem:[#allocation7_spill] sm:$0xff]  ;;  %v15244_v58 = vld [vmem:[#allocation32_spill] sm:$0xff] }
 0x442   :  { %v7247_v60 = vmax.f32 %v7151_v1, 0.0  ;;  %v6263_v32 = vpop.f32.mrb[144].mxu1  ;;  %v14482_v6 = vpop.f32.mrb[146].mxu0  ;;  %7963 = vmatpush1.bf16.msra.mxu0 %v11346_v16 }
 0x443   :  { %v7028_v63 = vmax.f32 %v15242_v30, %v6263_v32  ;;  %v6265_v15 = vpop.f32.mrb[145].mxu1  ;;  %v14488_v26 = vpop.f32.mrb[147].mxu0  ;;  %7964 = vmatprep.subr.bf16.mxu0 %v11351_v12  ;;  %v14493_v54 = vpack.c.bf16 %v7246_v18, %v7240_v4  ;;  %v11355_v30 = vld [vmem:[%s15158_s7 + $0x100] ss:$8 sps:$4 sm:$0xff]  }
 0x444   :  { %v7029_v40 = vmax.f32 %v13837_v7, %v6265_v15  ;;  %v6267_v62 = vpop.f32.mrb[146].mxu1  ;;  %v14496_v45 = vpack.c.bf16 %v7247_v60, %v7241_v46  ;;  %v11352_v7 = vld [vmem:[%s15158_s7 + $0xf0] ss:$8 sps:$4 sm:$0xff]  }
 0x445   :  { %v7156_v55 = vadd.f32 %v14334_v25, %v7028_v63  ;;  %v7034_v49 = vmax.f32 %v13844_v47, %v6267_v62  ;;  %v6269_v43 = vpop.f32.mrb[147].mxu1  ;;  %6631 = vmatmul.mubr.bf16.gmra.mrb[188].mxu0 %v15243_v29  ;;  %v11357_v47 = vld [vmem:[%s15158_s7 + $0x104] ss:$8 sps:$4 sm:$0xff]  }
 0x446   :  { %v7157_v56 = vadd.f32 %v14340_v36, %v7029_v40  ;;  %v7035_v16 = vmax.f32 %v15244_v58, %v6269_v43  ;;  %7965 = vmatpush1.bf16.msra.mxu0 %v11349_v23  ;;  %7968 = vmatprep.mubr.bf16.mxu0 %v14388_v20  ;;  %v15245_v63 = vld [vmem:[#allocation34_spill] sm:$0xff] }
 0x447   :  { %v7162_v53 = vadd.f32 %v14334_v25, %v7034_v49  ;;  %6970 = vmatmul.mubr.bf16.gmra.mrb[188].mxu1 %v15243_v29  ;;  %7966 = vmatprep.subr.bf16.mxu0 %v11354_v13  ;;  %v7252_v4 = vmax.f32 %v7156_v55, 0.0  ;;  %v11360_v55 = vld [vmem:[%s15158_s7 + $0x114] ss:$8 sps:$4 sm:$0xff]  }
 0x448   :  { %v7163_v12 = vadd.f32 %v14340_v36, %v7035_v16  ;;  %v14513_v1 = vpop.f32.mrb[148].mxu0  ;;  %v7253_v46 = vmax.f32 %v7157_v56, 0.0  ;;  %v15246_v49 = vld [vmem:[#allocation36_spill] sm:$0xff]  ;;  %v15247_v16 = vld [vmem:[#allocation38_spill] sm:$0xff] }
 0x449   :  { %v7258_v18 = vmax.f32 %v7162_v53, 0.0  ;;  %v14515_v20 = vpop.f32.mrb[149].mxu0 }
 0x44a   :  { %v7259_v60 = vmax.f32 %v7163_v12, 0.0  ;;  %v6273_v32 = vpop.f32.mrb[148].mxu1  ;;  %v14517_v23 = vpop.f32.mrb[150].mxu0  ;;  %7967 = vmatpush1.bf16.msra.mxu0 %v11352_v7 }
 0x44b   :  { %v7040_v15 = vmax.f32 %v15245_v63, %v6273_v32  ;;  %v6275_v13 = vpop.f32.mrb[149].mxu1  ;;  %v14523_v40 = vpop.f32.mrb[151].mxu0  ;;  %v14525_v62 = vpack.c.bf16 %v7258_v18, %v7252_v4  ;;  %8049 = vmatprep.subr.bf16.mxu0 %v11357_v47  ;;  %v15248_v4 = vld [vmem:[#allocation40_spill] sm:$0xff] }
 0x44c   :  { %v7041_v43 = vmax.f32 %v15246_v49, %v6275_v13  ;;  %v6277_v29 = vpop.f32.mrb[150].mxu1  ;;  %v14531_v56 = vpack.c.bf16 %v7259_v60, %v7253_v46  ;;  %v11358_v18 = vld [vmem:[%s15158_s7 + $0x110] ss:$8 sps:$4 sm:$0xff]   ;;  %v11363_v60 = vld [vmem:[%s15158_s7 + $0x124] ss:$8 sps:$4 sm:$0xff]  }
 0x44d   :  { %v7168_v58 = vadd.f32 %v14334_v25, %v7040_v15  ;;  %v7046_v7 = vmax.f32 %v15247_v16, %v6277_v29  ;;  %v6279_v53 = vpop.f32.mrb[151].mxu1  ;;  %7969 = vmatmul.mubr.bf16.vlgmr.msra.gmra.mrb[192].mxu0 %v14379_v0  ;;  %v15249_v29 = vld [vmem:[#allocation42_spill] sm:$0xff] }
 0x44e   :  { %v7169_v12 = vadd.f32 %v14340_v36, %v7041_v43  ;;  %v7047_v47 = vmax.f32 %v15248_v4, %v6279_v53  ;;  %7978 = vmatprep.mubr.bf16.mxu0 %v14424_v21  ;;  %8050 = vmatpush1.bf16.msra.mxu0 %v11355_v30 }
 0x44f   :  { %v7174_v46 = vadd.f32 %v14334_v25, %v7046_v7  ;;  %8051 = vmatprep.subr.bf16.mxu0 %v11360_v55  ;;  %v7264_v63 = vmax.f32 %v7168_v58, 0.0  ;;  %v11361_v55 = vld [vmem:[%s15158_s7 + $0x120] ss:$8 sps:$4 sm:$0xff]   ;;  %v11366_v58 = vld [vmem:[%s15158_s7 + $0x134] ss:$8 sps:$4 sm:$0xff]  }
 0x450   :  { %v7175_v0 = vadd.f32 %v14340_v36, %v7047_v47  ;;  %v14547_v32 = vpop.f32.mrb[152].mxu0  ;;  %v7265_v21 = vmax.f32 %v7169_v12, 0.0 }
 0x451   :  { %v7270_v15 = vmax.f32 %v7174_v46, 0.0  ;;  %v14549_v13 = vpop.f32.mrb[153].mxu0 }
 0x452   :  { %v7271_v30 = vmax.f32 %v7175_v0, 0.0  ;;  %v6283_v49 = vpop.f32.mrb[152].mxu1  ;;  %v14551_v43 = vpop.f32.mrb[154].mxu0  ;;  %8052 = vmatpush1.bf16.msra.mxu0 %v11358_v18 }
 0x453   :  { %v7052_v16 = vmax.f32 %v15249_v29, %v6283_v49  ;;  %v6285_v7 = vpop.f32.mrb[153].mxu1  ;;  %v14557_v53 = vpop.f32.mrb[155].mxu0  ;;  %v14559_v4 = vpack.c.bf16 %v7270_v15, %v7264_v63  ;;  %8053 = vmatprep.subr.bf16.mxu0 %v11363_v60  ;;  %v15250_v15 = vld [vmem:[#allocation46_spill] sm:$0xff] }
 0x454   :  { %v7053_v12 = vmax.f32 %v13931_v33, %v6285_v7  ;;  %v6287_v47 = vpop.f32.mrb[154].mxu1  ;;  %v14565_v18 = vpack.c.bf16 %v7271_v30, %v7265_v21  ;;  %v11364_v33 = vld [vmem:[%s15158_s7 + $0x130] ss:$8 sps:$4 sm:$0xff]  }
 0x455   :  { %v7180_v46 = vadd.f32 %v14334_v25, %v7052_v16  ;;  %v7058_v0 = vmax.f32 %v13938_v17, %v6287_v47  ;;  %v6289_v49 = vpop.f32.mrb[155].mxu1  ;;  %7979 = vmatmul.mubr.bf16.gmra.mrb[196].mxu0 %v14421_v28  ;;  %v11369_v17 = vld [vmem:[%s15158_s7 + $0x144] ss:$8 sps:$4 sm:$0xff]  }
 0x456   :  { %v7181_v63 = vadd.f32 %v14340_v36, %v7053_v12  ;;  %v7059_v60 = vmax.f32 %v15250_v15, %v6289_v49  ;;  %7988 = vmatprep.mubr.bf16.mxu0 %v14460_v34  ;;  %8054 = vmatpush1.bf16.msra.mxu0 %v11361_v55 }
 0x457   :  { %v7186_v21 = vadd.f32 %v14334_v25, %v7058_v0  ;;  %8055 = vmatprep.subr.bf16.mxu0 %v11366_v58  ;;  %v7276_v29 = vmax.f32 %v7180_v46, 0.0  ;;  %v11367_v58 = vld [vmem:[%s15158_s7 + $0x140] ss:$8 sps:$4 sm:$0xff]   ;;  %v15252_v0 = vld [vmem:[#allocation48_spill] sm:$0xff] }
 0x458   :  { %v7187_v28 = vadd.f32 %v14340_v36, %v7059_v60  ;;  %v14581_v30 = vpop.f32.mrb[156].mxu0  ;;  %v7277_v34 = vmax.f32 %v7181_v63, 0.0  ;;  %v11372_v46 = vld [vmem:[%s15158_s7 + $0x154] ss:$8 sps:$4 sm:$0xff]  }
 0x459   :  { %v7282_v16 = vmax.f32 %v7186_v21, 0.0  ;;  %v14583_v7 = vpop.f32.mrb[157].mxu0 }
 0x45a   :  { %v7283_v55 = vmax.f32 %v7187_v28, 0.0  ;;  %v6293_v12 = vpop.f32.mrb[156].mxu1  ;;  %v14585_v47 = vpop.f32.mrb[158].mxu0  ;;  %8056 = vmatpush1.bf16.msra.mxu0 %v11364_v33 }
 0x45b   :  { %15251 = vst [vmem:[#allocation19_spill] sm:$0xff] %v14585_v47  ;;  %v7064_v49 = vmax.f32 %v15252_v0, %v6293_v12  ;;  %v6295_v15 = vpop.f32.mrb[157].mxu1  ;;  %v14591_v60 = vpop.f32.mrb[159].mxu0  ;;  %v7336_v57 = vpack.c.bf16 %v7282_v16, %v7276_v29  ;;  %8057 = vmatprep.subr.bf16.mxu0 %v11369_v17  ;;  %v11379_v0 = vld [vmem:[%s15158_s7 + $0x180] ss:$8 sps:$4 sm:$0xff]  }
 0x45c   :  { %v7065_v63 = vmax.f32 %v13975_v11, %v6295_v15  ;;  %v6297_v21 = vpop.f32.mrb[158].mxu1  ;;  %v7337_v28 = vpack.c.bf16 %v7283_v55, %v7277_v34  ;;  %v11370_v11 = vld [vmem:[%s15158_s7 + $0x150] ss:$8 sps:$4 sm:$0xff]   ;;  %v11385_v15 = vld [vmem:[%s15158_s7 + $0x1a0] ss:$8 sps:$4 sm:$0xff]  }
 0x45d   :  { %v7192_v33 = vadd.f32 %v14334_v25, %v7064_v49  ;;  %v7070_v44 = vmax.f32 %v13982_v39, %v6297_v21  ;;  %v6299_v47 = vpop.f32.mrb[159].mxu1  ;;  %7989 = vmatmul.mubr.bf16.gmra.mrb[200].mxu0 %v14457_v41  ;;  %v11375_v39 = vld [vmem:[%s15158_s7 + $0x164] ss:$8 sps:$4 sm:$0xff]   ;;  %v11394_v21 = vld [vmem:[%s15158_s7 + $0x1d0] ss:$8 sps:$4 sm:$0xff]  }
 0x45e   :  { %v7193_v12 = vadd.f32 %v14340_v36, %v7065_v63  ;;  %v7071_v29 = vmax.f32 %v13989_v9, %v6299_v47  ;;  %7998 = vmatprep.mubr.bf16.mxu0 %v14496_v45  ;;  %8058 = vmatpush1.bf16.msra.mxu0 %v11367_v58  ;;  %v11373_v45 = vld [vmem:[%s15158_s7 + $0x160] ss:$8 sps:$4 sm:$0xff]   ;;  %v11381_v58 = vld [vmem:[%s15158_s7 + $0x184] ss:$8 sps:$4 sm:$0xff]  }
 0x45f   :  { %v7198_v17 = vadd.f32 %v14334_v25, %v7070_v44  ;;  %8059 = vmatprep.subr.bf16.mxu0 %v11372_v46  ;;  %v7288_v16 = vmax.f32 %v7192_v33, 0.0  ;;  %v11378_v44 = vld [vmem:[%s15158_s7 + $0x174] ss:$8 sps:$4 sm:$0xff]   ;;  %v11387_v49 = vld [vmem:[%s15158_s7 + $0x1a4] ss:$8 sps:$4 sm:$0xff]  }
 0x460   :  { %v7199_v41 = vadd.f32 %v14340_v36, %v7071_v29  ;;  %v7289_v55 = vmax.f32 %v7193_v12, 0.0  ;;  %v11376_v36 = vld [vmem:[%s15158_s7 + $0x170] ss:$8 sps:$4 sm:$0xff]   ;;  %v11393_v46 = vld [vmem:[%s15158_s7 + $0x1c4] ss:$8 sps:$4 sm:$0xff]  }
 0x461   :  { %v7294_v34 = vmax.f32 %v7198_v17, 0.0  ;;  %v11391_v63 = vld [vmem:[%s15158_s7 + $0x1c0] ss:$8 sps:$4 sm:$0xff]   ;;  %v11400_v12 = vld [vmem:[%s15158_s7 + $0x1f0] ss:$8 sps:$4 sm:$0xff]  }
 0x462   :  { %v7295_v9 = vmax.f32 %v7199_v41, 0.0  ;;  %8060 = vmatpush1.bf16.msra.mxu0 %v11370_v11  ;;  %v11397_v33 = vld [vmem:[%s15158_s7 + $0x1e0] ss:$8 sps:$4 sm:$0xff]   ;;  %v11405_v29 = vld [vmem:[%s15158_s7 + $0x204] ss:$8 sps:$4 sm:$0xff]  }
 0x463   :  { %v7342_v47 = vpack.c.bf16 %v7294_v34, %v7288_v16  ;;  %8061 = vmatprep.subr.bf16.mxu0 %v11375_v39  ;;  %v15253_v11 = vld [vmem:[#allocation2_spill] sm:$0xff]  ;;  %v15254_v39 = vld [vmem:[#allocation4_spill] sm:$0xff] }
 0x464   :  { %v7343_v25 = vpack.c.bf16 %v7295_v9, %v7289_v55  ;;  %v7100_v17 = vsub.s32 5, %v15253_v11  ;;  %v14679_v41 = vrot.slane %v14319_v35, %v15254_v39  ;;  %v15255_v34 = vsub.s32 3, %v15253_v11  ;;  %v15256_v9 = vld [vmem:[#allocation6_spill] sm:$0xff] }
 0x465   :  { %7999 = vmatmul.mubr.bf16.gmra.mrb[204].mxu0 %v14493_v54  ;;  %v11384_v54 = vld [vmem:[%s15158_s7 + $0x194] ss:$8 sps:$4 sm:$0xff]  }
 0x466   :  { %8008 = vmatprep.mubr.bf16.mxu0 %v14531_v56  ;;  %8062 = vmatpush1.bf16.msra.mxu0 %v11373_v45  ;;  %v11382_v56 = vld [vmem:[%s15158_s7 + $0x190] ss:$8 sps:$4 sm:$0xff]   ;;  %v14684_v55 = vrot.slane %v14319_v35, %v15255_v34 }
 0x467   :  { %8063 = vmatprep.subr.bf16.mxu0 %v11378_v44 }
 0x46a   :  { %8064 = vmatpush1.bf16.msra.mxu0 %v11376_v36 }
 0x46b   :  { %8065 = vmatprep.subr.bf16.mxu0 %v11381_v58  ;;  %v15258_v58 = vld [vmem:[#allocation9_spill] sm:$0xff] }
 0x46d   :  { %8009 = vmatmul.mubr.bf16.gmra.mrb[208].mxu0 %v14525_v62  ;;  %v11390_v62 = vld [vmem:[%s15158_s7 + $0x1b4] ss:$8 sps:$4 sm:$0xff]  }
 0x46e   :  { %8018 = vmatprep.mubr.bf16.mxu0 %v14565_v18  ;;  %8066 = vmatpush1.bf16.msra.mxu0 %v11379_v0  ;;  %v11388_v18 = vld [vmem:[%s15158_s7 + $0x1b0] ss:$8 sps:$4 sm:$0xff]  }
 0x46f   :  { %8067 = vmatprep.subr.bf16.mxu0 %v11384_v54  ;;  %v14694_v54 = vrot.slane %v14319_v35, %v7100_v17 }
 0x472   :  { %8068 = vmatpush1.bf16.msra.mxu0 %v11382_v56 }
 0x473   :  { %8069 = vmatprep.subr.bf16.mxu0 %v11387_v49 }
 0x475   :  { %8019 = vmatmul.mubr.bf16.gmra.mrb[212].mxu0 %v14559_v4  ;;  %v11396_v4 = vld [vmem:[%s15158_s7 + $0x1d4] ss:$8 sps:$4 sm:$0xff]  }
 0x476   :  { %8028 = vmatprep.mubr.bf16.mxu0 %v7337_v28  ;;  %8070 = vmatpush1.bf16.msra.mxu0 %v11385_v15  ;;  %v11399_v28 = vld [vmem:[%s15158_s7 + $0x1e4] ss:$8 sps:$4 sm:$0xff]  }
 0x477   :  { %8071 = vmatprep.subr.bf16.mxu0 %v11390_v62 }
 0x47a   :  { %8072 = vmatpush1.bf16.msra.mxu0 %v11388_v18  ;;  %v15259_v18 = vld [vmem:[#allocation10_spill] sm:$0xff] }
 0x47b   :  { %8073 = vmatprep.subr.bf16.mxu0 %v11393_v46 }
 0x47d   :  { %8029 = vmatmul.mubr.bf16.gmra.mrb[216].mxu0 %v7336_v57  ;;  %v11402_v57 = vld [vmem:[%s15158_s7 + $0x1f4] ss:$8 sps:$4 sm:$0xff]  }
 0x47e   :  { %8038 = vmatprep.mubr.bf16.mxu0 %v7343_v25  ;;  %8074 = vmatpush1.bf16.msra.mxu0 %v11391_v63 }
 0x47f   :  { %8075 = vmatprep.subr.bf16.mxu0 %v11396_v4 }
 0x482   :  { %8076 = vmatpush1.bf16.msra.mxu0 %v11394_v21 }
 0x483   :  { %8077 = vmatprep.subr.bf16.mxu0 %v11399_v28 }
 0x485   :  { %8039 = vmatmul.mubr.bf16.gmra.mrb[220].mxu0 %v7342_v47  ;;  %v15257_v47 = vsub.s32 4, %v15253_v11 }
 0x486   :  { %8078 = vmatpush1.bf16.msra.mxu0 %v11397_v33  ;;  %v15260_v33 = vld [vmem:[#allocation11_spill] sm:$0xff] }
 0x487   :  { %8079 = vmatprep.subr.bf16.mxu0 %v11402_v57  ;;  %v14690_v44 = vrot.slane %v14319_v35, %v15257_v47 }
 0x48a   :  { %8080 = vmatpush1.bf16.msra.mxu0 %v11400_v12 }
 0x48b   :  { %8162 = vmatprep.subr.bf16.mxu0 %v11405_v29 }
 0x4e0   :  { %v6562_v16 = vpop.f32.mrb[160].mxu0 }
 0x4e1   :  { %v6982_v45 = vmax.f32 %v15256_v9, %v6562_v16  ;;  %v6564_v25 = vpop.f32.mrb[161].mxu0 }
 0x4e2   :  { %v6901_v36 = vpop.f32.mrb[160].mxu1  ;;  %v6983_v0 = vmax.f32 %v15258_v58, %v6564_v25  ;;  %v6566_v56 = vpop.f32.mrb[162].mxu0 }
 0x4e3   :  { %v7110_v49 = vadd.f32 %v14679_v41, %v6982_v45  ;;  %v6984_v15 = vmax.f32 %v14329_v61, %v6901_v36  ;;  %v6903_v62 = vpop.f32.mrb[161].mxu1  ;;  %v6988_v46 = vmax.f32 %v15259_v18, %v6566_v56  ;;  %v6568_v63 = vpop.f32.mrb[163].mxu0 }
 0x4e4   :  { %v7111_v4 = vadd.f32 %v14684_v55, %v6983_v0  ;;  %v6985_v21 = vmax.f32 %v14336_v2, %v6903_v62  ;;  %v6905_v28 = vpop.f32.mrb[162].mxu1  ;;  %v6989_v57 = vmax.f32 %v15260_v33, %v6568_v63  ;;  %v11451_v2 = vld [vmem:[%s15160_s9 + $0x40] sm:$0xff]   ;;  %v11453_v63 = vld [vmem:[%s15160_s9 + $0x48] sm:$0xff]  }
 0x4e5   :  { %v7206_v12 = vmax.f32 %v7110_v49, 0.0  ;;  %v7112_v35 = vadd.f32 %v14690_v44, %v6984_v15  ;;  %v7116_v29 = vadd.f32 %v14679_v41, %v6988_v46  ;;  %v6990_v11 = vmax.f32 %v14342_v10, %v6905_v28  ;;  %v6907_v17 = vpop.f32.mrb[163].mxu1  ;;  %v11403_v0 = vld [vmem:[%s15158_s7 + $0x200] ss:$8 sps:$4 sm:$0xff]   ;;  %9618 = vmatprep.subr.bf16.mxu1 %v11451_v2  ;;  %v15261_v15 = vld [vmem:[#allocation12_spill] sm:$0xff] }
 0x4e6   :  { %v7207_v61 = vmax.f32 %v7111_v4, 0.0  ;;  %v7113_v39 = vadd.f32 %v14694_v54, %v6985_v21  ;;  %v7117_v16 = vadd.f32 %v14684_v55, %v6989_v57  ;;  %v6991_v34 = vmax.f32 %v14348_v42, %v6907_v17  ;;  %v11452_v42 = vld [vmem:[%s15160_s9] sm:$0xff]   ;;  %v11408_v46 = vld [vmem:[%s15158_s7 + $0x214] ss:$8 sps:$4 sm:$0xff]   ;;  %v11454_v4 = vld [vmem:[%s15160_s9 + $0x8] sm:$0xff]  }
 0x4e7   :  { %v7208_v9 = vmax.f32 %v7112_v35, 0.0  ;;  %v7212_v45 = vmax.f32 %v7116_v29, 0.0  ;;  %v7118_v47 = vadd.f32 %v14690_v44, %v6990_v11  ;;  %v15262_v33 = vld [vmem:[#allocation13_spill] sm:$0xff]  ;;  %9619 = vmatpush3.bf16.msra.mxu1 %v11452_v42  ;;  %v11455_v29 = vld [vmem:[%s15160_s9 + $0x50] sm:$0xff]  }
 0x4e8   :  { %v7209_v25 = vmax.f32 %v7113_v39, 0.0  ;;  %v7213_v36 = vmax.f32 %v7117_v16, 0.0  ;;  %v7119_v10 = vadd.f32 %v14694_v54, %v6991_v34  ;;  %v6572_v58 = vpop.f32.mrb[164].mxu0  ;;  %v15263_v34 = vld [vmem:[#allocation14_spill] sm:$0xff]  ;;  %9620 = vmatprep.subr.bf16.mxu1 %v11453_v63 }
 0x4e9   :  { %v7302_v56 = vpack.c.bf16 %v7212_v45, %v7206_v12  ;;  %v7214_v49 = vmax.f32 %v7118_v47, 0.0  ;;  %v6994_v62 = vmax.f32 %v15261_v15, %v6572_v58  ;;  %v6574_v18 = vpop.f32.mrb[165].mxu0 }
 0x4ea   :  { %v7215_v21 = vmax.f32 %v7119_v10, 0.0  ;;  %v6911_v28 = vpop.f32.mrb[164].mxu1  ;;  %v6995_v57 = vmax.f32 %v15262_v33, %v6574_v18  ;;  %v6576_v12 = vpop.f32.mrb[166].mxu0  ;;  %v7303_v35 = vpack.c.bf16 %v7213_v36, %v7207_v61  ;;  %v15264_v10 = vld [vmem:[#allocation15_spill] sm:$0xff] }
 0x4eb   :  { %v14733_v11 = vpack.c.bf16 %v7214_v49, %v7208_v9  ;;  %v7122_v17 = vadd.f32 %v14679_v41, %v6994_v62  ;;  %v6996_v39 = vmax.f32 %v14369_v22, %v6911_v28  ;;  %v6913_v16 = vpop.f32.mrb[165].mxu1  ;;  %v7000_v2 = vmax.f32 %v15263_v34, %v6576_v12  ;;  %v6578_v45 = vpop.f32.mrb[167].mxu0  ;;  %v11406_v9 = vld [vmem:[%s15158_s7 + $0x210] ss:$8 sps:$4 sm:$0xff]   ;;  %9621 = vmatpush3.bf16.msra.mxu1 %v11454_v4  ;;  %v11409_v4 = vld [vmem:[%s15158_s7 + $0x220] ss:$8 sps:$4 sm:$0xff]  }
 0x4ec   :  { %v7123_v47 = vadd.f32 %v14684_v55, %v6995_v57  ;;  %v6997_v61 = vmax.f32 %v14372_v59, %v6913_v16  ;;  %v6915_v36 = vpop.f32.mrb[166].mxu1  ;;  %v7001_v58 = vmax.f32 %v15264_v10, %v6578_v45  ;;  %8081 = vmatprep.mubr.bf16.mxu0 %v7303_v35  ;;  %v14744_v42 = vpack.c.bf16 %v7215_v21, %v7209_v25  ;;  %v11411_v59 = vld [vmem:[%s15158_s7 + $0x224] ss:$8 sps:$4 sm:$0xff]   ;;  %v11456_v25 = vld [vmem:[%s15160_s9 + $0x10] sm:$0xff]   ;;  %v11457_v57 = vld [vmem:[%s15160_s9 + $0x58] sm:$0xff]  }
 0x4ed   :  { %v7124_v22 = vadd.f32 %v14690_v44, %v6996_v39  ;;  %v7128_v49 = vadd.f32 %v14679_v41, %v7000_v2  ;;  %v7002_v15 = vmax.f32 %v14374_v14, %v6915_v36  ;;  %v6917_v62 = vpop.f32.mrb[167].mxu1  ;;  %8082 = vmatmul.mubr.bf16.vlgmr.msra.gmra.mrb[192].mxu0 %v7302_v56  ;;  %v7218_v21 = vmax.f32 %v7122_v17, 0.0  ;;  %9622 = vmatprep.subr.bf16.mxu1 %v11455_v29  ;;  %v11458_v17 = vld [vmem:[%s15160_s9 + $0x18] sm:$0xff]   ;;  %v11459_v45 = vld [vmem:[%s15160_s9 + $0x60] sm:$0xff]  }
 0x4ee   :  { %v7125_v18 = vadd.f32 %v14694_v54, %v6997_v61  ;;  %v7129_v63 = vadd.f32 %v14684_v55, %v7001_v58  ;;  %v7003_v28 = vmax.f32 %v14382_v52, %v6917_v62  ;;  %8163 = vmatpush1.bf16.msra.mxu0 %v11403_v0  ;;  %v7219_v14 = vmax.f32 %v7123_v47, 0.0  ;;  %v11414_v2 = vld [vmem:[%s15158_s7 + $0x234] ss:$8 sps:$4 sm:$0xff]   ;;  %v15266_v10 = vld [vmem:[#allocation17_spill] sm:$0xff] }
 0x4ef   :  { %v7224_v33 = vmax.f32 %v7128_v49, 0.0  ;;  %v7130_v56 = vadd.f32 %v14690_v44, %v7002_v15  ;;  %8164 = vmatprep.subr.bf16.mxu0 %v11408_v46  ;;  %v7220_v12 = vmax.f32 %v7124_v22, 0.0  ;;  %v15265_v46 = vld [vmem:[#allocation16_spill] sm:$0xff]  ;;  %9623 = vmatpush3.bf16.msra.mxu1 %v11456_v25 }
 0x4f0   :  { %v7225_v35 = vmax.f32 %v7129_v63, 0.0  ;;  %v7131_v52 = vadd.f32 %v14694_v54, %v7003_v28  ;;  %v6582_v0 = vpop.f32.mrb[168].mxu0  ;;  %v7221_v47 = vmax.f32 %v7125_v18, 0.0  ;;  %v15267_v28 = vld [vmem:[#allocation18_spill] sm:$0xff]  ;;  %v11412_v25 = vld [vmem:[%s15158_s7 + $0x230] ss:$8 sps:$4 sm:$0xff]   ;;  %9624 = vmatprep.subr.bf16.mxu1 %v11457_v57 }
 0x4f1   :  { %v7226_v39 = vmax.f32 %v7130_v56, 0.0  ;;  %v7006_v29 = vmax.f32 %v15265_v46, %v6582_v0  ;;  %v6584_v16 = vpop.f32.mrb[169].mxu0  ;;  %v7308_v34 = vpack.c.bf16 %v7224_v33, %v7218_v21 }
 0x4f2   :  { %v7227_v61 = vmax.f32 %v7131_v52, 0.0  ;;  %v6921_v36 = vpop.f32.mrb[168].mxu1  ;;  %v7007_v58 = vmax.f32 %v15266_v10, %v6584_v16  ;;  %8165 = vmatpush1.bf16.msra.mxu0 %v11406_v9  ;;  %v6586_v22 = vpop.f32.mrb[170].mxu0  ;;  %v7309_v49 = vpack.c.bf16 %v7225_v35, %v7219_v14  ;;  %v15268_v9 = vld [vmem:[#allocation20_spill] sm:$0xff]  ;;  %v11460_v16 = vld [vmem:[%s15160_s9 + $0x20] sm:$0xff]  }
 0x4f3   :  { %v7134_v15 = vadd.f32 %v14679_v41, %v7006_v29  ;;  %v7008_v62 = vmax.f32 %v14405_v8, %v6921_v36  ;;  %v6923_v63 = vpop.f32.mrb[169].mxu1  ;;  %v7012_v21 = vmax.f32 %v15267_v28, %v6586_v22  ;;  %v6588_v33 = vpop.f32.mrb[171].mxu0  ;;  %8166 = vmatprep.subr.bf16.mxu0 %v11411_v59  ;;  %v14780_v56 = vpack.c.bf16 %v7226_v39, %v7220_v12 }
 0x4f4   :  { %v7135_v18 = vadd.f32 %v14684_v55, %v7007_v58  ;;  %v7009_v52 = vmax.f32 %v14408_v38, %v6923_v63  ;;  %v6925_v0 = vpop.f32.mrb[170].mxu1  ;;  %v7013_v46 = vmax.f32 %v15268_v9, %v6588_v33  ;;  %8091 = vmatprep.mubr.bf16.mxu0 %v7309_v49  ;;  %v14788_v8 = vpack.c.bf16 %v7227_v61, %v7221_v47  ;;  %v11415_v58 = vld [vmem:[%s15158_s7 + $0x240] ss:$8 sps:$4 sm:$0xff]   ;;  %v15270_v33 = vld [vmem:[#allocation23_spill] sm:$0xff] }
 0x4f5   :  { %v7136_v14 = vadd.f32 %v14690_v44, %v7008_v62  ;;  %v7140_v59 = vadd.f32 %v14679_v41, %v7012_v21  ;;  %v7014_v12 = vmax.f32 %v14410_v27, %v6925_v0  ;;  %v6927_v35 = vpop.f32.mrb[171].mxu1  ;;  %8092 = vmatmul.mubr.bf16.gmra.mrb[196].mxu0 %v7308_v34  ;;  %9625 = vmatpush3.bf16.msra.mxu1 %v11458_v17  ;;  %v7230_v47 = vmax.f32 %v7134_v15, 0.0  ;;  %v11417_v27 = vld [vmem:[%s15158_s7 + $0x244] ss:$8 sps:$4 sm:$0xff]  }
 0x4f6   :  { %v7137_v38 = vadd.f32 %v14694_v54, %v7009_v52  ;;  %v7141_v39 = vadd.f32 %v14684_v55, %v7013_v46  ;;  %v7015_v29 = vmax.f32 %v14416_v48, %v6927_v35  ;;  %8167 = vmatpush1.bf16.msra.mxu0 %v11409_v4  ;;  %9626 = vmatprep.subr.bf16.mxu1 %v11459_v45  ;;  %v11461_v48 = vld [vmem:[%s15160_s9 + $0x68] sm:$0xff]   ;;  %v7231_v4 = vmax.f32 %v7135_v18, 0.0 }
 0x4f7   :  { %v7236_v61 = vmax.f32 %v7140_v59, 0.0  ;;  %v7142_v36 = vadd.f32 %v14690_v44, %v7014_v12  ;;  %8168 = vmatprep.subr.bf16.mxu0 %v11414_v2  ;;  %v7232_v57 = vmax.f32 %v7136_v14, 0.0  ;;  %v11462_v2 = vld [vmem:[%s15160_s9 + $0x28] sm:$0xff]   ;;  %v15271_v59 = vld [vmem:[#allocation25_spill] sm:$0xff] }
 0x4f8   :  { %v7237_v17 = vmax.f32 %v7141_v39, 0.0  ;;  %v7143_v34 = vadd.f32 %v14694_v54, %v7015_v29  ;;  %v6592_v10 = vpop.f32.mrb[172].mxu0  ;;  %v15269_v45 = vld [vmem:[#allocation22_spill] sm:$0xff]  ;;  %v7233_v63 = vmax.f32 %v7137_v38, 0.0  ;;  %v11420_v38 = vld [vmem:[%s15158_s7 + $0x254] ss:$8 sps:$4 sm:$0xff]  }
 0x4f9   :  { %v7238_v22 = vmax.f32 %v7142_v36, 0.0  ;;  %v7018_v49 = vmax.f32 %v15269_v45, %v6592_v10  ;;  %v6594_v15 = vpop.f32.mrb[173].mxu0  ;;  %v7314_v62 = vpack.c.bf16 %v7236_v61, %v7230_v47  ;;  %9627 = vmatpush3.bf16.msra.mxu1 %v11460_v16  ;;  %v15272_v47 = vld [vmem:[#allocation27_spill] sm:$0xff] }
 0x4fa   :  { %v7239_v28 = vmax.f32 %v7143_v34, 0.0  ;;  %v6931_v21 = vpop.f32.mrb[172].mxu1  ;;  %v7019_v18 = vmax.f32 %v15270_v33, %v6594_v15  ;;  %8169 = vmatpush1.bf16.msra.mxu0 %v11412_v25  ;;  %v6596_v52 = vpop.f32.mrb[174].mxu0  ;;  %v7315_v0 = vpack.c.bf16 %v7237_v17, %v7231_v4  ;;  %v11463_v25 = vld [vmem:[%s15160_s9 + $0x70] sm:$0xff]   ;;  %9628 = vmatprep.subr.bf16.mxu1 %v11461_v48  ;;  %v11423_v15 = vld [vmem:[%s15158_s7 + $0x264] ss:$8 sps:$4 sm:$0xff]  }
 0x4fb   :  { %v7146_v9 = vadd.f32 %v14679_v41, %v7018_v49  ;;  %v7020_v46 = vmax.f32 %v14441_v24, %v6931_v21  ;;  %v6933_v14 = vpop.f32.mrb[173].mxu1  ;;  %v7024_v12 = vmax.f32 %v15271_v59, %v6596_v52  ;;  %v6598_v35 = vpop.f32.mrb[175].mxu0  ;;  %8170 = vmatprep.subr.bf16.mxu0 %v11417_v27  ;;  %v14821_v39 = vpack.c.bf16 %v7238_v22, %v7232_v57  ;;  %v11418_v22 = vld [vmem:[%s15158_s7 + $0x250] ss:$8 sps:$4 sm:$0xff]   ;;  %v15273_v21 = vld [vmem:[#allocation29_spill] sm:$0xff] }
 0x4fc   :  { %v7147_v29 = vadd.f32 %v14684_v55, %v7019_v18  ;;  %v7021_v16 = vmax.f32 %v14444_v51, %v6933_v14  ;;  %v6935_v24 = vpop.f32.mrb[174].mxu1  ;;  %v7025_v61 = vmax.f32 %v15272_v47, %v6598_v35  ;;  %8101 = vmatprep.mubr.bf16.mxu0 %v7315_v0  ;;  %v14829_v36 = vpack.c.bf16 %v7239_v28, %v7233_v63  ;;  %v11464_v45 = vld [vmem:[%s15160_s9 + $0x30] sm:$0xff]   ;;  %v15274_v14 = vld [vmem:[#allocation30_spill] sm:$0xff] }
 0x4fd   :  { %v7148_v27 = vadd.f32 %v14690_v44, %v7020_v46  ;;  %v7152_v4 = vadd.f32 %v14679_v41, %v7024_v12  ;;  %v7026_v57 = vmax.f32 %v14446_v50, %v6935_v24  ;;  %v6937_v17 = vpop.f32.mrb[175].mxu1  ;;  %8102 = vmatmul.mubr.bf16.gmra.mrb[200].mxu0 %v7314_v62  ;;  %9629 = vmatpush3.bf16.msra.mxu1 %v11462_v2  ;;  %v7242_v50 = vmax.f32 %v7146_v9, 0.0  ;;  %v15275_v24 = vld [vmem:[#allocation31_spill] sm:$0xff] }
 0x4fe   :  { %v7149_v34 = vadd.f32 %v14694_v54, %v7021_v16  ;;  %v7153_v10 = vadd.f32 %v14684_v55, %v7025_v61  ;;  %v7027_v51 = vmax.f32 %v14452_v19, %v6937_v17  ;;  %8171 = vmatpush1.bf16.msra.mxu0 %v11415_v58  ;;  %9630 = vmatprep.subr.bf16.mxu1 %v11463_v25  ;;  %v7243_v19 = vmax.f32 %v7147_v29, 0.0 }
 0x4ff   :  { %v7248_v49 = vmax.f32 %v7152_v4, 0.0  ;;  %v7154_v48 = vadd.f32 %v14690_v44, %v7026_v57  ;;  %8172 = vmatprep.subr.bf16.mxu0 %v11420_v38  ;;  %v7244_v2 = vmax.f32 %v7148_v27, 0.0  ;;  %v11421_v38 = vld [vmem:[%s15158_s7 + $0x260] ss:$8 sps:$4 sm:$0xff]   ;;  %v11426_v27 = vld [vmem:[%s15158_s7 + $0x274] ss:$8 sps:$4 sm:$0xff]  }
 0x500   :  { %v7249_v58 = vmax.f32 %v7153_v10, 0.0  ;;  %v7155_v62 = vadd.f32 %v14694_v54, %v7027_v51  ;;  %v6602_v63 = vpop.f32.mrb[176].mxu0  ;;  %v7245_v0 = vmax.f32 %v7149_v34, 0.0  ;;  %v15276_v10 = vld [vmem:[#allocation33_spill] sm:$0xff] }
 0x501   :  { %v7250_v28 = vmax.f32 %v7154_v48, 0.0  ;;  %v7030_v33 = vmax.f32 %v15273_v21, %v6602_v63  ;;  %v6604_v18 = vpop.f32.mrb[177].mxu0  ;;  %v7320_v52 = vpack.c.bf16 %v7248_v49, %v7242_v50  ;;  %9631 = vmatpush3.bf16.msra.mxu1 %v11464_v45 }
 0x502   :  { %v7251_v9 = vmax.f32 %v7155_v62, 0.0  ;;  %v6941_v46 = vpop.f32.mrb[176].mxu1  ;;  %v7031_v59 = vmax.f32 %v15274_v14, %v6604_v18  ;;  %8173 = vmatpush1.bf16.msra.mxu0 %v11418_v22  ;;  %v6606_v12 = vpop.f32.mrb[178].mxu0  ;;  %v7321_v35 = vpack.c.bf16 %v7249_v58, %v7243_v19  ;;  %v11424_v19 = vld [vmem:[%s15158_s7 + $0x270] ss:$8 sps:$4 sm:$0xff]  }
 0x503   :  { %v7158_v25 = vadd.f32 %v14679_v41, %v7030_v33  ;;  %v7032_v29 = vmax.f32 %v14477_v31, %v6941_v46  ;;  %v6943_v16 = vpop.f32.mrb[177].mxu1  ;;  %v7036_v47 = vmax.f32 %v15275_v24, %v6606_v12  ;;  %v6608_v61 = vpop.f32.mrb[179].mxu0  ;;  %8174 = vmatprep.subr.bf16.mxu0 %v11423_v15  ;;  %v14859_v4 = vpack.c.bf16 %v7250_v28, %v7244_v2 }
 0x504   :  { %v7159_v57 = vadd.f32 %v14684_v55, %v7031_v59  ;;  %v7033_v17 = vmax.f32 %v14480_v3, %v6943_v16  ;;  %v6945_v34 = vpop.f32.mrb[178].mxu1  ;;  %v7037_v51 = vmax.f32 %v15276_v10, %v6608_v61  ;;  %8111 = vmatprep.mubr.bf16.mxu0 %v7321_v35  ;;  %v14864_v31 = vpack.c.bf16 %v7251_v9, %v7245_v0  ;;  %v15278_v35 = vld [vmem:[#allocation37_spill] sm:$0xff] }
 0x505   :  { %v7160_v22 = vadd.f32 %v14690_v44, %v7032_v29  ;;  %v7164_v45 = vadd.f32 %v14679_v41, %v7036_v47  ;;  %v7038_v50 = vmax.f32 %v14482_v6, %v6945_v34  ;;  %v6947_v49 = vpop.f32.mrb[179].mxu1  ;;  %8112 = vmatmul.mubr.bf16.gmra.mrb[204].mxu0 %v7320_v52  ;;  %v7254_v58 = vmax.f32 %v7158_v25, 0.0  ;;  %v11429_v6 = vld [vmem:[%s15158_s7 + $0x284] ss:$8 sps:$4 sm:$0xff]   ;;  %v15277_v52 = vld [vmem:[#allocation35_spill] sm:$0xff] }
 0x506   :  { %v7161_v48 = vadd.f32 %v14694_v54, %v7033_v17  ;;  %v7165_v15 = vadd.f32 %v14684_v55, %v7037_v51  ;;  %v7039_v3 = vmax.f32 %v14488_v26, %v6947_v49  ;;  %8175 = vmatpush1.bf16.msra.mxu0 %v11421_v38  ;;  %v7255_v2 = vmax.f32 %v7159_v57, 0.0  ;;  %v11427_v16 = vld [vmem:[%s15158_s7 + $0x280] ss:$8 sps:$4 sm:$0xff]   ;;  %v11432_v34 = vld [vmem:[%s15158_s7 + $0x294] ss:$8 sps:$4 sm:$0xff]  }
 0x507   :  { %v7260_v62 = vmax.f32 %v7164_v45, 0.0  ;;  %v7166_v63 = vadd.f32 %v14690_v44, %v7038_v50  ;;  %8176 = vmatprep.subr.bf16.mxu0 %v11426_v27  ;;  %v7256_v26 = vmax.f32 %v7160_v22, 0.0  ;;  %v15279_v27 = vld [vmem:[#allocation39_spill] sm:$0xff]  ;;  %v15280_v50 = vld [vmem:[#allocation41_spill] sm:$0xff] }
 0x508   :  { %v7261_v28 = vmax.f32 %v7165_v15, 0.0  ;;  %v7167_v21 = vadd.f32 %v14694_v54, %v7039_v3  ;;  %v6612_v33 = vpop.f32.mrb[180].mxu0  ;;  %v7257_v14 = vmax.f32 %v7161_v48, 0.0 }
 0x509   :  { %v7262_v18 = vmax.f32 %v7166_v63, 0.0  ;;  %v7042_v0 = vmax.f32 %v15277_v52, %v6612_v33  ;;  %v6614_v9 = vpop.f32.mrb[181].mxu0  ;;  %v7326_v46 = vpack.c.bf16 %v7260_v62, %v7254_v58  ;;  %v11430_v63 = vld [vmem:[%s15158_s7 + $0x290] ss:$8 sps:$4 sm:$0xff]  }
 0x50a   :  { %v7263_v59 = vmax.f32 %v7167_v21, 0.0  ;;  %v6951_v12 = vpop.f32.mrb[180].mxu1  ;;  %v7043_v38 = vmax.f32 %v15278_v35, %v6614_v9  ;;  %8177 = vmatpush1.bf16.msra.mxu0 %v11424_v19  ;;  %v6616_v25 = vpop.f32.mrb[182].mxu0  ;;  %v7327_v29 = vpack.c.bf16 %v7261_v28, %v7255_v2 }
 0x50b   :  { %v7170_v24 = vadd.f32 %v14679_v41, %v7042_v0  ;;  %v7044_v47 = vmax.f32 %v14513_v1, %v6951_v12  ;;  %v6953_v61 = vpop.f32.mrb[181].mxu1  ;;  %v7048_v57 = vmax.f32 %v15279_v27, %v6616_v25  ;;  %v6618_v17 = vpop.f32.mrb[183].mxu0  ;;  %8178 = vmatprep.subr.bf16.mxu0 %v11429_v6  ;;  %v14891_v10 = vpack.c.bf16 %v7262_v18, %v7256_v26  ;;  %v15281_v0 = vld [vmem:[#allocation43_spill] sm:$0xff] }
 0x50c   :  { %v7171_v51 = vadd.f32 %v14684_v55, %v7043_v38  ;;  %v7045_v22 = vmax.f32 %v14515_v20, %v6953_v61  ;;  %v6955_v45 = vpop.f32.mrb[182].mxu1  ;;  %v7049_v49 = vmax.f32 %v15280_v50, %v6618_v17  ;;  %8121 = vmatprep.mubr.bf16.mxu0 %v7327_v29  ;;  %v14896_v1 = vpack.c.bf16 %v7263_v59, %v7257_v14  ;;  %v15282_v38 = vld [vmem:[#allocation44_spill] sm:$0xff] }
 0x50d   :  { %v7172_v48 = vadd.f32 %v14690_v44, %v7044_v47  ;;  %v7176_v15 = vadd.f32 %v14679_v41, %v7048_v57  ;;  %v7050_v3 = vmax.f32 %v14517_v23, %v6955_v45  ;;  %v6957_v19 = vpop.f32.mrb[183].mxu1  ;;  %8122 = vmatmul.mubr.bf16.gmra.mrb[208].mxu0 %v7326_v46  ;;  %v7266_v6 = vmax.f32 %v7170_v24, 0.0  ;;  %v11435_v23 = vld [vmem:[%s15158_s7 + $0x2a4] ss:$8 sps:$4 sm:$0xff]   ;;  %v11433_v24 = vld [vmem:[%s15158_s7 + $0x2a0] ss:$8 sps:$4 sm:$0xff]  }
 0x50e   :  { %v7173_v58 = vadd.f32 %v14694_v54, %v7045_v22  ;;  %v7177_v62 = vadd.f32 %v14684_v55, %v7049_v49  ;;  %v7051_v20 = vmax.f32 %v14523_v40, %v6957_v19  ;;  %8179 = vmatpush1.bf16.msra.mxu0 %v11427_v16  ;;  %v7267_v21 = vmax.f32 %v7171_v51, 0.0  ;;  %v15283_v57 = vld [vmem:[#allocation45_spill] sm:$0xff]  ;;  %v11438_v51 = vld [vmem:[%s15158_s7 + $0x2b4] ss:$8 sps:$4 sm:$0xff]  }
 0x50f   :  { %v7272_v2 = vmax.f32 %v7176_v15, 0.0  ;;  %v7178_v28 = vadd.f32 %v14690_v44, %v7050_v3  ;;  %8180 = vmatprep.subr.bf16.mxu0 %v11432_v34  ;;  %v7268_v40 = vmax.f32 %v7172_v48, 0.0  ;;  %v15284_v48 = vld [vmem:[#allocation47_spill] sm:$0xff] }
 0x510   :  { %v7273_v33 = vmax.f32 %v7177_v62, 0.0  ;;  %v7179_v26 = vadd.f32 %v14694_v54, %v7051_v20  ;;  %v6622_v18 = vpop.f32.mrb[184].mxu0  ;;  %v7269_v59 = vmax.f32 %v7173_v58, 0.0 }
 0x511   :  { %v7274_v52 = vmax.f32 %v7178_v28, 0.0  ;;  %v7054_v9 = vmax.f32 %v15281_v0, %v6622_v18  ;;  %v6624_v46 = vpop.f32.mrb[185].mxu0  ;;  %v7332_v14 = vpack.c.bf16 %v7272_v2, %v7266_v6  ;;  %v11436_v6 = vld [vmem:[%s15158_s7 + $0x2b0] ss:$8 sps:$4 sm:$0xff]  }
 0x512   :  { %v7275_v12 = vmax.f32 %v7179_v26, 0.0  ;;  %v6961_v35 = vpop.f32.mrb[184].mxu1  ;;  %v7055_v25 = vmax.f32 %v15282_v38, %v6624_v46  ;;  %8181 = vmatpush1.bf16.msra.mxu0 %v11430_v63  ;;  %v6626_v29 = vpop.f32.mrb[186].mxu0  ;;  %v7333_v16 = vpack.c.bf16 %v7273_v33, %v7267_v21 }
 0x513   :  { %v7182_v47 = vadd.f32 %v14679_v41, %v7054_v9  ;;  %v7056_v61 = vmax.f32 %v14547_v32, %v6961_v35  ;;  %v6963_v27 = vpop.f32.mrb[185].mxu1  ;;  %v7060_v17 = vmax.f32 %v15283_v57, %v6626_v29  ;;  %v6628_v34 = vpop.f32.mrb[187].mxu0  ;;  %8182 = vmatprep.subr.bf16.mxu0 %v11435_v23  ;;  %v14923_v22 = vpack.c.bf16 %v7274_v52, %v7268_v40  ;;  %v15285_v52 = vld [vmem:[#allocation49_spill] sm:$0xff] }
 0x514   :  { %v7183_v45 = vadd.f32 %v14684_v55, %v7055_v25  ;;  %v7057_v50 = vmax.f32 %v14549_v13, %v6963_v27  ;;  %v6965_v49 = vpop.f32.mrb[186].mxu1  ;;  %v7061_v15 = vmax.f32 %v15284_v48, %v6628_v34  ;;  %8131 = vmatprep.mubr.bf16.mxu0 %v7333_v16  ;;  %v14928_v32 = vpack.c.bf16 %v7275_v12, %v7269_v59  ;;  %v11439_v29 = vld [vmem:[%s15158_s7 + $0x2c0] ss:$8 sps:$4 sm:$0xff]   ;;  %v15287_v48 = vld [vmem:[#allocation19_spill] sm:$0xff] }
 0x515   :  { %v7184_v3 = vadd.f32 %v14690_v44, %v7056_v61  ;;  %v7188_v19 = vadd.f32 %v14679_v41, %v7060_v17  ;;  %v7062_v58 = vmax.f32 %v14551_v43, %v6965_v49  ;;  %v6967_v62 = vpop.f32.mrb[187].mxu1  ;;  %8132 = vmatmul.mubr.bf16.gmra.mrb[212].mxu0 %v7332_v14  ;;  %v7278_v2 = vmax.f32 %v7182_v47, 0.0  ;;  %v11441_v43 = vld [vmem:[%s15158_s7 + $0x2c4] ss:$8 sps:$4 sm:$0xff]  }
 0x516   :  { %v7185_v20 = vadd.f32 %v14694_v54, %v7057_v50  ;;  %v7189_v63 = vadd.f32 %v14684_v55, %v7061_v15  ;;  %v7063_v13 = vmax.f32 %v14557_v53, %v6967_v62  ;;  %8183 = vmatpush1.bf16.msra.mxu0 %v11433_v24  ;;  %v7279_v21 = vmax.f32 %v7183_v45, 0.0  ;;  %v15286_v45 = vld [vmem:[#allocation50_spill] sm:$0xff] }
 0x517   :  { %v7284_v28 = vmax.f32 %v7188_v19, 0.0  ;;  %v7190_v23 = vadd.f32 %v14690_v44, %v7062_v58  ;;  %8184 = vmatprep.subr.bf16.mxu0 %v11438_v51  ;;  %v7280_v53 = vmax.f32 %v7184_v3, 0.0 }
 0x518   :  { %v7285_v33 = vmax.f32 %v7189_v63, 0.0  ;;  %v7191_v26 = vadd.f32 %v14694_v54, %v7063_v13  ;;  %v6632_v18 = vpop.f32.mrb[188].mxu0  ;;  %v7281_v14 = vmax.f32 %v7185_v20, 0.0 }
 0x519   :  { %v7286_v40 = vmax.f32 %v7190_v23, 0.0  ;;  %v7066_v0 = vmax.f32 %v15285_v52, %v6632_v18  ;;  %v6634_v9 = vpop.f32.mrb[189].mxu0  ;;  %v7338_v46 = vpack.c.bf16 %v7284_v28, %v7278_v2 }
 0x51a   :  { %v7287_v59 = vmax.f32 %v7191_v26, 0.0  ;;  %v6971_v12 = vpop.f32.mrb[188].mxu1  ;;  %v7067_v35 = vmax.f32 %v13977_v37, %v6634_v9  ;;  %8185 = vmatpush1.bf16.msra.mxu0 %v11436_v6  ;;  %v6636_v38 = vpop.f32.mrb[190].mxu0  ;;  %v7339_v25 = vpack.c.bf16 %v7285_v33, %v7279_v21  ;;  %v11444_v37 = vld [vmem:[%s15158_s7 + $0x2d4] ss:$8 sps:$4 sm:$0xff]  }
 0x51b   :  { %v7194_v16 = vadd.f32 %v14679_v41, %v7066_v0  ;;  %v7068_v24 = vmax.f32 %v14581_v30, %v6971_v12  ;;  %v6973_v47 = vpop.f32.mrb[189].mxu1  ;;  %v7072_v61 = vmax.f32 %v13984_v5, %v6636_v38  ;;  %v6638_v27 = vpop.f32.mrb[191].mxu0  ;;  %8186 = vmatprep.subr.bf16.mxu0 %v11441_v43  ;;  %v7340_v57 = vpack.c.bf16 %v7286_v40, %v7280_v53  ;;  %v11450_v26 = vld [vmem:[%s15158_s7 + $0x2f4] ss:$8 sps:$4 sm:$0xff]  }
 0x51c   :  { %v7195_v17 = vadd.f32 %v14684_v55, %v7067_v35  ;;  %v7069_v34 = vmax.f32 %v14583_v7, %v6973_v47  ;;  %v6975_v51 = vpop.f32.mrb[190].mxu1  ;;  %v7073_v50 = vmax.f32 %v15286_v45, %v6638_v27  ;;  %8141 = vmatprep.mubr.bf16.mxu0 %v7339_v25  ;;  %v7341_v49 = vpack.c.bf16 %v7287_v59, %v7281_v14  ;;  %v11442_v7 = vld [vmem:[%s15158_s7 + $0x2d0] ss:$8 sps:$4 sm:$0xff]  }
 0x51d   :  { %v7196_v30 = vadd.f32 %v14690_v44, %v7068_v24  ;;  %v7200_v5 = vadd.f32 %v14679_v41, %v7072_v61  ;;  %v7074_v15 = vmax.f32 %v15287_v48, %v6975_v51  ;;  %v6977_v3 = vpop.f32.mrb[191].mxu1  ;;  %8142 = vmatmul.mubr.bf16.gmra.mrb[216].mxu0 %v7338_v46  ;;  %v7290_v20 = vmax.f32 %v7194_v16, 0.0  ;;  %v11447_v41 = vld [vmem:[%s15158_s7 + $0x2e4] ss:$8 sps:$4 sm:$0xff]   ;;  %v11469_v51 = vld [vmem:[%s15161_s11 + $0x10] sm:$0xff]  }
 0x51e   :  { %v7197_v19 = vadd.f32 %v14694_v54, %v7069_v34  ;;  %v7201_v58 = vadd.f32 %v14684_v55, %v7073_v50  ;;  %v7075_v62 = vmax.f32 %v14591_v60, %v6977_v3  ;;  %8187 = vmatpush1.bf16.msra.mxu0 %v11439_v29  ;;  %v7291_v6 = vmax.f32 %v7195_v17, 0.0  ;;  %v11468_v24 = vld [vmem:[%s15161_s11 + $0x8] sm:$0xff]  }
 0x51f   :  { %v7296_v63 = vmax.f32 %v7200_v5, 0.0  ;;  %v7202_v13 = vadd.f32 %v14690_v44, %v7074_v15  ;;  %8188 = vmatprep.subr.bf16.mxu0 %v11444_v37  ;;  %v7292_v28 = vmax.f32 %v7196_v30, 0.0  ;;  %v11445_v44 = vld [vmem:[%s15158_s7 + $0x2e0] ss:$8 sps:$4 sm:$0xff]  }
 0x520   :  { %v7297_v2 = vmax.f32 %v7201_v58, 0.0  ;;  %v7203_v55 = vadd.f32 %v14694_v54, %v7075_v62  ;;  %v7293_v43 = vmax.f32 %v7197_v19, 0.0  ;;  %v11448_v54 = vld [vmem:[%s15158_s7 + $0x2f0] ss:$8 sps:$4 sm:$0xff]  }
 0x521   :  { %v7298_v60 = vmax.f32 %v7202_v13, 0.0  ;;  %v7344_v23 = vpack.c.bf16 %v7296_v63, %v7290_v20 }
 0x522   :  { %v7299_v21 = vmax.f32 %v7203_v55, 0.0  ;;  %8189 = vmatpush1.bf16.msra.mxu0 %v11442_v7  ;;  %v7345_v33 = vpack.c.bf16 %v7297_v2, %v7291_v6 }
 0x523   :  { %8190 = vmatprep.subr.bf16.mxu0 %v11447_v41  ;;  %v7346_v18 = vpack.c.bf16 %v7298_v60, %v7292_v28 }
 0x524   :  { %8151 = vmatprep.mubr.bf16.mxu0 %v7345_v33  ;;  %v7347_v53 = vpack.c.bf16 %v7299_v21, %v7293_v43 }
 0x525   :  { %8152 = vmatmul.mubr.bf16.gmra.mrb[220].mxu0 %v7344_v23 }
 0x526   :  { %8191 = vmatpush1.bf16.msra.mxu0 %v11445_v44  ;;  %8194 = vmatprep.mubr.bf16.mxu0 %v14744_v42  ;;  %v11466_v42 = vld [vmem:[%s15160_s9 + $0x38] sm:$0xff]  }
 0x527   :  { %8192 = vmatprep.subr.bf16.mxu0 %v11450_v26 }
 0x52a   :  { %8193 = vmatpush1.bf16.msra.mxu0 %v11448_v54 }
 0x52d   :  { %8195 = vmatmul.mubr.bf16.vlgmr.msra.gmra.mrb[192].mxu0 %v14733_v11  ;;  %v11465_v11 = vld [vmem:[%s15160_s9 + $0x78] sm:$0xff]  }
 0x52e   :  { %8204 = vmatprep.mubr.bf16.mxu0 %v14788_v8  ;;  %9632 = vmatprep.subr.bf16.mxu1 %v11465_v11  ;;  %v7444_v8 = vld [vmem:[%s15162_s8] sm:$0x3] }
 0x52f   :  { %9633 = vmatpush3.bf16.msra.mxu1 %v11466_v42 }
 0x535   :  { %8205 = vmatmul.mubr.bf16.gmra.mrb[196].mxu0 %v14780_v56  ;;  %v11467_v56 = vld [vmem:[%s15161_s11] sm:$0xff]  }
 0x536   :  { %8214 = vmatprep.mubr.bf16.mxu0 %v14829_v36  ;;  %9754 = vmatprep.subr.bf16.mxu1 %v11467_v56 }
 0x53d   :  { %8215 = vmatmul.mubr.bf16.gmra.mrb[200].mxu0 %v14821_v39  ;;  %v15288_v39 = vld [vmem:[#allocation3_spill] sm:$0xff] }
 0x53e   :  { %8224 = vmatprep.mubr.bf16.mxu0 %v14864_v31  ;;  %v15006_v36 = vrot.slane %v7444_v8, %v15288_v39 }
 0x545   :  { %8225 = vmatmul.mubr.bf16.gmra.mrb[204].mxu0 %v14859_v4  ;;  %v15289_v4 = vld [vmem:[#allocation5_spill] sm:$0xff] }
 0x546   :  { %8234 = vmatprep.mubr.bf16.mxu0 %v14896_v1  ;;  %v15009_v31 = vrot.slane %v7444_v8, %v15289_v4 }
 0x54d   :  { %8235 = vmatmul.mubr.bf16.gmra.mrb[208].mxu0 %v14891_v10 }
 0x54e   :  { %8244 = vmatprep.mubr.bf16.mxu0 %v14928_v32 }
 0x555   :  { %8245 = vmatmul.mubr.bf16.gmra.mrb[212].mxu0 %v14923_v22 }
 0x556   :  { %8254 = vmatprep.mubr.bf16.mxu0 %v7341_v49 }
 0x55d   :  { %8255 = vmatmul.mubr.bf16.gmra.mrb[216].mxu0 %v7340_v57 }
 0x55e   :  { %8264 = vmatprep.mubr.bf16.mxu0 %v7347_v53 }
 0x565   :  { %8265 = vmatmul.mubr.bf16.gmra.mrb[220].mxu0 %v7346_v18 }
 0x600   :  { %v8196_v10 = vpop.f32.mrb[192].mxu0 }
 0x601   :  { %v9882_v1 = vadd.f32 %v8196_v10, %v15006_v36  ;;  %v8198_v22 = vpop.f32.mrb[193].mxu0 }
 0x602   :  { %v9883_v32 = vadd.f32 %v8198_v22, %v15009_v31  ;;  %v8200_v40 = vpop.f32.mrb[194].mxu0 }
 0x603   :  { %v9884_v52 = vadd.f32 %v8200_v40, %v15006_v36  ;;  %v8202_v0 = vpop.f32.mrb[195].mxu0  ;;  %v8275_v46 = vmax.f32 %v9882_v1, 0.0 }
 0x604   :  { %v9885_v9 = vadd.f32 %v8202_v0, %v15009_v31  ;;  %v8276_v59 = vmax.f32 %v9883_v32, 0.0 }
 0x605   :  { %v8277_v14 = vmax.f32 %v9884_v52, 0.0 }
 0x606   :  { %v8278_v12 = vmax.f32 %v9885_v9, 0.0 }
 0x607   :  { %v8307_v35 = vpack.c.bf16 %v8277_v14, %v8275_v46 }
 0x608   :  { %v8308_v38 = vpack.c.bf16 %v8278_v12, %v8276_v59  ;;  %v8206_v25 = vpop.f32.mrb[196].mxu0 }
 0x609   :  { %v9886_v29 = vadd.f32 %v8206_v25, %v15006_v36  ;;  %v8208_v16 = vpop.f32.mrb[197].mxu0 }
 0x60a   :  { %v9887_v47 = vadd.f32 %v8208_v16, %v15009_v31  ;;  %v8210_v61 = vpop.f32.mrb[198].mxu0  ;;  %8490 = vmatprep.mubr.bf16.mxu1 %v8308_v38 }
 0x60b   :  { %v9888_v27 = vadd.f32 %v8210_v61, %v15006_v36  ;;  %v8212_v37 = vpop.f32.mrb[199].mxu0  ;;  %8491 = vmatmul.mubr.bf16.vlgmr.msra.gmra.mrb[192].mxu1 %v8307_v35  ;;  %v8279_v17 = vmax.f32 %v9886_v29, 0.0 }
 0x60c   :  { %v9889_v57 = vadd.f32 %v8212_v37, %v15009_v31  ;;  %9755 = vmatpush3.bf16.msra.mxu1 %v11467_v56  ;;  %v8280_v45 = vmax.f32 %v9887_v47, 0.0 }
 0x60d   :  { %v8281_v34 = vmax.f32 %v9888_v27, 0.0  ;;  %9756 = vmatprep.subr.bf16.mxu1 %v11468_v24 }
 0x60e   :  { %v8282_v50 = vmax.f32 %v9889_v57, 0.0 }
 0x60f   :  { %v8309_v49 = vpack.c.bf16 %v8281_v34, %v8279_v17 }
 0x610   :  { %v8310_v30 = vpack.c.bf16 %v8282_v50, %v8280_v45  ;;  %v8216_v5 = vpop.f32.mrb[200].mxu0  ;;  %9757 = vmatpush3.bf16.msra.mxu1 %v11468_v24 }
 0x611   :  { %v9890_v48 = vadd.f32 %v8216_v5, %v15006_v36  ;;  %v8218_v15 = vpop.f32.mrb[201].mxu0  ;;  %9758 = vmatprep.subr.bf16.mxu1 %v11469_v51 }
 0x612   :  { %v9891_v3 = vadd.f32 %v8218_v15, %v15009_v31  ;;  %v8220_v19 = vpop.f32.mrb[202].mxu0  ;;  %8498 = vmatprep.mubr.bf16.mxu1 %v8310_v30 }
 0x613   :  { %v9892_v58 = vadd.f32 %v8220_v19, %v15006_v36  ;;  %v8222_v62 = vpop.f32.mrb[203].mxu0  ;;  %8499 = vmatmul.mubr.bf16.gmra.mrb[196].mxu1 %v8309_v49  ;;  %v8283_v20 = vmax.f32 %v9890_v48, 0.0 }
 0x614   :  { %v9893_v7 = vadd.f32 %v8222_v62, %v15009_v31  ;;  %9759 = vmatpush3.bf16.msra.mxu1 %v11469_v51  ;;  %v8284_v13 = vmax.f32 %v9891_v3, 0.0 }
 0x615   :  { %v8285_v63 = vmax.f32 %v9892_v58, 0.0 }
 0x616   :  { %v8286_v41 = vmax.f32 %v9893_v7, 0.0 }
 0x617   :  { %v8311_v6 = vpack.c.bf16 %v8285_v63, %v8283_v20 }
 0x618   :  { %v8312_v2 = vpack.c.bf16 %v8286_v41, %v8284_v13  ;;  %v8226_v55 = vpop.f32.mrb[204].mxu0 }
 0x619   :  { %v9894_v28 = vadd.f32 %v8226_v55, %v15006_v36  ;;  %v8228_v60 = vpop.f32.mrb[205].mxu0 }
 0x61a   :  { %v9895_v23 = vadd.f32 %v8228_v60, %v15009_v31  ;;  %v8230_v43 = vpop.f32.mrb[206].mxu0  ;;  %8506 = vmatprep.mubr.bf16.mxu1 %v8312_v2 }
 0x61b   :  { %v9896_v21 = vadd.f32 %v8230_v43, %v15006_v36  ;;  %v8232_v33 = vpop.f32.mrb[207].mxu0  ;;  %8507 = vmatmul.mubr.bf16.gmra.mrb[200].mxu1 %v8311_v6  ;;  %v8287_v26 = vmax.f32 %v9894_v28, 0.0 }
 0x61c   :  { %v9897_v44 = vadd.f32 %v8232_v33, %v15009_v31  ;;  %v8288_v53 = vmax.f32 %v9895_v23, 0.0 }
 0x61d   :  { %v8289_v18 = vmax.f32 %v9896_v21, 0.0 }
 0x61e   :  { %v8290_v54 = vmax.f32 %v9897_v44, 0.0 }
 0x61f   :  { %v8313_v11 = vpack.c.bf16 %v8289_v18, %v8287_v26  ;;  %v11470_v26 = vld [vmem:[%s15161_s11 + $0x18] sm:$0xff]   ;;  %v11473_v18 = vld [vmem:[%s15161_s11 + $0x30] sm:$0xff]  }
 0x620   :  { %v8314_v42 = vpack.c.bf16 %v8290_v54, %v8288_v53  ;;  %v8236_v56 = vpop.f32.mrb[208].mxu0  ;;  %9760 = vmatprep.subr.bf16.mxu1 %v11470_v26  ;;  %v11474_v53 = vld [vmem:[%s15161_s11 + $0x38] sm:$0xff]  }
 0x621   :  { %v9898_v8 = vadd.f32 %v8236_v56, %v15006_v36  ;;  %v8238_v39 = vpop.f32.mrb[209].mxu0  ;;  %9761 = vmatpush3.bf16.msra.mxu1 %v11470_v26 }
 0x622   :  { %v9899_v4 = vadd.f32 %v8238_v39, %v15009_v31  ;;  %v8240_v10 = vpop.f32.mrb[210].mxu0  ;;  %8514 = vmatprep.mubr.bf16.mxu1 %v8314_v42 }
 0x623   :  { %v9900_v1 = vadd.f32 %v8240_v10, %v15006_v36  ;;  %v8242_v22 = vpop.f32.mrb[211].mxu0  ;;  %8515 = vmatmul.mubr.bf16.gmra.mrb[204].mxu1 %v8313_v11  ;;  %v8291_v40 = vmax.f32 %v9898_v8, 0.0  ;;  %v15067_v11 = vld [vmem:[%s15163_s10] ss:$0 sm:$0xff] }
 0x624   :  { %v9901_v32 = vadd.f32 %v8242_v22, %v15009_v31  ;;  %v8292_v0 = vmax.f32 %v9899_v4, 0.0 }
 0x625   :  { %v8293_v52 = vmax.f32 %v9900_v1, 0.0 }
 0x626   :  { %v8294_v9 = vmax.f32 %v9901_v32, 0.0 }
 0x627   :  { %v8315_v46 = vpack.c.bf16 %v8293_v52, %v8291_v40 }
 0x628   :  { %v8316_v14 = vpack.c.bf16 %v8294_v9, %v8292_v0  ;;  %v8246_v59 = vpop.f32.mrb[212].mxu0 }
 0x629   :  { %v9902_v12 = vadd.f32 %v8246_v59, %v15006_v36  ;;  %v8248_v35 = vpop.f32.mrb[213].mxu0 }
 0x62a   :  { %v9903_v38 = vadd.f32 %v8248_v35, %v15009_v31  ;;  %v8250_v25 = vpop.f32.mrb[214].mxu0  ;;  %8522 = vmatprep.mubr.bf16.mxu1 %v8316_v14 }
 0x62b   :  { %v9904_v29 = vadd.f32 %v8250_v25, %v15006_v36  ;;  %v8252_v16 = vpop.f32.mrb[215].mxu0  ;;  %8523 = vmatmul.mubr.bf16.gmra.mrb[208].mxu1 %v8315_v46  ;;  %v8295_v47 = vmax.f32 %v9902_v12, 0.0 }
 0x62c   :  { %v9905_v24 = vadd.f32 %v8252_v16, %v15009_v31  ;;  %v8296_v27 = vmax.f32 %v9903_v38, 0.0 }
 0x62d   :  { %v8297_v61 = vmax.f32 %v9904_v29, 0.0 }
 0x62e   :  { %v8298_v37 = vmax.f32 %v9905_v24, 0.0 }
 0x62f   :  { %v8317_v57 = vpack.c.bf16 %v8297_v61, %v8295_v47 }
 0x630   :  { %v8318_v17 = vpack.c.bf16 %v8298_v37, %v8296_v27  ;;  %v8256_v34 = vpop.f32.mrb[216].mxu0 }
 0x631   :  { %v9906_v51 = vadd.f32 %v8256_v34, %v15006_v36  ;;  %v8258_v45 = vpop.f32.mrb[217].mxu0 }
 0x632   :  { %v9907_v50 = vadd.f32 %v8258_v45, %v15009_v31  ;;  %v8260_v49 = vpop.f32.mrb[218].mxu0  ;;  %8530 = vmatprep.mubr.bf16.mxu1 %v8318_v17 }
 0x633   :  { %v9908_v30 = vadd.f32 %v8260_v49, %v15006_v36  ;;  %v8262_v5 = vpop.f32.mrb[219].mxu0  ;;  %8531 = vmatmul.mubr.bf16.gmra.mrb[212].mxu1 %v8317_v57  ;;  %v8299_v15 = vmax.f32 %v9906_v51, 0.0 }
 0x634   :  { %v9909_v48 = vadd.f32 %v8262_v5, %v15009_v31  ;;  %v8300_v19 = vmax.f32 %v9907_v50, 0.0 }
 0x635   :  { %v8301_v3 = vmax.f32 %v9908_v30, 0.0 }
 0x636   :  { %v8302_v58 = vmax.f32 %v9909_v48, 0.0 }
 0x637   :  { %v8319_v62 = vpack.c.bf16 %v8301_v3, %v8299_v15 }
 0x638   :  { %v8320_v7 = vpack.c.bf16 %v8302_v58, %v8300_v19  ;;  %v8266_v20 = vpop.f32.mrb[220].mxu0 }
 0x639   :  { %v9910_v63 = vadd.f32 %v8266_v20, %v15006_v36  ;;  %v8268_v13 = vpop.f32.mrb[221].mxu0 }
 0x63a   :  { %v9911_v41 = vadd.f32 %v8268_v13, %v15009_v31  ;;  %v8270_v6 = vpop.f32.mrb[222].mxu0  ;;  %8538 = vmatprep.mubr.bf16.mxu1 %v8320_v7 }
 0x63b   :  { %v9912_v2 = vadd.f32 %v8270_v6, %v15006_v36  ;;  %v8272_v55 = vpop.f32.mrb[223].mxu0  ;;  %8539 = vmatmul.mubr.bf16.gmra.mrb[216].mxu1 %v8319_v62  ;;  %v8303_v60 = vmax.f32 %v9910_v63, 0.0  ;;  %v11471_v36 = vld [vmem:[%s15161_s11 + $0x20] sm:$0xff]  }
 0x63c   :  { %v9913_v28 = vadd.f32 %v8272_v55, %v15009_v31  ;;  %v8304_v43 = vmax.f32 %v9911_v41, 0.0  ;;  %9762 = vmatprep.subr.bf16.mxu1 %v11471_v36  ;;  %v11472_v31 = vld [vmem:[%s15161_s11 + $0x28] sm:$0xff]  }
 0x63d   :  { %v8305_v23 = vmax.f32 %v9912_v2, 0.0  ;;  %9763 = vmatpush3.bf16.msra.mxu1 %v11471_v36 }
 0x63e   :  { %v8306_v21 = vmax.f32 %v9913_v28, 0.0  ;;  %9764 = vmatprep.subr.bf16.mxu1 %v11472_v31 }
 0x63f   :  { %v8321_v33 = vpack.c.bf16 %v8305_v23, %v8303_v60 }
 0x640   :  { %v8322_v44 = vpack.c.bf16 %v8306_v21, %v8304_v43 }
 0x641   :  { %9765 = vmatpush3.bf16.msra.mxu1 %v11472_v31 }
 0x642   :  { %8546 = vmatprep.mubr.bf16.mxu1 %v8322_v44  ;;  %9766 = vmatprep.subr.bf16.mxu1 %v11473_v18 }
 0x643   :  { %8547 = vmatmul.mubr.bf16.gmra.mrb[220].mxu1 %v8321_v33 }
 0x645   :  { %9767 = vmatpush3.bf16.msra.mxu1 %v11473_v18 }
 0x646   :  { %9768 = vmatprep.subr.bf16.mxu1 %v11474_v53 }
 0x649   :  { %9769 = vmatpush3.bf16.msra.mxu1 %v11474_v53 }
 0x6de   :  { %v9634_v54 = vpop.f32.mrb[192].mxu1 }
 0x6df   :  { %v9635_v42 = vpop.f32.mrb[193].mxu1 }
 0x6e0   :  { %v9636_v56 = vadd.f32 %v9635_v42, %v9634_v54  ;;  %v9637_v8 = vpop.f32.mrb[194].mxu1 }
 0x6e1   :  { %v9638_v39 = vpop.f32.mrb[195].mxu1 }
 0x6e2   :  { %v8493_v4 = vadd.f32 %v9636_v56, %v15067_v11  ;;  %v9639_v10 = vadd.f32 %v9638_v39, %v9637_v8 }
 0x6e4   :  { %v8496_v1 = vadd.f32 %v9639_v10, %v15067_v11  ;;  %v8555_v22 = vmax.f32 %v8493_v4, 0.0 }
 0x6e6   :  { %v8556_v32 = vmax.f32 %v8496_v1, 0.0  ;;  %v9640_v40 = vpop.f32.mrb[196].mxu1 }
 0x6e7   :  { %v9641_v52 = vpop.f32.mrb[197].mxu1 }
 0x6e8   :  { %v9642_v0 = vadd.f32 %v9641_v52, %v9640_v40  ;;  %v9643_v9 = vpop.f32.mrb[198].mxu1  ;;  %v8571_v46 = vpack.c.bf16 %v8556_v32, %v8555_v22 }
 0x6e9   :  { %v9644_v14 = vpop.f32.mrb[199].mxu1 }
 0x6ea   :  { %v8501_v59 = vadd.f32 %v9642_v0, %v15067_v11  ;;  %v9645_v12 = vadd.f32 %v9644_v14, %v9643_v9  ;;  %9770 = vmatprep.mubr.bf16.mxu1 %v8571_v46 }
 0x6ec   :  { %v8504_v35 = vadd.f32 %v9645_v12, %v15067_v11  ;;  %v8557_v38 = vmax.f32 %v8501_v59, 0.0 }
 0x6ee   :  { %v8558_v25 = vmax.f32 %v8504_v35, 0.0  ;;  %v9646_v29 = vpop.f32.mrb[200].mxu1 }
 0x6ef   :  { %v9647_v16 = vpop.f32.mrb[201].mxu1 }
 0x6f0   :  { %v8572_v24 = vpack.c.bf16 %v8558_v25, %v8557_v38  ;;  %v9648_v47 = vadd.f32 %v9647_v16, %v9646_v29  ;;  %v9649_v61 = vpop.f32.mrb[202].mxu1 }
 0x6f1   :  { %v9650_v27 = vpop.f32.mrb[203].mxu1 }
 0x6f2   :  { %v8509_v37 = vadd.f32 %v9648_v47, %v15067_v11  ;;  %v9651_v57 = vadd.f32 %v9650_v27, %v9649_v61  ;;  %9771 = vmatmul.mubr.bf16.vlgmr.msra.gmra.mrb[224].mxu1 %v8572_v24  ;;  %v9517_v61 = vld [vmem:[%s15164_s12] ss:$0 sm:$0xff] }
 0x6f4   :  { %v8512_v17 = vadd.f32 %v9651_v57, %v15067_v11  ;;  %v8559_v34 = vmax.f32 %v8509_v37, 0.0 }
 0x6f6   :  { %v8560_v51 = vmax.f32 %v8512_v17, 0.0  ;;  %v9652_v45 = vpop.f32.mrb[204].mxu1 }
 0x6f7   :  { %v9653_v50 = vpop.f32.mrb[205].mxu1 }
 0x6f8   :  { %v9654_v49 = vadd.f32 %v9653_v50, %v9652_v45  ;;  %v9655_v30 = vpop.f32.mrb[206].mxu1  ;;  %v8573_v5 = vpack.c.bf16 %v8560_v51, %v8559_v34 }
 0x6f9   :  { %v9656_v48 = vpop.f32.mrb[207].mxu1 }
 0x6fa   :  { %v8517_v15 = vadd.f32 %v9654_v49, %v15067_v11  ;;  %v9657_v3 = vadd.f32 %v9656_v48, %v9655_v30  ;;  %9774 = vmatprep.mubr.bf16.mxu1 %v8573_v5 }
 0x6fc   :  { %v8520_v19 = vadd.f32 %v9657_v3, %v15067_v11  ;;  %v8561_v58 = vmax.f32 %v8517_v15, 0.0 }
 0x6fe   :  { %v8562_v62 = vmax.f32 %v8520_v19, 0.0  ;;  %v9658_v7 = vpop.f32.mrb[208].mxu1 }
 0x6ff   :  { %v9659_v20 = vpop.f32.mrb[209].mxu1 }
 0x700   :  { %v9660_v63 = vadd.f32 %v9659_v20, %v9658_v7  ;;  %v9661_v13 = vpop.f32.mrb[210].mxu1  ;;  %v8574_v41 = vpack.c.bf16 %v8562_v62, %v8561_v58 }
 0x701   :  { %v9662_v6 = vpop.f32.mrb[211].mxu1 }
 0x702   :  { %v8525_v2 = vadd.f32 %v9660_v63, %v15067_v11  ;;  %v9663_v55 = vadd.f32 %v9662_v6, %v9661_v13  ;;  %9775 = vmatmul.mubr.bf16.gmra.mrb[228].mxu1 %v8574_v41 }
 0x704   :  { %v8528_v28 = vadd.f32 %v9663_v55, %v15067_v11  ;;  %v8563_v60 = vmax.f32 %v8525_v2, 0.0 }
 0x706   :  { %v8564_v23 = vmax.f32 %v8528_v28, 0.0  ;;  %v9664_v43 = vpop.f32.mrb[212].mxu1 }
 0x707   :  { %v9665_v21 = vpop.f32.mrb[213].mxu1 }
 0x708   :  { %v9666_v33 = vadd.f32 %v9665_v21, %v9664_v43  ;;  %v9667_v44 = vpop.f32.mrb[214].mxu1  ;;  %v8575_v26 = vpack.c.bf16 %v8564_v23, %v8563_v60 }
 0x709   :  { %v9668_v36 = vpop.f32.mrb[215].mxu1 }
 0x70a   :  { %v8533_v31 = vadd.f32 %v9666_v33, %v15067_v11  ;;  %v9669_v18 = vadd.f32 %v9668_v36, %v9667_v44  ;;  %9778 = vmatprep.mubr.bf16.mxu1 %v8575_v26 }
 0x70c   :  { %v8536_v53 = vadd.f32 %v9669_v18, %v15067_v11  ;;  %v8565_v54 = vmax.f32 %v8533_v31, 0.0 }
 0x70e   :  { %v8566_v42 = vmax.f32 %v8536_v53, 0.0  ;;  %v9670_v56 = vpop.f32.mrb[216].mxu1 }
 0x70f   :  { %v9671_v8 = vpop.f32.mrb[217].mxu1 }
 0x710   :  { %v9672_v39 = vadd.f32 %v9671_v8, %v9670_v56  ;;  %v9673_v4 = vpop.f32.mrb[218].mxu1  ;;  %v8576_v10 = vpack.c.bf16 %v8566_v42, %v8565_v54 }
 0x711   :  { %v9674_v1 = vpop.f32.mrb[219].mxu1 }
 0x712   :  { %v8541_v22 = vadd.f32 %v9672_v39, %v15067_v11  ;;  %v9675_v32 = vadd.f32 %v9674_v1, %v9673_v4  ;;  %9779 = vmatmul.mubr.bf16.gmra.mrb[232].mxu1 %v8576_v10 }
 0x714   :  { %v8544_v40 = vadd.f32 %v9675_v32, %v15067_v11  ;;  %v8567_v52 = vmax.f32 %v8541_v22, 0.0 }
 0x716   :  { %v8568_v0 = vmax.f32 %v8544_v40, 0.0  ;;  %v9676_v9 = vpop.f32.mrb[220].mxu1 }
 0x717   :  { %v9677_v46 = vpop.f32.mrb[221].mxu1 }
 0x718   :  { %v9678_v14 = vadd.f32 %v9677_v46, %v9676_v9  ;;  %v9679_v59 = vpop.f32.mrb[222].mxu1  ;;  %v8577_v12 = vpack.c.bf16 %v8568_v0, %v8567_v52 }
 0x719   :  { %v9680_v35 = vpop.f32.mrb[223].mxu1 }
 0x71a   :  { %v8549_v38 = vadd.f32 %v9678_v14, %v15067_v11  ;;  %v9681_v25 = vadd.f32 %v9680_v35, %v9679_v59  ;;  %9782 = vmatprep.mubr.bf16.mxu1 %v8577_v12 }
 0x71c   :  { %v8552_v29 = vadd.f32 %v9681_v25, %v15067_v11  ;;  %v8569_v16 = vmax.f32 %v8549_v38, 0.0 }
 0x71e   :  { %v8570_v24 = vmax.f32 %v8552_v29, 0.0 }
 0x720   :  { %v8578_v47 = vpack.c.bf16 %v8570_v24, %v8569_v16 }
 0x722   :  { %9783 = vmatmul.mubr.bf16.gmra.mrb[236].mxu1 %v8578_v47 }
 0x7c5   :  { %v9772_v27 = vpop.f32.mrb[224].mxu1 }
 0x7c6   :  { %v8693_v37 = vadd.f32 %v9772_v27, %v9517_v61  ;;  %v8684_v57 = vpop.f32.mrb[225].mxu1 }
 0x7c7   :  { %v8685_v17 = vadd.f32 %v9517_v61, %v8684_v57  ;;  %v9773_v34 = vpop.f32.mrb[226].mxu1 }
 0x7c8   :  { %8750 = vst.msk [vmem:[%s15165_s13 + $0x10] sm:$0xff] %vm8747_vm1, %v8693_v37  ;;  %v8696_v11 = vadd.f32 %v9773_v34, %v9517_v61  ;;  %v8687_v51 = vpop.f32.mrb[227].mxu1 }
 0x7c9   :  { %8748 = vst.msk [vmem:[%s15165_s13] sm:$0xff] %vm8747_vm1, %v8685_v17  ;;  %v8688_v45 = vadd.f32 %v9517_v61, %v8687_v51 }
 0x7ca   :  { %8751 = vst.msk [vmem:[%s15165_s13 + $0x18] sm:$0xff] %vm8747_vm1, %v8696_v11 }
 0x7cb   :  { %8749 = vst.msk [vmem:[%s15165_s13 + $0x8] sm:$0xff] %vm8747_vm1, %v8688_v45 }
 0x7d5   :  { %v9776_v50 = vpop.f32.mrb[228].mxu1 }
 0x7d6   :  { %v8709_v49 = vadd.f32 %v9776_v50, %v9517_v61  ;;  %v8700_v30 = vpop.f32.mrb[229].mxu1 }
 0x7d7   :  { %v8701_v5 = vadd.f32 %v9517_v61, %v8700_v30  ;;  %v9777_v48 = vpop.f32.mrb[230].mxu1 }
 0x7d8   :  { %8754 = vst.msk [vmem:[%s15165_s13 + $0x30] sm:$0xff] %vm8747_vm1, %v8709_v49  ;;  %v8712_v15 = vadd.f32 %v9777_v48, %v9517_v61  ;;  %v8703_v3 = vpop.f32.mrb[231].mxu1 }
 0x7d9   :  { %8752 = vst.msk [vmem:[%s15165_s13 + $0x20] sm:$0xff] %vm8747_vm1, %v8701_v5  ;;  %v8704_v19 = vadd.f32 %v9517_v61, %v8703_v3 }
 0x7da   :  { %8755 = vst.msk [vmem:[%s15165_s13 + $0x38] sm:$0xff] %vm8747_vm1, %v8712_v15 }
 0x7db   :  { %8753 = vst.msk [vmem:[%s15165_s13 + $0x28] sm:$0xff] %vm8747_vm1, %v8704_v19 }
 0x7e5   :  { %v9780_v58 = vpop.f32.mrb[232].mxu1 }
 0x7e6   :  { %v8725_v62 = vadd.f32 %v9780_v58, %v9517_v61  ;;  %v8716_v7 = vpop.f32.mrb[233].mxu1 }
 0x7e7   :  { %v8717_v20 = vadd.f32 %v9517_v61, %v8716_v7  ;;  %v9781_v63 = vpop.f32.mrb[234].mxu1 }
 0x7e8   :  { %8758 = vst.msk [vmem:[%s15165_s13 + $0x50] sm:$0xff] %vm8747_vm1, %v8725_v62  ;;  %v8728_v13 = vadd.f32 %v9781_v63, %v9517_v61  ;;  %v8719_v41 = vpop.f32.mrb[235].mxu1 }
 0x7e9   :  { %8756 = vst.msk [vmem:[%s15165_s13 + $0x40] sm:$0xff] %vm8747_vm1, %v8717_v20  ;;  %v8720_v6 = vadd.f32 %v9517_v61, %v8719_v41 }
 0x7ea   :  { %8759 = vst.msk [vmem:[%s15165_s13 + $0x58] sm:$0xff] %vm8747_vm1, %v8728_v13 }
 0x7eb   :  { %8757 = vst.msk [vmem:[%s15165_s13 + $0x48] sm:$0xff] %vm8747_vm1, %v8720_v6 }
 0x7f5   :  { %v9784_v2 = vpop.f32.mrb[236].mxu1 }
 0x7f6   :  { %v8741_v55 = vadd.f32 %v9784_v2, %v9517_v61  ;;  %v8732_v28 = vpop.f32.mrb[237].mxu1 }
 0x7f7   :  { %v8733_v60 = vadd.f32 %v9517_v61, %v8732_v28  ;;  %v9785_v23 = vpop.f32.mrb[238].mxu1 }
 0x7f8   :  { %8762 = vst.msk [vmem:[%s15165_s13 + $0x70] sm:$0xff] %vm8747_vm1, %v8741_v55  ;;  %v8744_v43 = vadd.f32 %v9785_v23, %v9517_v61  ;;  %v8735_v21 = vpop.f32.mrb[239].mxu1 }
 0x7f9   :  { %8760 = vst.msk [vmem:[%s15165_s13 + $0x60] sm:$0xff] %vm8747_vm1, %v8733_v60  ;;  %v8736_v33 = vadd.f32 %v9517_v61, %v8735_v21 }
 0x7fa   :  { %8763 = vst.msk [vmem:[%s15165_s13 + $0x78] sm:$0xff] %vm8747_vm1, %v8744_v43 }
 0x7fb   :  { %8761 = vst.msk [vmem:[%s15165_s13 + $0x68] sm:$0xff] %vm8747_vm1, %v8736_v33 }

</bundles_post_ra>
